<compile_context>
chip_gen: v6e
topology: v6e:2x2x1
jax: 0.10.0
libtpu: 0.0.40
codegen_flags: <defaults>
</compile_context>

<pallas_src>
import functools

import jax
import jax.numpy as jnp
import numpy as np
from jax.experimental import pallas as pl
from jax.experimental.pallas import tpu as pltpu


def _cconv_kernel(x_ref, w_ref, b_ref, o_ref, *,
                  KH, KW, Cin, Cout, sh, sw, dil, tHo, Wo):
    """One (batch, Ho-tile) grid step.

    x_ref: (Cin, Hp, Wp)      full padded image of this batch element (VMEM)
    w_ref: (KH*KW*Cin*Cout,)  combined complex weight, f32 scalars (SMEM)
    b_ref: (Cout,)            combined complex bias, f32 scalars (SMEM)
    o_ref: (Cout, tHo, Wo)    output tile (VMEM); lane dim = W (time frames)
    """
    h = pl.program_id(1)
    row0 = pl.multiple_of(h * (tHo * sh), tHo * sh)

    # f32 accumulators with the bias folded into the init; Cout is small so
    # they stay register-resident for tHo = 8.
    acc = [jnp.full((tHo, Wo), b_ref[co], dtype=jnp.float32)
           for co in range(Cout)]

    # Each input tap slab is loaded from VMEM once and fanned out to all Cout
    # accumulators as scalar-weight FMAs on the VPU (no MXU, no relayouts).
    for kh in range(KH):
        r_start = row0 + kh * dil
        rsl = pl.ds(r_start, tHo) if sh == 1 else pl.ds(r_start, tHo, sh)
        for kw in range(KW):
            csl = pl.ds(kw * dil, Wo) if sw == 1 else pl.ds(kw * dil, Wo, sw)
            for ci in range(Cin):
                tap = x_ref[ci, rsl, csl]              # (tHo, Wo), native dtype
                base = ((kh * KW + kw) * Cin + ci) * Cout
                for co in range(Cout):
                    acc[co] = acc[co] + w_ref[base + co] * tap

    for co in range(Cout):
        o_ref[co] = acc[co].astype(o_ref.dtype)


def complex_conv2d(x_nchw, w_real, w_imag, b_real, b_imag, *,
                   kernel_size=(3, 3), stride=(1, 1), padding=(1, 1),
                   dilation=1, causal=True):
    """x_nchw: [N, Cin, H, W] with Cin = 2 * Cin_half (real half, imag half).

    w_real/w_imag: PyTorch layout [Cout_half, Cin_half, KH, KW].
    b_real/b_imag: [Cout_half].
    Returns [N, Cout, Ho, Wo] with Cout = 2 * Cout_half (NCHW, like PyTorch).
    """
    # TODO(synk): groups != 1 not implemented (module default groups=1).
    # TODO(synk): for large channel counts switch to an MXU im2col path; this
    #             scalar-FMA formulation targets MTFAA's small-channel
    #             ComplexConv2d layers (Cin*Cout*KH*KW unrolled in the trace).
    N, Cin, H, W = x_nchw.shape
    KH, KW = kernel_size
    sh, sw = stride
    ph, pw = padding
    dil = int(dilation)
    cin_h = Cin // 2
    cout_h = w_real.shape[0]
    Cout = 2 * cout_h

    # ---- padding (matches the PyTorch forward); single HBM pass, no transposes.
    wpad = (pw, 0) if (pw != 0 and causal) else (pw, pw)
    x_p = jnp.pad(x_nchw, ((0, 0), (0, 0), (ph, ph), wpad))
    Hp = H + 2 * ph
    Wp = W + wpad[0] + wpad[1]
    Ho = (Hp - dil * (KH - 1) - 1) // sh + 1
    Wo = (Wp - dil * (KW - 1) - 1) // sw + 1

    # ---- combined complex weight [KH, KW, Cin, Cout] and bias [Cout] (f32 SMEM).
    wr = jnp.transpose(w_real, (2, 3, 1, 0)).astype(jnp.float32)  # [KH,KW,cin_h,cout_h]
    wi = jnp.transpose(w_imag, (2, 3, 1, 0)).astype(jnp.float32)
    w_full = jnp.concatenate(
        [jnp.concatenate([wr, wi], axis=-1),        # real inputs -> [ W_r |  W_i]
         jnp.concatenate([-wi, wr], axis=-1)],      # imag inputs -> [-W_i |  W_r]
        axis=2)                                     # [KH, KW, Cin, Cout]
    w_flat = w_full.reshape(-1)                     # idx = ((kh*KW+kw)*Cin+ci)*Cout+co
    b_full = jnp.concatenate([b_real - b_imag, b_real + b_imag]).astype(jnp.float32)

    # ---- H tiling: tHo=8 keeps accumulators in vregs and yields >= 2*N
    #      parallel grid items (feeds both v7x TensorCores).
    tHo = 8 if Ho % 8 == 0 else Ho
    nH = Ho // tHo

    def _rup(v, m):
        return -(-v // m) * m

    itemsize = jnp.dtype(x_nchw.dtype).itemsize
    in_tile_bytes = Cin * _rup(Hp, 8) * _rup(Wp, 128) * itemsize
    out_tile_bytes = Cout * _rup(tHo, 8) * _rup(Wo, 128) * itemsize
    vmem_limit = int(min(max(2 * (in_tile_bytes + out_tile_bytes) + (4 << 20),
                             32 << 20), 64 << 20))

    cost = pl.CostEstimate(
        flops=2 * N * Ho * Wo * KH * KW * Cin * Cout,
        transcendentals=0,
        bytes_accessed=int(x_p.size * itemsize + N * Cout * Ho * Wo * itemsize
                           + w_flat.size * 4 + b_full.size * 4))

    kernel = functools.partial(_cconv_kernel, KH=KH, KW=KW, Cin=Cin, Cout=Cout,
                               sh=sh, sw=sw, dil=dil, tHo=tHo, Wo=Wo)

    return pl.pallas_call(
        kernel,
        out_shape=jax.ShapeDtypeStruct((N, Cout, Ho, Wo), x_nchw.dtype),
        grid_spec=pltpu.PrefetchScalarGridSpec(
            num_scalar_prefetch=0,
            grid=(N, nH),
            in_specs=[
                # Full padded image of one batch element; block index is
                # constant in h, so it is DMA'd once per batch element and
                # stays VMEM-resident across the Ho tiles.
                pl.BlockSpec((None, Cin, Hp, Wp), lambda n, h: (n, 0, 0, 0)),
                pl.BlockSpec(memory_space=pltpu.MemorySpace.SMEM),   # weights
                pl.BlockSpec(memory_space=pltpu.MemorySpace.SMEM),   # bias
            ],
            out_specs=pl.BlockSpec((None, Cout, tHo, Wo),
                                   lambda n, h: (n, 0, h, 0)),
        ),
        compiler_params=pltpu.CompilerParams(
            dimension_semantics=("parallel", "parallel"),
            vmem_limit_bytes=vmem_limit),
        cost_estimate=cost,
    )(x_p, w_flat, b_full)


def _reference(x_nchw, w_real, w_imag, b_real, b_imag, *, kernel_size, stride,
               padding, dilation, causal):
    """Pure-JAX reference using lax.conv_general_dilated (mirrors PyTorch)."""
    ph, pw = padding
    if pw != 0 and causal:
        x_nchw = jnp.pad(x_nchw, ((0, 0), (0, 0), (0, 0), (pw, 0)))
    else:
        x_nchw = jnp.pad(x_nchw, ((0, 0), (0, 0), (0, 0), (pw, pw)))
    xr, xi = jnp.split(x_nchw, 2, axis=1)

    def conv(x, w, b):
        y = jax.lax.conv_general_dilated(
            x, w, window_strides=stride, padding=[(ph, ph), (0, 0)],
            rhs_dilation=(dilation, dilation),
            dimension_numbers=("NCHW", "OIHW", "NCHW"))
        return y + b[None, :, None, None]

    r2r = conv(xr, w_real, b_real)
    i2i = conv(xi, w_imag, b_imag)
    r2i = conv(xr, w_imag, b_imag)
    i2r = conv(xi, w_real, b_real)
    return jnp.concatenate([r2r - i2i, r2i + i2r], axis=1)


if __name__ == "__main__":
    key = jax.random.PRNGKey(0)
    k_x, k_wr, k_wi, k_br, k_bi = jax.random.split(key, 5)

    # Module config (small; 3x3 kernel so the conv is non-trivial).
    in_channels, out_channels = 4, 8
    kernel_size, stride, padding, dilation, causal = (3, 3), (1, 1), (1, 1), 1, True
    cin_h, cout_h = in_channels // 2, out_channels // 2

    x = jax.random.normal(k_x, (2, in_channels, 16, 16), jnp.float32)

    # nn.init.normal_(std=0.05) on weights; small nonzero biases so the bias
    # path (b_r - b_i, b_r + b_i) is actually exercised.
    w_real = 0.05 * jax.random.normal(k_wr, (cout_h, cin_h, *kernel_size), jnp.float32)
    w_imag = 0.05 * jax.random.normal(k_wi, (cout_h, cin_h, *kernel_size), jnp.float32)
    b_real = 0.1 * jax.random.normal(k_br, (cout_h,), jnp.float32)
    b_imag = 0.1 * jax.random.normal(k_bi, (cout_h,), jnp.float32)

    out = complex_conv2d(x, w_real, w_imag, b_real, b_imag,
                         kernel_size=kernel_size, stride=stride,
                         padding=padding, dilation=dilation, causal=causal)
    out = jax.block_until_ready(out)

    ref = _reference(x, w_real, w_imag, b_real, b_imag,
                     kernel_size=kernel_size, stride=stride,
                     padding=padding, dilation=dilation, causal=causal)
    np.testing.assert_allclose(np.asarray(out), np.asarray(ref),
                               rtol=1e-4, atol=1e-4)
    print("KERNEL_OK")
</pallas_src>

<mosaic_0001>
module attributes {stable_mosaic.version = 11 : i64} {
  func.func @_cconv_kernel(%arg0: i32, %arg1: i32, %arg2: memref<1x4x18x17xf32, #tpu.memory_space<vmem>>, %arg3: memref<288xf32, #tpu.memory_space<smem>>, %arg4: memref<8xf32, #tpu.memory_space<smem>>, %arg5: memref<1x8x8x15xf32, #tpu.memory_space<vmem>>) attributes {dimension_semantics = [#tpu.dimension_semantics<parallel>, #tpu.dimension_semantics<parallel>], iteration_bounds = array<i64: 2, 2>, scalar_prefetch = 0 : i64, scratch_operands = 0 : i64, tpu.core_type = #tpu.core_type<tc>, window_params = [{transform_indices = @transform_0, window_bounds = array<i64: 1, 4, 18, 17>}, {transform_indices = @transform_1, window_bounds = array<i64: 288>}, {transform_indices = @transform_2, window_bounds = array<i64: 8>}, {transform_indices = @transform_3, window_bounds = array<i64: 1, 8, 8, 15>}]} {
    %c8_i32 = arith.constant 8 : i32
    %0 = arith.muli %arg1, %c8_i32 : i32
    %1 = tpu.assume_multiple %0, 8 : i32
    %c0 = arith.constant 0 : index
    %2 = memref.load %arg4[%c0] : memref<8xf32, #tpu.memory_space<smem>>
    %3 = vector.broadcast %2 : f32 to vector<8x15xf32>
    %c1 = arith.constant 1 : index
    %4 = memref.load %arg4[%c1] : memref<8xf32, #tpu.memory_space<smem>>
    %5 = vector.broadcast %4 : f32 to vector<8x15xf32>
    %c2 = arith.constant 2 : index
    %6 = memref.load %arg4[%c2] : memref<8xf32, #tpu.memory_space<smem>>
    %7 = vector.broadcast %6 : f32 to vector<8x15xf32>
    %c3 = arith.constant 3 : index
    %8 = memref.load %arg4[%c3] : memref<8xf32, #tpu.memory_space<smem>>
    %9 = vector.broadcast %8 : f32 to vector<8x15xf32>
    %c4 = arith.constant 4 : index
    %10 = memref.load %arg4[%c4] : memref<8xf32, #tpu.memory_space<smem>>
    %11 = vector.broadcast %10 : f32 to vector<8x15xf32>
    %c5 = arith.constant 5 : index
    %12 = memref.load %arg4[%c5] : memref<8xf32, #tpu.memory_space<smem>>
    %13 = vector.broadcast %12 : f32 to vector<8x15xf32>
    %c6 = arith.constant 6 : index
    %14 = memref.load %arg4[%c6] : memref<8xf32, #tpu.memory_space<smem>>
    %15 = vector.broadcast %14 : f32 to vector<8x15xf32>
    %c7 = arith.constant 7 : index
    %16 = memref.load %arg4[%c7] : memref<8xf32, #tpu.memory_space<smem>>
    %17 = vector.broadcast %16 : f32 to vector<8x15xf32>
    %c0_i32 = arith.constant 0 : i32
    %18 = arith.addi %1, %c0_i32 : i32
    %c0_0 = arith.constant 0 : index
    %c0_1 = arith.constant 0 : index
    %19 = arith.index_cast %18 : i32 to index
    %c0_2 = arith.constant 0 : index
    %20 = vector.load %arg2[%c0_0, %c0_1, %19, %c0_2] : memref<1x4x18x17xf32, #tpu.memory_space<vmem>>, vector<1x1x8x15xf32>
    %21 = vector.shape_cast %20 : vector<1x1x8x15xf32> to vector<8x15xf32>
    %c0_3 = arith.constant 0 : index
    %22 = memref.load %arg3[%c0_3] : memref<288xf32, #tpu.memory_space<smem>>
    %23 = vector.broadcast %22 : f32 to vector<8x15xf32>
    %24 = arith.mulf %23, %21 : vector<8x15xf32>
    %25 = arith.addf %3, %24 : vector<8x15xf32>
    %c1_4 = arith.constant 1 : index
    %26 = memref.load %arg3[%c1_4] : memref<288xf32, #tpu.memory_space<smem>>
    %27 = vector.broadcast %26 : f32 to vector<8x15xf32>
    %28 = arith.mulf %27, %21 : vector<8x15xf32>
    %29 = arith.addf %5, %28 : vector<8x15xf32>
    %c2_5 = arith.constant 2 : index
    %30 = memref.load %arg3[%c2_5] : memref<288xf32, #tpu.memory_space<smem>>
    %31 = vector.broadcast %30 : f32 to vector<8x15xf32>
    %32 = arith.mulf %31, %21 : vector<8x15xf32>
    %33 = arith.addf %7, %32 : vector<8x15xf32>
    %c3_6 = arith.constant 3 : index
    %34 = memref.load %arg3[%c3_6] : memref<288xf32, #tpu.memory_space<smem>>
    %35 = vector.broadcast %34 : f32 to vector<8x15xf32>
    %36 = arith.mulf %35, %21 : vector<8x15xf32>
    %37 = arith.addf %9, %36 : vector<8x15xf32>
    %c4_7 = arith.constant 4 : index
    %38 = memref.load %arg3[%c4_7] : memref<288xf32, #tpu.memory_space<smem>>
    %39 = vector.broadcast %38 : f32 to vector<8x15xf32>
    %40 = arith.mulf %39, %21 : vector<8x15xf32>
    %41 = arith.addf %11, %40 : vector<8x15xf32>
    %c5_8 = arith.constant 5 : index
    %42 = memref.load %arg3[%c5_8] : memref<288xf32, #tpu.memory_space<smem>>
    %43 = vector.broadcast %42 : f32 to vector<8x15xf32>
    %44 = arith.mulf %43, %21 : vector<8x15xf32>
    %45 = arith.addf %13, %44 : vector<8x15xf32>
    %c6_9 = arith.constant 6 : index
    %46 = memref.load %arg3[%c6_9] : memref<288xf32, #tpu.memory_space<smem>>
    %47 = vector.broadcast %46 : f32 to vector<8x15xf32>
    %48 = arith.mulf %47, %21 : vector<8x15xf32>
    %49 = arith.addf %15, %48 : vector<8x15xf32>
    %c7_10 = arith.constant 7 : index
    %50 = memref.load %arg3[%c7_10] : memref<288xf32, #tpu.memory_space<smem>>
    %51 = vector.broadcast %50 : f32 to vector<8x15xf32>
    %52 = arith.mulf %51, %21 : vector<8x15xf32>
    %53 = arith.addf %17, %52 : vector<8x15xf32>
    %c0_11 = arith.constant 0 : index
    %c1_12 = arith.constant 1 : index
    %54 = arith.index_cast %18 : i32 to index
    %c0_13 = arith.constant 0 : index
    %55 = vector.load %arg2[%c0_11, %c1_12, %54, %c0_13] : memref<1x4x18x17xf32, #tpu.memory_space<vmem>>, vector<1x1x8x15xf32>
    %56 = vector.shape_cast %55 : vector<1x1x8x15xf32> to vector<8x15xf32>
    %c8 = arith.constant 8 : index
    %57 = memref.load %arg3[%c8] : memref<288xf32, #tpu.memory_space<smem>>
    %58 = vector.broadcast %57 : f32 to vector<8x15xf32>
    %59 = arith.mulf %58, %56 : vector<8x15xf32>
    %60 = arith.addf %25, %59 : vector<8x15xf32>
    %c9 = arith.constant 9 : index
    %61 = memref.load %arg3[%c9] : memref<288xf32, #tpu.memory_space<smem>>
    %62 = vector.broadcast %61 : f32 to vector<8x15xf32>
    %63 = arith.mulf %62, %56 : vector<8x15xf32>
    %64 = arith.addf %29, %63 : vector<8x15xf32>
    %c10 = arith.constant 10 : index
    %65 = memref.load %arg3[%c10] : memref<288xf32, #tpu.memory_space<smem>>
    %66 = vector.broadcast %65 : f32 to vector<8x15xf32>
    %67 = arith.mulf %66, %56 : vector<8x15xf32>
    %68 = arith.addf %33, %67 : vector<8x15xf32>
    %c11 = arith.constant 11 : index
    %69 = memref.load %arg3[%c11] : memref<288xf32, #tpu.memory_space<smem>>
    %70 = vector.broadcast %69 : f32 to vector<8x15xf32>
    %71 = arith.mulf %70, %56 : vector<8x15xf32>
    %72 = arith.addf %37, %71 : vector<8x15xf32>
    %c12 = arith.constant 12 : index
    %73 = memref.load %arg3[%c12] : memref<288xf32, #tpu.memory_space<smem>>
    %74 = vector.broadcast %73 : f32 to vector<8x15xf32>
    %75 = arith.mulf %74, %56 : vector<8x15xf32>
    %76 = arith.addf %41, %75 : vector<8x15xf32>
    %c13 = arith.constant 13 : index
    %77 = memref.load %arg3[%c13] : memref<288xf32, #tpu.memory_space<smem>>
    %78 = vector.broadcast %77 : f32 to vector<8x15xf32>
    %79 = arith.mulf %78, %56 : vector<8x15xf32>
    %80 = arith.addf %45, %79 : vector<8x15xf32>
    %c14 = arith.constant 14 : index
    %81 = memref.load %arg3[%c14] : memref<288xf32, #tpu.memory_space<smem>>
    %82 = vector.broadcast %81 : f32 to vector<8x15xf32>
    %83 = arith.mulf %82, %56 : vector<8x15xf32>
    %84 = arith.addf %49, %83 : vector<8x15xf32>
    %c15 = arith.constant 15 : index
    %85 = memref.load %arg3[%c15] : memref<288xf32, #tpu.memory_space<smem>>
    %86 = vector.broadcast %85 : f32 to vector<8x15xf32>
    %87 = arith.mulf %86, %56 : vector<8x15xf32>
    %88 = arith.addf %53, %87 : vector<8x15xf32>
    %c0_14 = arith.constant 0 : index
    %c2_15 = arith.constant 2 : index
    %89 = arith.index_cast %18 : i32 to index
    %c0_16 = arith.constant 0 : index
    %90 = vector.load %arg2[%c0_14, %c2_15, %89, %c0_16] : memref<1x4x18x17xf32, #tpu.memory_space<vmem>>, vector<1x1x8x15xf32>
    %91 = vector.shape_cast %90 : vector<1x1x8x15xf32> to vector<8x15xf32>
    %c16 = arith.constant 16 : index
    %92 = memref.load %arg3[%c16] : memref<288xf32, #tpu.memory_space<smem>>
    %93 = vector.broadcast %92 : f32 to vector<8x15xf32>
    %94 = arith.mulf %93, %91 : vector<8x15xf32>
    %95 = arith.addf %60, %94 : vector<8x15xf32>
    %c17 = arith.constant 17 : index
    %96 = memref.load %arg3[%c17] : memref<288xf32, #tpu.memory_space<smem>>
    %97 = vector.broadcast %96 : f32 to vector<8x15xf32>
    %98 = arith.mulf %97, %91 : vector<8x15xf32>
    %99 = arith.addf %64, %98 : vector<8x15xf32>
    %c18 = arith.constant 18 : index
    %100 = memref.load %arg3[%c18] : memref<288xf32, #tpu.memory_space<smem>>
    %101 = vector.broadcast %100 : f32 to vector<8x15xf32>
    %102 = arith.mulf %101, %91 : vector<8x15xf32>
    %103 = arith.addf %68, %102 : vector<8x15xf32>
    %c19 = arith.constant 19 : index
    %104 = memref.load %arg3[%c19] : memref<288xf32, #tpu.memory_space<smem>>
    %105 = vector.broadcast %104 : f32 to vector<8x15xf32>
    %106 = arith.mulf %105, %91 : vector<8x15xf32>
    %107 = arith.addf %72, %106 : vector<8x15xf32>
    %c20 = arith.constant 20 : index
    %108 = memref.load %arg3[%c20] : memref<288xf32, #tpu.memory_space<smem>>
    %109 = vector.broadcast %108 : f32 to vector<8x15xf32>
    %110 = arith.mulf %109, %91 : vector<8x15xf32>
    %111 = arith.addf %76, %110 : vector<8x15xf32>
    %c21 = arith.constant 21 : index
    %112 = memref.load %arg3[%c21] : memref<288xf32, #tpu.memory_space<smem>>
    %113 = vector.broadcast %112 : f32 to vector<8x15xf32>
    %114 = arith.mulf %113, %91 : vector<8x15xf32>
    %115 = arith.addf %80, %114 : vector<8x15xf32>
    %c22 = arith.constant 22 : index
    %116 = memref.load %arg3[%c22] : memref<288xf32, #tpu.memory_space<smem>>
    %117 = vector.broadcast %116 : f32 to vector<8x15xf32>
    %118 = arith.mulf %117, %91 : vector<8x15xf32>
    %119 = arith.addf %84, %118 : vector<8x15xf32>
    %c23 = arith.constant 23 : index
    %120 = memref.load %arg3[%c23] : memref<288xf32, #tpu.memory_space<smem>>
    %121 = vector.broadcast %120 : f32 to vector<8x15xf32>
    %122 = arith.mulf %121, %91 : vector<8x15xf32>
    %123 = arith.addf %88, %122 : vector<8x15xf32>
    %c0_17 = arith.constant 0 : index
    %c3_18 = arith.constant 3 : index
    %124 = arith.index_cast %18 : i32 to index
    %c0_19 = arith.constant 0 : index
    %125 = vector.load %arg2[%c0_17, %c3_18, %124, %c0_19] : memref<1x4x18x17xf32, #tpu.memory_space<vmem>>, vector<1x1x8x15xf32>
    %126 = vector.shape_cast %125 : vector<1x1x8x15xf32> to vector<8x15xf32>
    %c24 = arith.constant 24 : index
    %127 = memref.load %arg3[%c24] : memref<288xf32, #tpu.memory_space<smem>>
    %128 = vector.broadcast %127 : f32 to vector<8x15xf32>
    %129 = arith.mulf %128, %126 : vector<8x15xf32>
    %130 = arith.addf %95, %129 : vector<8x15xf32>
    %c25 = arith.constant 25 : index
    %131 = memref.load %arg3[%c25] : memref<288xf32, #tpu.memory_space<smem>>
    %132 = vector.broadcast %131 : f32 to vector<8x15xf32>
    %133 = arith.mulf %132, %126 : vector<8x15xf32>
    %134 = arith.addf %99, %133 : vector<8x15xf32>
    %c26 = arith.constant 26 : index
    %135 = memref.load %arg3[%c26] : memref<288xf32, #tpu.memory_space<smem>>
    %136 = vector.broadcast %135 : f32 to vector<8x15xf32>
    %137 = arith.mulf %136, %126 : vector<8x15xf32>
    %138 = arith.addf %103, %137 : vector<8x15xf32>
    %c27 = arith.constant 27 : index
    %139 = memref.load %arg3[%c27] : memref<288xf32, #tpu.memory_space<smem>>
    %140 = vector.broadcast %139 : f32 to vector<8x15xf32>
    %141 = arith.mulf %140, %126 : vector<8x15xf32>
    %142 = arith.addf %107, %141 : vector<8x15xf32>
    %c28 = arith.constant 28 : index
    %143 = memref.load %arg3[%c28] : memref<288xf32, #tpu.memory_space<smem>>
    %144 = vector.broadcast %143 : f32 to vector<8x15xf32>
    %145 = arith.mulf %144, %126 : vector<8x15xf32>
    %146 = arith.addf %111, %145 : vector<8x15xf32>
    %c29 = arith.constant 29 : index
    %147 = memref.load %arg3[%c29] : memref<288xf32, #tpu.memory_space<smem>>
    %148 = vector.broadcast %147 : f32 to vector<8x15xf32>
    %149 = arith.mulf %148, %126 : vector<8x15xf32>
    %150 = arith.addf %115, %149 : vector<8x15xf32>
    %c30 = arith.constant 30 : index
    %151 = memref.load %arg3[%c30] : memref<288xf32, #tpu.memory_space<smem>>
    %152 = vector.broadcast %151 : f32 to vector<8x15xf32>
    %153 = arith.mulf %152, %126 : vector<8x15xf32>
    %154 = arith.addf %119, %153 : vector<8x15xf32>
    %c31 = arith.constant 31 : index
    %155 = memref.load %arg3[%c31] : memref<288xf32, #tpu.memory_space<smem>>
    %156 = vector.broadcast %155 : f32 to vector<8x15xf32>
    %157 = arith.mulf %156, %126 : vector<8x15xf32>
    %158 = arith.addf %123, %157 : vector<8x15xf32>
    %c0_20 = arith.constant 0 : index
    %c0_21 = arith.constant 0 : index
    %159 = arith.index_cast %18 : i32 to index
    %c1_22 = arith.constant 1 : index
    %160 = vector.load %arg2[%c0_20, %c0_21, %159, %c1_22] : memref<1x4x18x17xf32, #tpu.memory_space<vmem>>, vector<1x1x8x15xf32>
    %161 = vector.shape_cast %160 : vector<1x1x8x15xf32> to vector<8x15xf32>
    %c32 = arith.constant 32 : index
    %162 = memref.load %arg3[%c32] : memref<288xf32, #tpu.memory_space<smem>>
    %163 = vector.broadcast %162 : f32 to vector<8x15xf32>
    %164 = arith.mulf %163, %161 : vector<8x15xf32>
    %165 = arith.addf %130, %164 : vector<8x15xf32>
    %c33 = arith.constant 33 : index
    %166 = memref.load %arg3[%c33] : memref<288xf32, #tpu.memory_space<smem>>
    %167 = vector.broadcast %166 : f32 to vector<8x15xf32>
    %168 = arith.mulf %167, %161 : vector<8x15xf32>
    %169 = arith.addf %134, %168 : vector<8x15xf32>
    %c34 = arith.constant 34 : index
    %170 = memref.load %arg3[%c34] : memref<288xf32, #tpu.memory_space<smem>>
    %171 = vector.broadcast %170 : f32 to vector<8x15xf32>
    %172 = arith.mulf %171, %161 : vector<8x15xf32>
    %173 = arith.addf %138, %172 : vector<8x15xf32>
    %c35 = arith.constant 35 : index
    %174 = memref.load %arg3[%c35] : memref<288xf32, #tpu.memory_space<smem>>
    %175 = vector.broadcast %174 : f32 to vector<8x15xf32>
    %176 = arith.mulf %175, %161 : vector<8x15xf32>
    %177 = arith.addf %142, %176 : vector<8x15xf32>
    %c36 = arith.constant 36 : index
    %178 = memref.load %arg3[%c36] : memref<288xf32, #tpu.memory_space<smem>>
    %179 = vector.broadcast %178 : f32 to vector<8x15xf32>
    %180 = arith.mulf %179, %161 : vector<8x15xf32>
    %181 = arith.addf %146, %180 : vector<8x15xf32>
    %c37 = arith.constant 37 : index
    %182 = memref.load %arg3[%c37] : memref<288xf32, #tpu.memory_space<smem>>
    %183 = vector.broadcast %182 : f32 to vector<8x15xf32>
    %184 = arith.mulf %183, %161 : vector<8x15xf32>
    %185 = arith.addf %150, %184 : vector<8x15xf32>
    %c38 = arith.constant 38 : index
    %186 = memref.load %arg3[%c38] : memref<288xf32, #tpu.memory_space<smem>>
    %187 = vector.broadcast %186 : f32 to vector<8x15xf32>
    %188 = arith.mulf %187, %161 : vector<8x15xf32>
    %189 = arith.addf %154, %188 : vector<8x15xf32>
    %c39 = arith.constant 39 : index
    %190 = memref.load %arg3[%c39] : memref<288xf32, #tpu.memory_space<smem>>
    %191 = vector.broadcast %190 : f32 to vector<8x15xf32>
    %192 = arith.mulf %191, %161 : vector<8x15xf32>
    %193 = arith.addf %158, %192 : vector<8x15xf32>
    %c0_23 = arith.constant 0 : index
    %c1_24 = arith.constant 1 : index
    %194 = arith.index_cast %18 : i32 to index
    %c1_25 = arith.constant 1 : index
    %195 = vector.load %arg2[%c0_23, %c1_24, %194, %c1_25] : memref<1x4x18x17xf32, #tpu.memory_space<vmem>>, vector<1x1x8x15xf32>
    %196 = vector.shape_cast %195 : vector<1x1x8x15xf32> to vector<8x15xf32>
    %c40 = arith.constant 40 : index
    %197 = memref.load %arg3[%c40] : memref<288xf32, #tpu.memory_space<smem>>
    %198 = vector.broadcast %197 : f32 to vector<8x15xf32>
    %199 = arith.mulf %198, %196 : vector<8x15xf32>
    %200 = arith.addf %165, %199 : vector<8x15xf32>
    %c41 = arith.constant 41 : index
    %201 = memref.load %arg3[%c41] : memref<288xf32, #tpu.memory_space<smem>>
    %202 = vector.broadcast %201 : f32 to vector<8x15xf32>
    %203 = arith.mulf %202, %196 : vector<8x15xf32>
    %204 = arith.addf %169, %203 : vector<8x15xf32>
    %c42 = arith.constant 42 : index
    %205 = memref.load %arg3[%c42] : memref<288xf32, #tpu.memory_space<smem>>
    %206 = vector.broadcast %205 : f32 to vector<8x15xf32>
    %207 = arith.mulf %206, %196 : vector<8x15xf32>
    %208 = arith.addf %173, %207 : vector<8x15xf32>
    %c43 = arith.constant 43 : index
    %209 = memref.load %arg3[%c43] : memref<288xf32, #tpu.memory_space<smem>>
    %210 = vector.broadcast %209 : f32 to vector<8x15xf32>
    %211 = arith.mulf %210, %196 : vector<8x15xf32>
    %212 = arith.addf %177, %211 : vector<8x15xf32>
    %c44 = arith.constant 44 : index
    %213 = memref.load %arg3[%c44] : memref<288xf32, #tpu.memory_space<smem>>
    %214 = vector.broadcast %213 : f32 to vector<8x15xf32>
    %215 = arith.mulf %214, %196 : vector<8x15xf32>
    %216 = arith.addf %181, %215 : vector<8x15xf32>
    %c45 = arith.constant 45 : index
    %217 = memref.load %arg3[%c45] : memref<288xf32, #tpu.memory_space<smem>>
    %218 = vector.broadcast %217 : f32 to vector<8x15xf32>
    %219 = arith.mulf %218, %196 : vector<8x15xf32>
    %220 = arith.addf %185, %219 : vector<8x15xf32>
    %c46 = arith.constant 46 : index
    %221 = memref.load %arg3[%c46] : memref<288xf32, #tpu.memory_space<smem>>
    %222 = vector.broadcast %221 : f32 to vector<8x15xf32>
    %223 = arith.mulf %222, %196 : vector<8x15xf32>
    %224 = arith.addf %189, %223 : vector<8x15xf32>
    %c47 = arith.constant 47 : index
    %225 = memref.load %arg3[%c47] : memref<288xf32, #tpu.memory_space<smem>>
    %226 = vector.broadcast %225 : f32 to vector<8x15xf32>
    %227 = arith.mulf %226, %196 : vector<8x15xf32>
    %228 = arith.addf %193, %227 : vector<8x15xf32>
    %c0_26 = arith.constant 0 : index
    %c2_27 = arith.constant 2 : index
    %229 = arith.index_cast %18 : i32 to index
    %c1_28 = arith.constant 1 : index
    %230 = vector.load %arg2[%c0_26, %c2_27, %229, %c1_28] : memref<1x4x18x17xf32, #tpu.memory_space<vmem>>, vector<1x1x8x15xf32>
    %231 = vector.shape_cast %230 : vector<1x1x8x15xf32> to vector<8x15xf32>
    %c48 = arith.constant 48 : index
    %232 = memref.load %arg3[%c48] : memref<288xf32, #tpu.memory_space<smem>>
    %233 = vector.broadcast %232 : f32 to vector<8x15xf32>
    %234 = arith.mulf %233, %231 : vector<8x15xf32>
    %235 = arith.addf %200, %234 : vector<8x15xf32>
    %c49 = arith.constant 49 : index
    %236 = memref.load %arg3[%c49] : memref<288xf32, #tpu.memory_space<smem>>
    %237 = vector.broadcast %236 : f32 to vector<8x15xf32>
    %238 = arith.mulf %237, %231 : vector<8x15xf32>
    %239 = arith.addf %204, %238 : vector<8x15xf32>
    %c50 = arith.constant 50 : index
    %240 = memref.load %arg3[%c50] : memref<288xf32, #tpu.memory_space<smem>>
    %241 = vector.broadcast %240 : f32 to vector<8x15xf32>
    %242 = arith.mulf %241, %231 : vector<8x15xf32>
    %243 = arith.addf %208, %242 : vector<8x15xf32>
    %c51 = arith.constant 51 : index
    %244 = memref.load %arg3[%c51] : memref<288xf32, #tpu.memory_space<smem>>
    %245 = vector.broadcast %244 : f32 to vector<8x15xf32>
    %246 = arith.mulf %245, %231 : vector<8x15xf32>
    %247 = arith.addf %212, %246 : vector<8x15xf32>
    %c52 = arith.constant 52 : index
    %248 = memref.load %arg3[%c52] : memref<288xf32, #tpu.memory_space<smem>>
    %249 = vector.broadcast %248 : f32 to vector<8x15xf32>
    %250 = arith.mulf %249, %231 : vector<8x15xf32>
    %251 = arith.addf %216, %250 : vector<8x15xf32>
    %c53 = arith.constant 53 : index
    %252 = memref.load %arg3[%c53] : memref<288xf32, #tpu.memory_space<smem>>
    %253 = vector.broadcast %252 : f32 to vector<8x15xf32>
    %254 = arith.mulf %253, %231 : vector<8x15xf32>
    %255 = arith.addf %220, %254 : vector<8x15xf32>
    %c54 = arith.constant 54 : index
    %256 = memref.load %arg3[%c54] : memref<288xf32, #tpu.memory_space<smem>>
    %257 = vector.broadcast %256 : f32 to vector<8x15xf32>
    %258 = arith.mulf %257, %231 : vector<8x15xf32>
    %259 = arith.addf %224, %258 : vector<8x15xf32>
    %c55 = arith.constant 55 : index
    %260 = memref.load %arg3[%c55] : memref<288xf32, #tpu.memory_space<smem>>
    %261 = vector.broadcast %260 : f32 to vector<8x15xf32>
    %262 = arith.mulf %261, %231 : vector<8x15xf32>
    %263 = arith.addf %228, %262 : vector<8x15xf32>
    %c0_29 = arith.constant 0 : index
    %c3_30 = arith.constant 3 : index
    %264 = arith.index_cast %18 : i32 to index
    %c1_31 = arith.constant 1 : index
    %265 = vector.load %arg2[%c0_29, %c3_30, %264, %c1_31] : memref<1x4x18x17xf32, #tpu.memory_space<vmem>>, vector<1x1x8x15xf32>
    %266 = vector.shape_cast %265 : vector<1x1x8x15xf32> to vector<8x15xf32>
    %c56 = arith.constant 56 : index
    %267 = memref.load %arg3[%c56] : memref<288xf32, #tpu.memory_space<smem>>
    %268 = vector.broadcast %267 : f32 to vector<8x15xf32>
    %269 = arith.mulf %268, %266 : vector<8x15xf32>
    %270 = arith.addf %235, %269 : vector<8x15xf32>
    %c57 = arith.constant 57 : index
    %271 = memref.load %arg3[%c57] : memref<288xf32, #tpu.memory_space<smem>>
    %272 = vector.broadcast %271 : f32 to vector<8x15xf32>
    %273 = arith.mulf %272, %266 : vector<8x15xf32>
    %274 = arith.addf %239, %273 : vector<8x15xf32>
    %c58 = arith.constant 58 : index
    %275 = memref.load %arg3[%c58] : memref<288xf32, #tpu.memory_space<smem>>
    %276 = vector.broadcast %275 : f32 to vector<8x15xf32>
    %277 = arith.mulf %276, %266 : vector<8x15xf32>
    %278 = arith.addf %243, %277 : vector<8x15xf32>
    %c59 = arith.constant 59 : index
    %279 = memref.load %arg3[%c59] : memref<288xf32, #tpu.memory_space<smem>>
    %280 = vector.broadcast %279 : f32 to vector<8x15xf32>
    %281 = arith.mulf %280, %266 : vector<8x15xf32>
    %282 = arith.addf %247, %281 : vector<8x15xf32>
    %c60 = arith.constant 60 : index
    %283 = memref.load %arg3[%c60] : memref<288xf32, #tpu.memory_space<smem>>
    %284 = vector.broadcast %283 : f32 to vector<8x15xf32>
    %285 = arith.mulf %284, %266 : vector<8x15xf32>
    %286 = arith.addf %251, %285 : vector<8x15xf32>
    %c61 = arith.constant 61 : index
    %287 = memref.load %arg3[%c61] : memref<288xf32, #tpu.memory_space<smem>>
    %288 = vector.broadcast %287 : f32 to vector<8x15xf32>
    %289 = arith.mulf %288, %266 : vector<8x15xf32>
    %290 = arith.addf %255, %289 : vector<8x15xf32>
    %c62 = arith.constant 62 : index
    %291 = memref.load %arg3[%c62] : memref<288xf32, #tpu.memory_space<smem>>
    %292 = vector.broadcast %291 : f32 to vector<8x15xf32>
    %293 = arith.mulf %292, %266 : vector<8x15xf32>
    %294 = arith.addf %259, %293 : vector<8x15xf32>
    %c63 = arith.constant 63 : index
    %295 = memref.load %arg3[%c63] : memref<288xf32, #tpu.memory_space<smem>>
    %296 = vector.broadcast %295 : f32 to vector<8x15xf32>
    %297 = arith.mulf %296, %266 : vector<8x15xf32>
    %298 = arith.addf %263, %297 : vector<8x15xf32>
    %c0_32 = arith.constant 0 : index
    %c0_33 = arith.constant 0 : index
    %299 = arith.index_cast %18 : i32 to index
    %c2_34 = arith.constant 2 : index
    %300 = vector.load %arg2[%c0_32, %c0_33, %299, %c2_34] : memref<1x4x18x17xf32, #tpu.memory_space<vmem>>, vector<1x1x8x15xf32>
    %301 = vector.shape_cast %300 : vector<1x1x8x15xf32> to vector<8x15xf32>
    %c64 = arith.constant 64 : index
    %302 = memref.load %arg3[%c64] : memref<288xf32, #tpu.memory_space<smem>>
    %303 = vector.broadcast %302 : f32 to vector<8x15xf32>
    %304 = arith.mulf %303, %301 : vector<8x15xf32>
    %305 = arith.addf %270, %304 : vector<8x15xf32>
    %c65 = arith.constant 65 : index
    %306 = memref.load %arg3[%c65] : memref<288xf32, #tpu.memory_space<smem>>
    %307 = vector.broadcast %306 : f32 to vector<8x15xf32>
    %308 = arith.mulf %307, %301 : vector<8x15xf32>
    %309 = arith.addf %274, %308 : vector<8x15xf32>
    %c66 = arith.constant 66 : index
    %310 = memref.load %arg3[%c66] : memref<288xf32, #tpu.memory_space<smem>>
    %311 = vector.broadcast %310 : f32 to vector<8x15xf32>
    %312 = arith.mulf %311, %301 : vector<8x15xf32>
    %313 = arith.addf %278, %312 : vector<8x15xf32>
    %c67 = arith.constant 67 : index
    %314 = memref.load %arg3[%c67] : memref<288xf32, #tpu.memory_space<smem>>
    %315 = vector.broadcast %314 : f32 to vector<8x15xf32>
    %316 = arith.mulf %315, %301 : vector<8x15xf32>
    %317 = arith.addf %282, %316 : vector<8x15xf32>
    %c68 = arith.constant 68 : index
    %318 = memref.load %arg3[%c68] : memref<288xf32, #tpu.memory_space<smem>>
    %319 = vector.broadcast %318 : f32 to vector<8x15xf32>
    %320 = arith.mulf %319, %301 : vector<8x15xf32>
    %321 = arith.addf %286, %320 : vector<8x15xf32>
    %c69 = arith.constant 69 : index
    %322 = memref.load %arg3[%c69] : memref<288xf32, #tpu.memory_space<smem>>
    %323 = vector.broadcast %322 : f32 to vector<8x15xf32>
    %324 = arith.mulf %323, %301 : vector<8x15xf32>
    %325 = arith.addf %290, %324 : vector<8x15xf32>
    %c70 = arith.constant 70 : index
    %326 = memref.load %arg3[%c70] : memref<288xf32, #tpu.memory_space<smem>>
    %327 = vector.broadcast %326 : f32 to vector<8x15xf32>
    %328 = arith.mulf %327, %301 : vector<8x15xf32>
    %329 = arith.addf %294, %328 : vector<8x15xf32>
    %c71 = arith.constant 71 : index
    %330 = memref.load %arg3[%c71] : memref<288xf32, #tpu.memory_space<smem>>
    %331 = vector.broadcast %330 : f32 to vector<8x15xf32>
    %332 = arith.mulf %331, %301 : vector<8x15xf32>
    %333 = arith.addf %298, %332 : vector<8x15xf32>
    %c0_35 = arith.constant 0 : index
    %c1_36 = arith.constant 1 : index
    %334 = arith.index_cast %18 : i32 to index
    %c2_37 = arith.constant 2 : index
    %335 = vector.load %arg2[%c0_35, %c1_36, %334, %c2_37] : memref<1x4x18x17xf32, #tpu.memory_space<vmem>>, vector<1x1x8x15xf32>
    %336 = vector.shape_cast %335 : vector<1x1x8x15xf32> to vector<8x15xf32>
    %c72 = arith.constant 72 : index
    %337 = memref.load %arg3[%c72] : memref<288xf32, #tpu.memory_space<smem>>
    %338 = vector.broadcast %337 : f32 to vector<8x15xf32>
    %339 = arith.mulf %338, %336 : vector<8x15xf32>
    %340 = arith.addf %305, %339 : vector<8x15xf32>
    %c73 = arith.constant 73 : index
    %341 = memref.load %arg3[%c73] : memref<288xf32, #tpu.memory_space<smem>>
    %342 = vector.broadcast %341 : f32 to vector<8x15xf32>
    %343 = arith.mulf %342, %336 : vector<8x15xf32>
    %344 = arith.addf %309, %343 : vector<8x15xf32>
    %c74 = arith.constant 74 : index
    %345 = memref.load %arg3[%c74] : memref<288xf32, #tpu.memory_space<smem>>
    %346 = vector.broadcast %345 : f32 to vector<8x15xf32>
    %347 = arith.mulf %346, %336 : vector<8x15xf32>
    %348 = arith.addf %313, %347 : vector<8x15xf32>
    %c75 = arith.constant 75 : index
    %349 = memref.load %arg3[%c75] : memref<288xf32, #tpu.memory_space<smem>>
    %350 = vector.broadcast %349 : f32 to vector<8x15xf32>
    %351 = arith.mulf %350, %336 : vector<8x15xf32>
    %352 = arith.addf %317, %351 : vector<8x15xf32>
    %c76 = arith.constant 76 : index
    %353 = memref.load %arg3[%c76] : memref<288xf32, #tpu.memory_space<smem>>
    %354 = vector.broadcast %353 : f32 to vector<8x15xf32>
    %355 = arith.mulf %354, %336 : vector<8x15xf32>
    %356 = arith.addf %321, %355 : vector<8x15xf32>
    %c77 = arith.constant 77 : index
    %357 = memref.load %arg3[%c77] : memref<288xf32, #tpu.memory_space<smem>>
    %358 = vector.broadcast %357 : f32 to vector<8x15xf32>
    %359 = arith.mulf %358, %336 : vector<8x15xf32>
    %360 = arith.addf %325, %359 : vector<8x15xf32>
    %c78 = arith.constant 78 : index
    %361 = memref.load %arg3[%c78] : memref<288xf32, #tpu.memory_space<smem>>
    %362 = vector.broadcast %361 : f32 to vector<8x15xf32>
    %363 = arith.mulf %362, %336 : vector<8x15xf32>
    %364 = arith.addf %329, %363 : vector<8x15xf32>
    %c79 = arith.constant 79 : index
    %365 = memref.load %arg3[%c79] : memref<288xf32, #tpu.memory_space<smem>>
    %366 = vector.broadcast %365 : f32 to vector<8x15xf32>
    %367 = arith.mulf %366, %336 : vector<8x15xf32>
    %368 = arith.addf %333, %367 : vector<8x15xf32>
    %c0_38 = arith.constant 0 : index
    %c2_39 = arith.constant 2 : index
    %369 = arith.index_cast %18 : i32 to index
    %c2_40 = arith.constant 2 : index
    %370 = vector.load %arg2[%c0_38, %c2_39, %369, %c2_40] : memref<1x4x18x17xf32, #tpu.memory_space<vmem>>, vector<1x1x8x15xf32>
    %371 = vector.shape_cast %370 : vector<1x1x8x15xf32> to vector<8x15xf32>
    %c80 = arith.constant 80 : index
    %372 = memref.load %arg3[%c80] : memref<288xf32, #tpu.memory_space<smem>>
    %373 = vector.broadcast %372 : f32 to vector<8x15xf32>
    %374 = arith.mulf %373, %371 : vector<8x15xf32>
    %375 = arith.addf %340, %374 : vector<8x15xf32>
    %c81 = arith.constant 81 : index
    %376 = memref.load %arg3[%c81] : memref<288xf32, #tpu.memory_space<smem>>
    %377 = vector.broadcast %376 : f32 to vector<8x15xf32>
    %378 = arith.mulf %377, %371 : vector<8x15xf32>
    %379 = arith.addf %344, %378 : vector<8x15xf32>
    %c82 = arith.constant 82 : index
    %380 = memref.load %arg3[%c82] : memref<288xf32, #tpu.memory_space<smem>>
    %381 = vector.broadcast %380 : f32 to vector<8x15xf32>
    %382 = arith.mulf %381, %371 : vector<8x15xf32>
    %383 = arith.addf %348, %382 : vector<8x15xf32>
    %c83 = arith.constant 83 : index
    %384 = memref.load %arg3[%c83] : memref<288xf32, #tpu.memory_space<smem>>
    %385 = vector.broadcast %384 : f32 to vector<8x15xf32>
    %386 = arith.mulf %385, %371 : vector<8x15xf32>
    %387 = arith.addf %352, %386 : vector<8x15xf32>
    %c84 = arith.constant 84 : index
    %388 = memref.load %arg3[%c84] : memref<288xf32, #tpu.memory_space<smem>>
    %389 = vector.broadcast %388 : f32 to vector<8x15xf32>
    %390 = arith.mulf %389, %371 : vector<8x15xf32>
    %391 = arith.addf %356, %390 : vector<8x15xf32>
    %c85 = arith.constant 85 : index
    %392 = memref.load %arg3[%c85] : memref<288xf32, #tpu.memory_space<smem>>
    %393 = vector.broadcast %392 : f32 to vector<8x15xf32>
    %394 = arith.mulf %393, %371 : vector<8x15xf32>
    %395 = arith.addf %360, %394 : vector<8x15xf32>
    %c86 = arith.constant 86 : index
    %396 = memref.load %arg3[%c86] : memref<288xf32, #tpu.memory_space<smem>>
    %397 = vector.broadcast %396 : f32 to vector<8x15xf32>
    %398 = arith.mulf %397, %371 : vector<8x15xf32>
    %399 = arith.addf %364, %398 : vector<8x15xf32>
    %c87 = arith.constant 87 : index
    %400 = memref.load %arg3[%c87] : memref<288xf32, #tpu.memory_space<smem>>
    %401 = vector.broadcast %400 : f32 to vector<8x15xf32>
    %402 = arith.mulf %401, %371 : vector<8x15xf32>
    %403 = arith.addf %368, %402 : vector<8x15xf32>
    %c0_41 = arith.constant 0 : index
    %c3_42 = arith.constant 3 : index
    %404 = arith.index_cast %18 : i32 to index
    %c2_43 = arith.constant 2 : index
    %405 = vector.load %arg2[%c0_41, %c3_42, %404, %c2_43] : memref<1x4x18x17xf32, #tpu.memory_space<vmem>>, vector<1x1x8x15xf32>
    %406 = vector.shape_cast %405 : vector<1x1x8x15xf32> to vector<8x15xf32>
    %c88 = arith.constant 88 : index
    %407 = memref.load %arg3[%c88] : memref<288xf32, #tpu.memory_space<smem>>
    %408 = vector.broadcast %407 : f32 to vector<8x15xf32>
    %409 = arith.mulf %408, %406 : vector<8x15xf32>
    %410 = arith.addf %375, %409 : vector<8x15xf32>
    %c89 = arith.constant 89 : index
    %411 = memref.load %arg3[%c89] : memref<288xf32, #tpu.memory_space<smem>>
    %412 = vector.broadcast %411 : f32 to vector<8x15xf32>
    %413 = arith.mulf %412, %406 : vector<8x15xf32>
    %414 = arith.addf %379, %413 : vector<8x15xf32>
    %c90 = arith.constant 90 : index
    %415 = memref.load %arg3[%c90] : memref<288xf32, #tpu.memory_space<smem>>
    %416 = vector.broadcast %415 : f32 to vector<8x15xf32>
    %417 = arith.mulf %416, %406 : vector<8x15xf32>
    %418 = arith.addf %383, %417 : vector<8x15xf32>
    %c91 = arith.constant 91 : index
    %419 = memref.load %arg3[%c91] : memref<288xf32, #tpu.memory_space<smem>>
    %420 = vector.broadcast %419 : f32 to vector<8x15xf32>
    %421 = arith.mulf %420, %406 : vector<8x15xf32>
    %422 = arith.addf %387, %421 : vector<8x15xf32>
    %c92 = arith.constant 92 : index
    %423 = memref.load %arg3[%c92] : memref<288xf32, #tpu.memory_space<smem>>
    %424 = vector.broadcast %423 : f32 to vector<8x15xf32>
    %425 = arith.mulf %424, %406 : vector<8x15xf32>
    %426 = arith.addf %391, %425 : vector<8x15xf32>
    %c93 = arith.constant 93 : index
    %427 = memref.load %arg3[%c93] : memref<288xf32, #tpu.memory_space<smem>>
    %428 = vector.broadcast %427 : f32 to vector<8x15xf32>
    %429 = arith.mulf %428, %406 : vector<8x15xf32>
    %430 = arith.addf %395, %429 : vector<8x15xf32>
    %c94 = arith.constant 94 : index
    %431 = memref.load %arg3[%c94] : memref<288xf32, #tpu.memory_space<smem>>
    %432 = vector.broadcast %431 : f32 to vector<8x15xf32>
    %433 = arith.mulf %432, %406 : vector<8x15xf32>
    %434 = arith.addf %399, %433 : vector<8x15xf32>
    %c95 = arith.constant 95 : index
    %435 = memref.load %arg3[%c95] : memref<288xf32, #tpu.memory_space<smem>>
    %436 = vector.broadcast %435 : f32 to vector<8x15xf32>
    %437 = arith.mulf %436, %406 : vector<8x15xf32>
    %438 = arith.addf %403, %437 : vector<8x15xf32>
    %c1_i32 = arith.constant 1 : i32
    %439 = arith.addi %1, %c1_i32 : i32
    %c0_44 = arith.constant 0 : index
    %c0_45 = arith.constant 0 : index
    %440 = arith.index_cast %439 : i32 to index
    %c0_46 = arith.constant 0 : index
    %441 = vector.load %arg2[%c0_44, %c0_45, %440, %c0_46] : memref<1x4x18x17xf32, #tpu.memory_space<vmem>>, vector<1x1x8x15xf32>
    %442 = vector.shape_cast %441 : vector<1x1x8x15xf32> to vector<8x15xf32>
    %c96 = arith.constant 96 : index
    %443 = memref.load %arg3[%c96] : memref<288xf32, #tpu.memory_space<smem>>
    %444 = vector.broadcast %443 : f32 to vector<8x15xf32>
    %445 = arith.mulf %444, %442 : vector<8x15xf32>
    %446 = arith.addf %410, %445 : vector<8x15xf32>
    %c97 = arith.constant 97 : index
    %447 = memref.load %arg3[%c97] : memref<288xf32, #tpu.memory_space<smem>>
    %448 = vector.broadcast %447 : f32 to vector<8x15xf32>
    %449 = arith.mulf %448, %442 : vector<8x15xf32>
    %450 = arith.addf %414, %449 : vector<8x15xf32>
    %c98 = arith.constant 98 : index
    %451 = memref.load %arg3[%c98] : memref<288xf32, #tpu.memory_space<smem>>
    %452 = vector.broadcast %451 : f32 to vector<8x15xf32>
    %453 = arith.mulf %452, %442 : vector<8x15xf32>
    %454 = arith.addf %418, %453 : vector<8x15xf32>
    %c99 = arith.constant 99 : index
    %455 = memref.load %arg3[%c99] : memref<288xf32, #tpu.memory_space<smem>>
    %456 = vector.broadcast %455 : f32 to vector<8x15xf32>
    %457 = arith.mulf %456, %442 : vector<8x15xf32>
    %458 = arith.addf %422, %457 : vector<8x15xf32>
    %c100 = arith.constant 100 : index
    %459 = memref.load %arg3[%c100] : memref<288xf32, #tpu.memory_space<smem>>
    %460 = vector.broadcast %459 : f32 to vector<8x15xf32>
    %461 = arith.mulf %460, %442 : vector<8x15xf32>
    %462 = arith.addf %426, %461 : vector<8x15xf32>
    %c101 = arith.constant 101 : index
    %463 = memref.load %arg3[%c101] : memref<288xf32, #tpu.memory_space<smem>>
    %464 = vector.broadcast %463 : f32 to vector<8x15xf32>
    %465 = arith.mulf %464, %442 : vector<8x15xf32>
    %466 = arith.addf %430, %465 : vector<8x15xf32>
    %c102 = arith.constant 102 : index
    %467 = memref.load %arg3[%c102] : memref<288xf32, #tpu.memory_space<smem>>
    %468 = vector.broadcast %467 : f32 to vector<8x15xf32>
    %469 = arith.mulf %468, %442 : vector<8x15xf32>
    %470 = arith.addf %434, %469 : vector<8x15xf32>
    %c103 = arith.constant 103 : index
    %471 = memref.load %arg3[%c103] : memref<288xf32, #tpu.memory_space<smem>>
    %472 = vector.broadcast %471 : f32 to vector<8x15xf32>
    %473 = arith.mulf %472, %442 : vector<8x15xf32>
    %474 = arith.addf %438, %473 : vector<8x15xf32>
    %c0_47 = arith.constant 0 : index
    %c1_48 = arith.constant 1 : index
    %475 = arith.index_cast %439 : i32 to index
    %c0_49 = arith.constant 0 : index
    %476 = vector.load %arg2[%c0_47, %c1_48, %475, %c0_49] : memref<1x4x18x17xf32, #tpu.memory_space<vmem>>, vector<1x1x8x15xf32>
    %477 = vector.shape_cast %476 : vector<1x1x8x15xf32> to vector<8x15xf32>
    %c104 = arith.constant 104 : index
    %478 = memref.load %arg3[%c104] : memref<288xf32, #tpu.memory_space<smem>>
    %479 = vector.broadcast %478 : f32 to vector<8x15xf32>
    %480 = arith.mulf %479, %477 : vector<8x15xf32>
    %481 = arith.addf %446, %480 : vector<8x15xf32>
    %c105 = arith.constant 105 : index
    %482 = memref.load %arg3[%c105] : memref<288xf32, #tpu.memory_space<smem>>
    %483 = vector.broadcast %482 : f32 to vector<8x15xf32>
    %484 = arith.mulf %483, %477 : vector<8x15xf32>
    %485 = arith.addf %450, %484 : vector<8x15xf32>
    %c106 = arith.constant 106 : index
    %486 = memref.load %arg3[%c106] : memref<288xf32, #tpu.memory_space<smem>>
    %487 = vector.broadcast %486 : f32 to vector<8x15xf32>
    %488 = arith.mulf %487, %477 : vector<8x15xf32>
    %489 = arith.addf %454, %488 : vector<8x15xf32>
    %c107 = arith.constant 107 : index
    %490 = memref.load %arg3[%c107] : memref<288xf32, #tpu.memory_space<smem>>
    %491 = vector.broadcast %490 : f32 to vector<8x15xf32>
    %492 = arith.mulf %491, %477 : vector<8x15xf32>
    %493 = arith.addf %458, %492 : vector<8x15xf32>
    %c108 = arith.constant 108 : index
    %494 = memref.load %arg3[%c108] : memref<288xf32, #tpu.memory_space<smem>>
    %495 = vector.broadcast %494 : f32 to vector<8x15xf32>
    %496 = arith.mulf %495, %477 : vector<8x15xf32>
    %497 = arith.addf %462, %496 : vector<8x15xf32>
    %c109 = arith.constant 109 : index
    %498 = memref.load %arg3[%c109] : memref<288xf32, #tpu.memory_space<smem>>
    %499 = vector.broadcast %498 : f32 to vector<8x15xf32>
    %500 = arith.mulf %499, %477 : vector<8x15xf32>
    %501 = arith.addf %466, %500 : vector<8x15xf32>
    %c110 = arith.constant 110 : index
    %502 = memref.load %arg3[%c110] : memref<288xf32, #tpu.memory_space<smem>>
    %503 = vector.broadcast %502 : f32 to vector<8x15xf32>
    %504 = arith.mulf %503, %477 : vector<8x15xf32>
    %505 = arith.addf %470, %504 : vector<8x15xf32>
    %c111 = arith.constant 111 : index
    %506 = memref.load %arg3[%c111] : memref<288xf32, #tpu.memory_space<smem>>
    %507 = vector.broadcast %506 : f32 to vector<8x15xf32>
    %508 = arith.mulf %507, %477 : vector<8x15xf32>
    %509 = arith.addf %474, %508 : vector<8x15xf32>
    %c0_50 = arith.constant 0 : index
    %c2_51 = arith.constant 2 : index
    %510 = arith.index_cast %439 : i32 to index
    %c0_52 = arith.constant 0 : index
    %511 = vector.load %arg2[%c0_50, %c2_51, %510, %c0_52] : memref<1x4x18x17xf32, #tpu.memory_space<vmem>>, vector<1x1x8x15xf32>
    %512 = vector.shape_cast %511 : vector<1x1x8x15xf32> to vector<8x15xf32>
    %c112 = arith.constant 112 : index
    %513 = memref.load %arg3[%c112] : memref<288xf32, #tpu.memory_space<smem>>
    %514 = vector.broadcast %513 : f32 to vector<8x15xf32>
    %515 = arith.mulf %514, %512 : vector<8x15xf32>
    %516 = arith.addf %481, %515 : vector<8x15xf32>
    %c113 = arith.constant 113 : index
    %517 = memref.load %arg3[%c113] : memref<288xf32, #tpu.memory_space<smem>>
    %518 = vector.broadcast %517 : f32 to vector<8x15xf32>
    %519 = arith.mulf %518, %512 : vector<8x15xf32>
    %520 = arith.addf %485, %519 : vector<8x15xf32>
    %c114 = arith.constant 114 : index
    %521 = memref.load %arg3[%c114] : memref<288xf32, #tpu.memory_space<smem>>
    %522 = vector.broadcast %521 : f32 to vector<8x15xf32>
    %523 = arith.mulf %522, %512 : vector<8x15xf32>
    %524 = arith.addf %489, %523 : vector<8x15xf32>
    %c115 = arith.constant 115 : index
    %525 = memref.load %arg3[%c115] : memref<288xf32, #tpu.memory_space<smem>>
    %526 = vector.broadcast %525 : f32 to vector<8x15xf32>
    %527 = arith.mulf %526, %512 : vector<8x15xf32>
    %528 = arith.addf %493, %527 : vector<8x15xf32>
    %c116 = arith.constant 116 : index
    %529 = memref.load %arg3[%c116] : memref<288xf32, #tpu.memory_space<smem>>
    %530 = vector.broadcast %529 : f32 to vector<8x15xf32>
    %531 = arith.mulf %530, %512 : vector<8x15xf32>
    %532 = arith.addf %497, %531 : vector<8x15xf32>
    %c117 = arith.constant 117 : index
    %533 = memref.load %arg3[%c117] : memref<288xf32, #tpu.memory_space<smem>>
    %534 = vector.broadcast %533 : f32 to vector<8x15xf32>
    %535 = arith.mulf %534, %512 : vector<8x15xf32>
    %536 = arith.addf %501, %535 : vector<8x15xf32>
    %c118 = arith.constant 118 : index
    %537 = memref.load %arg3[%c118] : memref<288xf32, #tpu.memory_space<smem>>
    %538 = vector.broadcast %537 : f32 to vector<8x15xf32>
    %539 = arith.mulf %538, %512 : vector<8x15xf32>
    %540 = arith.addf %505, %539 : vector<8x15xf32>
    %c119 = arith.constant 119 : index
    %541 = memref.load %arg3[%c119] : memref<288xf32, #tpu.memory_space<smem>>
    %542 = vector.broadcast %541 : f32 to vector<8x15xf32>
    %543 = arith.mulf %542, %512 : vector<8x15xf32>
    %544 = arith.addf %509, %543 : vector<8x15xf32>
    %c0_53 = arith.constant 0 : index
    %c3_54 = arith.constant 3 : index
    %545 = arith.index_cast %439 : i32 to index
    %c0_55 = arith.constant 0 : index
    %546 = vector.load %arg2[%c0_53, %c3_54, %545, %c0_55] : memref<1x4x18x17xf32, #tpu.memory_space<vmem>>, vector<1x1x8x15xf32>
    %547 = vector.shape_cast %546 : vector<1x1x8x15xf32> to vector<8x15xf32>
    %c120 = arith.constant 120 : index
    %548 = memref.load %arg3[%c120] : memref<288xf32, #tpu.memory_space<smem>>
    %549 = vector.broadcast %548 : f32 to vector<8x15xf32>
    %550 = arith.mulf %549, %547 : vector<8x15xf32>
    %551 = arith.addf %516, %550 : vector<8x15xf32>
    %c121 = arith.constant 121 : index
    %552 = memref.load %arg3[%c121] : memref<288xf32, #tpu.memory_space<smem>>
    %553 = vector.broadcast %552 : f32 to vector<8x15xf32>
    %554 = arith.mulf %553, %547 : vector<8x15xf32>
    %555 = arith.addf %520, %554 : vector<8x15xf32>
    %c122 = arith.constant 122 : index
    %556 = memref.load %arg3[%c122] : memref<288xf32, #tpu.memory_space<smem>>
    %557 = vector.broadcast %556 : f32 to vector<8x15xf32>
    %558 = arith.mulf %557, %547 : vector<8x15xf32>
    %559 = arith.addf %524, %558 : vector<8x15xf32>
    %c123 = arith.constant 123 : index
    %560 = memref.load %arg3[%c123] : memref<288xf32, #tpu.memory_space<smem>>
    %561 = vector.broadcast %560 : f32 to vector<8x15xf32>
    %562 = arith.mulf %561, %547 : vector<8x15xf32>
    %563 = arith.addf %528, %562 : vector<8x15xf32>
    %c124 = arith.constant 124 : index
    %564 = memref.load %arg3[%c124] : memref<288xf32, #tpu.memory_space<smem>>
    %565 = vector.broadcast %564 : f32 to vector<8x15xf32>
    %566 = arith.mulf %565, %547 : vector<8x15xf32>
    %567 = arith.addf %532, %566 : vector<8x15xf32>
    %c125 = arith.constant 125 : index
    %568 = memref.load %arg3[%c125] : memref<288xf32, #tpu.memory_space<smem>>
    %569 = vector.broadcast %568 : f32 to vector<8x15xf32>
    %570 = arith.mulf %569, %547 : vector<8x15xf32>
    %571 = arith.addf %536, %570 : vector<8x15xf32>
    %c126 = arith.constant 126 : index
    %572 = memref.load %arg3[%c126] : memref<288xf32, #tpu.memory_space<smem>>
    %573 = vector.broadcast %572 : f32 to vector<8x15xf32>
    %574 = arith.mulf %573, %547 : vector<8x15xf32>
    %575 = arith.addf %540, %574 : vector<8x15xf32>
    %c127 = arith.constant 127 : index
    %576 = memref.load %arg3[%c127] : memref<288xf32, #tpu.memory_space<smem>>
    %577 = vector.broadcast %576 : f32 to vector<8x15xf32>
    %578 = arith.mulf %577, %547 : vector<8x15xf32>
    %579 = arith.addf %544, %578 : vector<8x15xf32>
    %c0_56 = arith.constant 0 : index
    %c0_57 = arith.constant 0 : index
    %580 = arith.index_cast %439 : i32 to index
    %c1_58 = arith.constant 1 : index
    %581 = vector.load %arg2[%c0_56, %c0_57, %580, %c1_58] : memref<1x4x18x17xf32, #tpu.memory_space<vmem>>, vector<1x1x8x15xf32>
    %582 = vector.shape_cast %581 : vector<1x1x8x15xf32> to vector<8x15xf32>
    %c128 = arith.constant 128 : index
    %583 = memref.load %arg3[%c128] : memref<288xf32, #tpu.memory_space<smem>>
    %584 = vector.broadcast %583 : f32 to vector<8x15xf32>
    %585 = arith.mulf %584, %582 : vector<8x15xf32>
    %586 = arith.addf %551, %585 : vector<8x15xf32>
    %c129 = arith.constant 129 : index
    %587 = memref.load %arg3[%c129] : memref<288xf32, #tpu.memory_space<smem>>
    %588 = vector.broadcast %587 : f32 to vector<8x15xf32>
    %589 = arith.mulf %588, %582 : vector<8x15xf32>
    %590 = arith.addf %555, %589 : vector<8x15xf32>
    %c130 = arith.constant 130 : index
    %591 = memref.load %arg3[%c130] : memref<288xf32, #tpu.memory_space<smem>>
    %592 = vector.broadcast %591 : f32 to vector<8x15xf32>
    %593 = arith.mulf %592, %582 : vector<8x15xf32>
    %594 = arith.addf %559, %593 : vector<8x15xf32>
    %c131 = arith.constant 131 : index
    %595 = memref.load %arg3[%c131] : memref<288xf32, #tpu.memory_space<smem>>
    %596 = vector.broadcast %595 : f32 to vector<8x15xf32>
    %597 = arith.mulf %596, %582 : vector<8x15xf32>
    %598 = arith.addf %563, %597 : vector<8x15xf32>
    %c132 = arith.constant 132 : index
    %599 = memref.load %arg3[%c132] : memref<288xf32, #tpu.memory_space<smem>>
    %600 = vector.broadcast %599 : f32 to vector<8x15xf32>
    %601 = arith.mulf %600, %582 : vector<8x15xf32>
    %602 = arith.addf %567, %601 : vector<8x15xf32>
    %c133 = arith.constant 133 : index
    %603 = memref.load %arg3[%c133] : memref<288xf32, #tpu.memory_space<smem>>
    %604 = vector.broadcast %603 : f32 to vector<8x15xf32>
    %605 = arith.mulf %604, %582 : vector<8x15xf32>
    %606 = arith.addf %571, %605 : vector<8x15xf32>
    %c134 = arith.constant 134 : index
    %607 = memref.load %arg3[%c134] : memref<288xf32, #tpu.memory_space<smem>>
    %608 = vector.broadcast %607 : f32 to vector<8x15xf32>
    %609 = arith.mulf %608, %582 : vector<8x15xf32>
    %610 = arith.addf %575, %609 : vector<8x15xf32>
    %c135 = arith.constant 135 : index
    %611 = memref.load %arg3[%c135] : memref<288xf32, #tpu.memory_space<smem>>
    %612 = vector.broadcast %611 : f32 to vector<8x15xf32>
    %613 = arith.mulf %612, %582 : vector<8x15xf32>
    %614 = arith.addf %579, %613 : vector<8x15xf32>
    %c0_59 = arith.constant 0 : index
    %c1_60 = arith.constant 1 : index
    %615 = arith.index_cast %439 : i32 to index
    %c1_61 = arith.constant 1 : index
    %616 = vector.load %arg2[%c0_59, %c1_60, %615, %c1_61] : memref<1x4x18x17xf32, #tpu.memory_space<vmem>>, vector<1x1x8x15xf32>
    %617 = vector.shape_cast %616 : vector<1x1x8x15xf32> to vector<8x15xf32>
    %c136 = arith.constant 136 : index
    %618 = memref.load %arg3[%c136] : memref<288xf32, #tpu.memory_space<smem>>
    %619 = vector.broadcast %618 : f32 to vector<8x15xf32>
    %620 = arith.mulf %619, %617 : vector<8x15xf32>
    %621 = arith.addf %586, %620 : vector<8x15xf32>
    %c137 = arith.constant 137 : index
    %622 = memref.load %arg3[%c137] : memref<288xf32, #tpu.memory_space<smem>>
    %623 = vector.broadcast %622 : f32 to vector<8x15xf32>
    %624 = arith.mulf %623, %617 : vector<8x15xf32>
    %625 = arith.addf %590, %624 : vector<8x15xf32>
    %c138 = arith.constant 138 : index
    %626 = memref.load %arg3[%c138] : memref<288xf32, #tpu.memory_space<smem>>
    %627 = vector.broadcast %626 : f32 to vector<8x15xf32>
    %628 = arith.mulf %627, %617 : vector<8x15xf32>
    %629 = arith.addf %594, %628 : vector<8x15xf32>
    %c139 = arith.constant 139 : index
    %630 = memref.load %arg3[%c139] : memref<288xf32, #tpu.memory_space<smem>>
    %631 = vector.broadcast %630 : f32 to vector<8x15xf32>
    %632 = arith.mulf %631, %617 : vector<8x15xf32>
    %633 = arith.addf %598, %632 : vector<8x15xf32>
    %c140 = arith.constant 140 : index
    %634 = memref.load %arg3[%c140] : memref<288xf32, #tpu.memory_space<smem>>
    %635 = vector.broadcast %634 : f32 to vector<8x15xf32>
    %636 = arith.mulf %635, %617 : vector<8x15xf32>
    %637 = arith.addf %602, %636 : vector<8x15xf32>
    %c141 = arith.constant 141 : index
    %638 = memref.load %arg3[%c141] : memref<288xf32, #tpu.memory_space<smem>>
    %639 = vector.broadcast %638 : f32 to vector<8x15xf32>
    %640 = arith.mulf %639, %617 : vector<8x15xf32>
    %641 = arith.addf %606, %640 : vector<8x15xf32>
    %c142 = arith.constant 142 : index
    %642 = memref.load %arg3[%c142] : memref<288xf32, #tpu.memory_space<smem>>
    %643 = vector.broadcast %642 : f32 to vector<8x15xf32>
    %644 = arith.mulf %643, %617 : vector<8x15xf32>
    %645 = arith.addf %610, %644 : vector<8x15xf32>
    %c143 = arith.constant 143 : index
    %646 = memref.load %arg3[%c143] : memref<288xf32, #tpu.memory_space<smem>>
    %647 = vector.broadcast %646 : f32 to vector<8x15xf32>
    %648 = arith.mulf %647, %617 : vector<8x15xf32>
    %649 = arith.addf %614, %648 : vector<8x15xf32>
    %c0_62 = arith.constant 0 : index
    %c2_63 = arith.constant 2 : index
    %650 = arith.index_cast %439 : i32 to index
    %c1_64 = arith.constant 1 : index
    %651 = vector.load %arg2[%c0_62, %c2_63, %650, %c1_64] : memref<1x4x18x17xf32, #tpu.memory_space<vmem>>, vector<1x1x8x15xf32>
    %652 = vector.shape_cast %651 : vector<1x1x8x15xf32> to vector<8x15xf32>
    %c144 = arith.constant 144 : index
    %653 = memref.load %arg3[%c144] : memref<288xf32, #tpu.memory_space<smem>>
    %654 = vector.broadcast %653 : f32 to vector<8x15xf32>
    %655 = arith.mulf %654, %652 : vector<8x15xf32>
    %656 = arith.addf %621, %655 : vector<8x15xf32>
    %c145 = arith.constant 145 : index
    %657 = memref.load %arg3[%c145] : memref<288xf32, #tpu.memory_space<smem>>
    %658 = vector.broadcast %657 : f32 to vector<8x15xf32>
    %659 = arith.mulf %658, %652 : vector<8x15xf32>
    %660 = arith.addf %625, %659 : vector<8x15xf32>
    %c146 = arith.constant 146 : index
    %661 = memref.load %arg3[%c146] : memref<288xf32, #tpu.memory_space<smem>>
    %662 = vector.broadcast %661 : f32 to vector<8x15xf32>
    %663 = arith.mulf %662, %652 : vector<8x15xf32>
    %664 = arith.addf %629, %663 : vector<8x15xf32>
    %c147 = arith.constant 147 : index
    %665 = memref.load %arg3[%c147] : memref<288xf32, #tpu.memory_space<smem>>
    %666 = vector.broadcast %665 : f32 to vector<8x15xf32>
    %667 = arith.mulf %666, %652 : vector<8x15xf32>
    %668 = arith.addf %633, %667 : vector<8x15xf32>
    %c148 = arith.constant 148 : index
    %669 = memref.load %arg3[%c148] : memref<288xf32, #tpu.memory_space<smem>>
    %670 = vector.broadcast %669 : f32 to vector<8x15xf32>
    %671 = arith.mulf %670, %652 : vector<8x15xf32>
    %672 = arith.addf %637, %671 : vector<8x15xf32>
    %c149 = arith.constant 149 : index
    %673 = memref.load %arg3[%c149] : memref<288xf32, #tpu.memory_space<smem>>
    %674 = vector.broadcast %673 : f32 to vector<8x15xf32>
    %675 = arith.mulf %674, %652 : vector<8x15xf32>
    %676 = arith.addf %641, %675 : vector<8x15xf32>
    %c150 = arith.constant 150 : index
    %677 = memref.load %arg3[%c150] : memref<288xf32, #tpu.memory_space<smem>>
    %678 = vector.broadcast %677 : f32 to vector<8x15xf32>
    %679 = arith.mulf %678, %652 : vector<8x15xf32>
    %680 = arith.addf %645, %679 : vector<8x15xf32>
    %c151 = arith.constant 151 : index
    %681 = memref.load %arg3[%c151] : memref<288xf32, #tpu.memory_space<smem>>
    %682 = vector.broadcast %681 : f32 to vector<8x15xf32>
    %683 = arith.mulf %682, %652 : vector<8x15xf32>
    %684 = arith.addf %649, %683 : vector<8x15xf32>
    %c0_65 = arith.constant 0 : index
    %c3_66 = arith.constant 3 : index
    %685 = arith.index_cast %439 : i32 to index
    %c1_67 = arith.constant 1 : index
    %686 = vector.load %arg2[%c0_65, %c3_66, %685, %c1_67] : memref<1x4x18x17xf32, #tpu.memory_space<vmem>>, vector<1x1x8x15xf32>
    %687 = vector.shape_cast %686 : vector<1x1x8x15xf32> to vector<8x15xf32>
    %c152 = arith.constant 152 : index
    %688 = memref.load %arg3[%c152] : memref<288xf32, #tpu.memory_space<smem>>
    %689 = vector.broadcast %688 : f32 to vector<8x15xf32>
    %690 = arith.mulf %689, %687 : vector<8x15xf32>
    %691 = arith.addf %656, %690 : vector<8x15xf32>
    %c153 = arith.constant 153 : index
    %692 = memref.load %arg3[%c153] : memref<288xf32, #tpu.memory_space<smem>>
    %693 = vector.broadcast %692 : f32 to vector<8x15xf32>
    %694 = arith.mulf %693, %687 : vector<8x15xf32>
    %695 = arith.addf %660, %694 : vector<8x15xf32>
    %c154 = arith.constant 154 : index
    %696 = memref.load %arg3[%c154] : memref<288xf32, #tpu.memory_space<smem>>
    %697 = vector.broadcast %696 : f32 to vector<8x15xf32>
    %698 = arith.mulf %697, %687 : vector<8x15xf32>
    %699 = arith.addf %664, %698 : vector<8x15xf32>
    %c155 = arith.constant 155 : index
    %700 = memref.load %arg3[%c155] : memref<288xf32, #tpu.memory_space<smem>>
    %701 = vector.broadcast %700 : f32 to vector<8x15xf32>
    %702 = arith.mulf %701, %687 : vector<8x15xf32>
    %703 = arith.addf %668, %702 : vector<8x15xf32>
    %c156 = arith.constant 156 : index
    %704 = memref.load %arg3[%c156] : memref<288xf32, #tpu.memory_space<smem>>
    %705 = vector.broadcast %704 : f32 to vector<8x15xf32>
    %706 = arith.mulf %705, %687 : vector<8x15xf32>
    %707 = arith.addf %672, %706 : vector<8x15xf32>
    %c157 = arith.constant 157 : index
    %708 = memref.load %arg3[%c157] : memref<288xf32, #tpu.memory_space<smem>>
    %709 = vector.broadcast %708 : f32 to vector<8x15xf32>
    %710 = arith.mulf %709, %687 : vector<8x15xf32>
    %711 = arith.addf %676, %710 : vector<8x15xf32>
    %c158 = arith.constant 158 : index
    %712 = memref.load %arg3[%c158] : memref<288xf32, #tpu.memory_space<smem>>
    %713 = vector.broadcast %712 : f32 to vector<8x15xf32>
    %714 = arith.mulf %713, %687 : vector<8x15xf32>
    %715 = arith.addf %680, %714 : vector<8x15xf32>
    %c159 = arith.constant 159 : index
    %716 = memref.load %arg3[%c159] : memref<288xf32, #tpu.memory_space<smem>>
    %717 = vector.broadcast %716 : f32 to vector<8x15xf32>
    %718 = arith.mulf %717, %687 : vector<8x15xf32>
    %719 = arith.addf %684, %718 : vector<8x15xf32>
    %c0_68 = arith.constant 0 : index
    %c0_69 = arith.constant 0 : index
    %720 = arith.index_cast %439 : i32 to index
    %c2_70 = arith.constant 2 : index
    %721 = vector.load %arg2[%c0_68, %c0_69, %720, %c2_70] : memref<1x4x18x17xf32, #tpu.memory_space<vmem>>, vector<1x1x8x15xf32>
    %722 = vector.shape_cast %721 : vector<1x1x8x15xf32> to vector<8x15xf32>
    %c160 = arith.constant 160 : index
    %723 = memref.load %arg3[%c160] : memref<288xf32, #tpu.memory_space<smem>>
    %724 = vector.broadcast %723 : f32 to vector<8x15xf32>
    %725 = arith.mulf %724, %722 : vector<8x15xf32>
    %726 = arith.addf %691, %725 : vector<8x15xf32>
    %c161 = arith.constant 161 : index
    %727 = memref.load %arg3[%c161] : memref<288xf32, #tpu.memory_space<smem>>
    %728 = vector.broadcast %727 : f32 to vector<8x15xf32>
    %729 = arith.mulf %728, %722 : vector<8x15xf32>
    %730 = arith.addf %695, %729 : vector<8x15xf32>
    %c162 = arith.constant 162 : index
    %731 = memref.load %arg3[%c162] : memref<288xf32, #tpu.memory_space<smem>>
    %732 = vector.broadcast %731 : f32 to vector<8x15xf32>
    %733 = arith.mulf %732, %722 : vector<8x15xf32>
    %734 = arith.addf %699, %733 : vector<8x15xf32>
    %c163 = arith.constant 163 : index
    %735 = memref.load %arg3[%c163] : memref<288xf32, #tpu.memory_space<smem>>
    %736 = vector.broadcast %735 : f32 to vector<8x15xf32>
    %737 = arith.mulf %736, %722 : vector<8x15xf32>
    %738 = arith.addf %703, %737 : vector<8x15xf32>
    %c164 = arith.constant 164 : index
    %739 = memref.load %arg3[%c164] : memref<288xf32, #tpu.memory_space<smem>>
    %740 = vector.broadcast %739 : f32 to vector<8x15xf32>
    %741 = arith.mulf %740, %722 : vector<8x15xf32>
    %742 = arith.addf %707, %741 : vector<8x15xf32>
    %c165 = arith.constant 165 : index
    %743 = memref.load %arg3[%c165] : memref<288xf32, #tpu.memory_space<smem>>
    %744 = vector.broadcast %743 : f32 to vector<8x15xf32>
    %745 = arith.mulf %744, %722 : vector<8x15xf32>
    %746 = arith.addf %711, %745 : vector<8x15xf32>
    %c166 = arith.constant 166 : index
    %747 = memref.load %arg3[%c166] : memref<288xf32, #tpu.memory_space<smem>>
    %748 = vector.broadcast %747 : f32 to vector<8x15xf32>
    %749 = arith.mulf %748, %722 : vector<8x15xf32>
    %750 = arith.addf %715, %749 : vector<8x15xf32>
    %c167 = arith.constant 167 : index
    %751 = memref.load %arg3[%c167] : memref<288xf32, #tpu.memory_space<smem>>
    %752 = vector.broadcast %751 : f32 to vector<8x15xf32>
    %753 = arith.mulf %752, %722 : vector<8x15xf32>
    %754 = arith.addf %719, %753 : vector<8x15xf32>
    %c0_71 = arith.constant 0 : index
    %c1_72 = arith.constant 1 : index
    %755 = arith.index_cast %439 : i32 to index
    %c2_73 = arith.constant 2 : index
    %756 = vector.load %arg2[%c0_71, %c1_72, %755, %c2_73] : memref<1x4x18x17xf32, #tpu.memory_space<vmem>>, vector<1x1x8x15xf32>
    %757 = vector.shape_cast %756 : vector<1x1x8x15xf32> to vector<8x15xf32>
    %c168 = arith.constant 168 : index
    %758 = memref.load %arg3[%c168] : memref<288xf32, #tpu.memory_space<smem>>
    %759 = vector.broadcast %758 : f32 to vector<8x15xf32>
    %760 = arith.mulf %759, %757 : vector<8x15xf32>
    %761 = arith.addf %726, %760 : vector<8x15xf32>
    %c169 = arith.constant 169 : index
    %762 = memref.load %arg3[%c169] : memref<288xf32, #tpu.memory_space<smem>>
    %763 = vector.broadcast %762 : f32 to vector<8x15xf32>
    %764 = arith.mulf %763, %757 : vector<8x15xf32>
    %765 = arith.addf %730, %764 : vector<8x15xf32>
    %c170 = arith.constant 170 : index
    %766 = memref.load %arg3[%c170] : memref<288xf32, #tpu.memory_space<smem>>
    %767 = vector.broadcast %766 : f32 to vector<8x15xf32>
    %768 = arith.mulf %767, %757 : vector<8x15xf32>
    %769 = arith.addf %734, %768 : vector<8x15xf32>
    %c171 = arith.constant 171 : index
    %770 = memref.load %arg3[%c171] : memref<288xf32, #tpu.memory_space<smem>>
    %771 = vector.broadcast %770 : f32 to vector<8x15xf32>
    %772 = arith.mulf %771, %757 : vector<8x15xf32>
    %773 = arith.addf %738, %772 : vector<8x15xf32>
    %c172 = arith.constant 172 : index
    %774 = memref.load %arg3[%c172] : memref<288xf32, #tpu.memory_space<smem>>
    %775 = vector.broadcast %774 : f32 to vector<8x15xf32>
    %776 = arith.mulf %775, %757 : vector<8x15xf32>
    %777 = arith.addf %742, %776 : vector<8x15xf32>
    %c173 = arith.constant 173 : index
    %778 = memref.load %arg3[%c173] : memref<288xf32, #tpu.memory_space<smem>>
    %779 = vector.broadcast %778 : f32 to vector<8x15xf32>
    %780 = arith.mulf %779, %757 : vector<8x15xf32>
    %781 = arith.addf %746, %780 : vector<8x15xf32>
    %c174 = arith.constant 174 : index
    %782 = memref.load %arg3[%c174] : memref<288xf32, #tpu.memory_space<smem>>
    %783 = vector.broadcast %782 : f32 to vector<8x15xf32>
    %784 = arith.mulf %783, %757 : vector<8x15xf32>
    %785 = arith.addf %750, %784 : vector<8x15xf32>
    %c175 = arith.constant 175 : index
    %786 = memref.load %arg3[%c175] : memref<288xf32, #tpu.memory_space<smem>>
    %787 = vector.broadcast %786 : f32 to vector<8x15xf32>
    %788 = arith.mulf %787, %757 : vector<8x15xf32>
    %789 = arith.addf %754, %788 : vector<8x15xf32>
    %c0_74 = arith.constant 0 : index
    %c2_75 = arith.constant 2 : index
    %790 = arith.index_cast %439 : i32 to index
    %c2_76 = arith.constant 2 : index
    %791 = vector.load %arg2[%c0_74, %c2_75, %790, %c2_76] : memref<1x4x18x17xf32, #tpu.memory_space<vmem>>, vector<1x1x8x15xf32>
    %792 = vector.shape_cast %791 : vector<1x1x8x15xf32> to vector<8x15xf32>
    %c176 = arith.constant 176 : index
    %793 = memref.load %arg3[%c176] : memref<288xf32, #tpu.memory_space<smem>>
    %794 = vector.broadcast %793 : f32 to vector<8x15xf32>
    %795 = arith.mulf %794, %792 : vector<8x15xf32>
    %796 = arith.addf %761, %795 : vector<8x15xf32>
    %c177 = arith.constant 177 : index
    %797 = memref.load %arg3[%c177] : memref<288xf32, #tpu.memory_space<smem>>
    %798 = vector.broadcast %797 : f32 to vector<8x15xf32>
    %799 = arith.mulf %798, %792 : vector<8x15xf32>
    %800 = arith.addf %765, %799 : vector<8x15xf32>
    %c178 = arith.constant 178 : index
    %801 = memref.load %arg3[%c178] : memref<288xf32, #tpu.memory_space<smem>>
    %802 = vector.broadcast %801 : f32 to vector<8x15xf32>
    %803 = arith.mulf %802, %792 : vector<8x15xf32>
    %804 = arith.addf %769, %803 : vector<8x15xf32>
    %c179 = arith.constant 179 : index
    %805 = memref.load %arg3[%c179] : memref<288xf32, #tpu.memory_space<smem>>
    %806 = vector.broadcast %805 : f32 to vector<8x15xf32>
    %807 = arith.mulf %806, %792 : vector<8x15xf32>
    %808 = arith.addf %773, %807 : vector<8x15xf32>
    %c180 = arith.constant 180 : index
    %809 = memref.load %arg3[%c180] : memref<288xf32, #tpu.memory_space<smem>>
    %810 = vector.broadcast %809 : f32 to vector<8x15xf32>
    %811 = arith.mulf %810, %792 : vector<8x15xf32>
    %812 = arith.addf %777, %811 : vector<8x15xf32>
    %c181 = arith.constant 181 : index
    %813 = memref.load %arg3[%c181] : memref<288xf32, #tpu.memory_space<smem>>
    %814 = vector.broadcast %813 : f32 to vector<8x15xf32>
    %815 = arith.mulf %814, %792 : vector<8x15xf32>
    %816 = arith.addf %781, %815 : vector<8x15xf32>
    %c182 = arith.constant 182 : index
    %817 = memref.load %arg3[%c182] : memref<288xf32, #tpu.memory_space<smem>>
    %818 = vector.broadcast %817 : f32 to vector<8x15xf32>
    %819 = arith.mulf %818, %792 : vector<8x15xf32>
    %820 = arith.addf %785, %819 : vector<8x15xf32>
    %c183 = arith.constant 183 : index
    %821 = memref.load %arg3[%c183] : memref<288xf32, #tpu.memory_space<smem>>
    %822 = vector.broadcast %821 : f32 to vector<8x15xf32>
    %823 = arith.mulf %822, %792 : vector<8x15xf32>
    %824 = arith.addf %789, %823 : vector<8x15xf32>
    %c0_77 = arith.constant 0 : index
    %c3_78 = arith.constant 3 : index
    %825 = arith.index_cast %439 : i32 to index
    %c2_79 = arith.constant 2 : index
    %826 = vector.load %arg2[%c0_77, %c3_78, %825, %c2_79] : memref<1x4x18x17xf32, #tpu.memory_space<vmem>>, vector<1x1x8x15xf32>
    %827 = vector.shape_cast %826 : vector<1x1x8x15xf32> to vector<8x15xf32>
    %c184 = arith.constant 184 : index
    %828 = memref.load %arg3[%c184] : memref<288xf32, #tpu.memory_space<smem>>
    %829 = vector.broadcast %828 : f32 to vector<8x15xf32>
    %830 = arith.mulf %829, %827 : vector<8x15xf32>
    %831 = arith.addf %796, %830 : vector<8x15xf32>
    %c185 = arith.constant 185 : index
    %832 = memref.load %arg3[%c185] : memref<288xf32, #tpu.memory_space<smem>>
    %833 = vector.broadcast %832 : f32 to vector<8x15xf32>
    %834 = arith.mulf %833, %827 : vector<8x15xf32>
    %835 = arith.addf %800, %834 : vector<8x15xf32>
    %c186 = arith.constant 186 : index
    %836 = memref.load %arg3[%c186] : memref<288xf32, #tpu.memory_space<smem>>
    %837 = vector.broadcast %836 : f32 to vector<8x15xf32>
    %838 = arith.mulf %837, %827 : vector<8x15xf32>
    %839 = arith.addf %804, %838 : vector<8x15xf32>
    %c187 = arith.constant 187 : index
    %840 = memref.load %arg3[%c187] : memref<288xf32, #tpu.memory_space<smem>>
    %841 = vector.broadcast %840 : f32 to vector<8x15xf32>
    %842 = arith.mulf %841, %827 : vector<8x15xf32>
    %843 = arith.addf %808, %842 : vector<8x15xf32>
    %c188 = arith.constant 188 : index
    %844 = memref.load %arg3[%c188] : memref<288xf32, #tpu.memory_space<smem>>
    %845 = vector.broadcast %844 : f32 to vector<8x15xf32>
    %846 = arith.mulf %845, %827 : vector<8x15xf32>
    %847 = arith.addf %812, %846 : vector<8x15xf32>
    %c189 = arith.constant 189 : index
    %848 = memref.load %arg3[%c189] : memref<288xf32, #tpu.memory_space<smem>>
    %849 = vector.broadcast %848 : f32 to vector<8x15xf32>
    %850 = arith.mulf %849, %827 : vector<8x15xf32>
    %851 = arith.addf %816, %850 : vector<8x15xf32>
    %c190 = arith.constant 190 : index
    %852 = memref.load %arg3[%c190] : memref<288xf32, #tpu.memory_space<smem>>
    %853 = vector.broadcast %852 : f32 to vector<8x15xf32>
    %854 = arith.mulf %853, %827 : vector<8x15xf32>
    %855 = arith.addf %820, %854 : vector<8x15xf32>
    %c191 = arith.constant 191 : index
    %856 = memref.load %arg3[%c191] : memref<288xf32, #tpu.memory_space<smem>>
    %857 = vector.broadcast %856 : f32 to vector<8x15xf32>
    %858 = arith.mulf %857, %827 : vector<8x15xf32>
    %859 = arith.addf %824, %858 : vector<8x15xf32>
    %c2_i32 = arith.constant 2 : i32
    %860 = arith.addi %1, %c2_i32 : i32
    %c0_80 = arith.constant 0 : index
    %c0_81 = arith.constant 0 : index
    %861 = arith.index_cast %860 : i32 to index
    %c0_82 = arith.constant 0 : index
    %862 = vector.load %arg2[%c0_80, %c0_81, %861, %c0_82] : memref<1x4x18x17xf32, #tpu.memory_space<vmem>>, vector<1x1x8x15xf32>
    %863 = vector.shape_cast %862 : vector<1x1x8x15xf32> to vector<8x15xf32>
    %c192 = arith.constant 192 : index
    %864 = memref.load %arg3[%c192] : memref<288xf32, #tpu.memory_space<smem>>
    %865 = vector.broadcast %864 : f32 to vector<8x15xf32>
    %866 = arith.mulf %865, %863 : vector<8x15xf32>
    %867 = arith.addf %831, %866 : vector<8x15xf32>
    %c193 = arith.constant 193 : index
    %868 = memref.load %arg3[%c193] : memref<288xf32, #tpu.memory_space<smem>>
    %869 = vector.broadcast %868 : f32 to vector<8x15xf32>
    %870 = arith.mulf %869, %863 : vector<8x15xf32>
    %871 = arith.addf %835, %870 : vector<8x15xf32>
    %c194 = arith.constant 194 : index
    %872 = memref.load %arg3[%c194] : memref<288xf32, #tpu.memory_space<smem>>
    %873 = vector.broadcast %872 : f32 to vector<8x15xf32>
    %874 = arith.mulf %873, %863 : vector<8x15xf32>
    %875 = arith.addf %839, %874 : vector<8x15xf32>
    %c195 = arith.constant 195 : index
    %876 = memref.load %arg3[%c195] : memref<288xf32, #tpu.memory_space<smem>>
    %877 = vector.broadcast %876 : f32 to vector<8x15xf32>
    %878 = arith.mulf %877, %863 : vector<8x15xf32>
    %879 = arith.addf %843, %878 : vector<8x15xf32>
    %c196 = arith.constant 196 : index
    %880 = memref.load %arg3[%c196] : memref<288xf32, #tpu.memory_space<smem>>
    %881 = vector.broadcast %880 : f32 to vector<8x15xf32>
    %882 = arith.mulf %881, %863 : vector<8x15xf32>
    %883 = arith.addf %847, %882 : vector<8x15xf32>
    %c197 = arith.constant 197 : index
    %884 = memref.load %arg3[%c197] : memref<288xf32, #tpu.memory_space<smem>>
    %885 = vector.broadcast %884 : f32 to vector<8x15xf32>
    %886 = arith.mulf %885, %863 : vector<8x15xf32>
    %887 = arith.addf %851, %886 : vector<8x15xf32>
    %c198 = arith.constant 198 : index
    %888 = memref.load %arg3[%c198] : memref<288xf32, #tpu.memory_space<smem>>
    %889 = vector.broadcast %888 : f32 to vector<8x15xf32>
    %890 = arith.mulf %889, %863 : vector<8x15xf32>
    %891 = arith.addf %855, %890 : vector<8x15xf32>
    %c199 = arith.constant 199 : index
    %892 = memref.load %arg3[%c199] : memref<288xf32, #tpu.memory_space<smem>>
    %893 = vector.broadcast %892 : f32 to vector<8x15xf32>
    %894 = arith.mulf %893, %863 : vector<8x15xf32>
    %895 = arith.addf %859, %894 : vector<8x15xf32>
    %c0_83 = arith.constant 0 : index
    %c1_84 = arith.constant 1 : index
    %896 = arith.index_cast %860 : i32 to index
    %c0_85 = arith.constant 0 : index
    %897 = vector.load %arg2[%c0_83, %c1_84, %896, %c0_85] : memref<1x4x18x17xf32, #tpu.memory_space<vmem>>, vector<1x1x8x15xf32>
    %898 = vector.shape_cast %897 : vector<1x1x8x15xf32> to vector<8x15xf32>
    %c200 = arith.constant 200 : index
    %899 = memref.load %arg3[%c200] : memref<288xf32, #tpu.memory_space<smem>>
    %900 = vector.broadcast %899 : f32 to vector<8x15xf32>
    %901 = arith.mulf %900, %898 : vector<8x15xf32>
    %902 = arith.addf %867, %901 : vector<8x15xf32>
    %c201 = arith.constant 201 : index
    %903 = memref.load %arg3[%c201] : memref<288xf32, #tpu.memory_space<smem>>
    %904 = vector.broadcast %903 : f32 to vector<8x15xf32>
    %905 = arith.mulf %904, %898 : vector<8x15xf32>
    %906 = arith.addf %871, %905 : vector<8x15xf32>
    %c202 = arith.constant 202 : index
    %907 = memref.load %arg3[%c202] : memref<288xf32, #tpu.memory_space<smem>>
    %908 = vector.broadcast %907 : f32 to vector<8x15xf32>
    %909 = arith.mulf %908, %898 : vector<8x15xf32>
    %910 = arith.addf %875, %909 : vector<8x15xf32>
    %c203 = arith.constant 203 : index
    %911 = memref.load %arg3[%c203] : memref<288xf32, #tpu.memory_space<smem>>
    %912 = vector.broadcast %911 : f32 to vector<8x15xf32>
    %913 = arith.mulf %912, %898 : vector<8x15xf32>
    %914 = arith.addf %879, %913 : vector<8x15xf32>
    %c204 = arith.constant 204 : index
    %915 = memref.load %arg3[%c204] : memref<288xf32, #tpu.memory_space<smem>>
    %916 = vector.broadcast %915 : f32 to vector<8x15xf32>
    %917 = arith.mulf %916, %898 : vector<8x15xf32>
    %918 = arith.addf %883, %917 : vector<8x15xf32>
    %c205 = arith.constant 205 : index
    %919 = memref.load %arg3[%c205] : memref<288xf32, #tpu.memory_space<smem>>
    %920 = vector.broadcast %919 : f32 to vector<8x15xf32>
    %921 = arith.mulf %920, %898 : vector<8x15xf32>
    %922 = arith.addf %887, %921 : vector<8x15xf32>
    %c206 = arith.constant 206 : index
    %923 = memref.load %arg3[%c206] : memref<288xf32, #tpu.memory_space<smem>>
    %924 = vector.broadcast %923 : f32 to vector<8x15xf32>
    %925 = arith.mulf %924, %898 : vector<8x15xf32>
    %926 = arith.addf %891, %925 : vector<8x15xf32>
    %c207 = arith.constant 207 : index
    %927 = memref.load %arg3[%c207] : memref<288xf32, #tpu.memory_space<smem>>
    %928 = vector.broadcast %927 : f32 to vector<8x15xf32>
    %929 = arith.mulf %928, %898 : vector<8x15xf32>
    %930 = arith.addf %895, %929 : vector<8x15xf32>
    %c0_86 = arith.constant 0 : index
    %c2_87 = arith.constant 2 : index
    %931 = arith.index_cast %860 : i32 to index
    %c0_88 = arith.constant 0 : index
    %932 = vector.load %arg2[%c0_86, %c2_87, %931, %c0_88] : memref<1x4x18x17xf32, #tpu.memory_space<vmem>>, vector<1x1x8x15xf32>
    %933 = vector.shape_cast %932 : vector<1x1x8x15xf32> to vector<8x15xf32>
    %c208 = arith.constant 208 : index
    %934 = memref.load %arg3[%c208] : memref<288xf32, #tpu.memory_space<smem>>
    %935 = vector.broadcast %934 : f32 to vector<8x15xf32>
    %936 = arith.mulf %935, %933 : vector<8x15xf32>
    %937 = arith.addf %902, %936 : vector<8x15xf32>
    %c209 = arith.constant 209 : index
    %938 = memref.load %arg3[%c209] : memref<288xf32, #tpu.memory_space<smem>>
    %939 = vector.broadcast %938 : f32 to vector<8x15xf32>
    %940 = arith.mulf %939, %933 : vector<8x15xf32>
    %941 = arith.addf %906, %940 : vector<8x15xf32>
    %c210 = arith.constant 210 : index
    %942 = memref.load %arg3[%c210] : memref<288xf32, #tpu.memory_space<smem>>
    %943 = vector.broadcast %942 : f32 to vector<8x15xf32>
    %944 = arith.mulf %943, %933 : vector<8x15xf32>
    %945 = arith.addf %910, %944 : vector<8x15xf32>
    %c211 = arith.constant 211 : index
    %946 = memref.load %arg3[%c211] : memref<288xf32, #tpu.memory_space<smem>>
    %947 = vector.broadcast %946 : f32 to vector<8x15xf32>
    %948 = arith.mulf %947, %933 : vector<8x15xf32>
    %949 = arith.addf %914, %948 : vector<8x15xf32>
    %c212 = arith.constant 212 : index
    %950 = memref.load %arg3[%c212] : memref<288xf32, #tpu.memory_space<smem>>
    %951 = vector.broadcast %950 : f32 to vector<8x15xf32>
    %952 = arith.mulf %951, %933 : vector<8x15xf32>
    %953 = arith.addf %918, %952 : vector<8x15xf32>
    %c213 = arith.constant 213 : index
    %954 = memref.load %arg3[%c213] : memref<288xf32, #tpu.memory_space<smem>>
    %955 = vector.broadcast %954 : f32 to vector<8x15xf32>
    %956 = arith.mulf %955, %933 : vector<8x15xf32>
    %957 = arith.addf %922, %956 : vector<8x15xf32>
    %c214 = arith.constant 214 : index
    %958 = memref.load %arg3[%c214] : memref<288xf32, #tpu.memory_space<smem>>
    %959 = vector.broadcast %958 : f32 to vector<8x15xf32>
    %960 = arith.mulf %959, %933 : vector<8x15xf32>
    %961 = arith.addf %926, %960 : vector<8x15xf32>
    %c215 = arith.constant 215 : index
    %962 = memref.load %arg3[%c215] : memref<288xf32, #tpu.memory_space<smem>>
    %963 = vector.broadcast %962 : f32 to vector<8x15xf32>
    %964 = arith.mulf %963, %933 : vector<8x15xf32>
    %965 = arith.addf %930, %964 : vector<8x15xf32>
    %c0_89 = arith.constant 0 : index
    %c3_90 = arith.constant 3 : index
    %966 = arith.index_cast %860 : i32 to index
    %c0_91 = arith.constant 0 : index
    %967 = vector.load %arg2[%c0_89, %c3_90, %966, %c0_91] : memref<1x4x18x17xf32, #tpu.memory_space<vmem>>, vector<1x1x8x15xf32>
    %968 = vector.shape_cast %967 : vector<1x1x8x15xf32> to vector<8x15xf32>
    %c216 = arith.constant 216 : index
    %969 = memref.load %arg3[%c216] : memref<288xf32, #tpu.memory_space<smem>>
    %970 = vector.broadcast %969 : f32 to vector<8x15xf32>
    %971 = arith.mulf %970, %968 : vector<8x15xf32>
    %972 = arith.addf %937, %971 : vector<8x15xf32>
    %c217 = arith.constant 217 : index
    %973 = memref.load %arg3[%c217] : memref<288xf32, #tpu.memory_space<smem>>
    %974 = vector.broadcast %973 : f32 to vector<8x15xf32>
    %975 = arith.mulf %974, %968 : vector<8x15xf32>
    %976 = arith.addf %941, %975 : vector<8x15xf32>
    %c218 = arith.constant 218 : index
    %977 = memref.load %arg3[%c218] : memref<288xf32, #tpu.memory_space<smem>>
    %978 = vector.broadcast %977 : f32 to vector<8x15xf32>
    %979 = arith.mulf %978, %968 : vector<8x15xf32>
    %980 = arith.addf %945, %979 : vector<8x15xf32>
    %c219 = arith.constant 219 : index
    %981 = memref.load %arg3[%c219] : memref<288xf32, #tpu.memory_space<smem>>
    %982 = vector.broadcast %981 : f32 to vector<8x15xf32>
    %983 = arith.mulf %982, %968 : vector<8x15xf32>
    %984 = arith.addf %949, %983 : vector<8x15xf32>
    %c220 = arith.constant 220 : index
    %985 = memref.load %arg3[%c220] : memref<288xf32, #tpu.memory_space<smem>>
    %986 = vector.broadcast %985 : f32 to vector<8x15xf32>
    %987 = arith.mulf %986, %968 : vector<8x15xf32>
    %988 = arith.addf %953, %987 : vector<8x15xf32>
    %c221 = arith.constant 221 : index
    %989 = memref.load %arg3[%c221] : memref<288xf32, #tpu.memory_space<smem>>
    %990 = vector.broadcast %989 : f32 to vector<8x15xf32>
    %991 = arith.mulf %990, %968 : vector<8x15xf32>
    %992 = arith.addf %957, %991 : vector<8x15xf32>
    %c222 = arith.constant 222 : index
    %993 = memref.load %arg3[%c222] : memref<288xf32, #tpu.memory_space<smem>>
    %994 = vector.broadcast %993 : f32 to vector<8x15xf32>
    %995 = arith.mulf %994, %968 : vector<8x15xf32>
    %996 = arith.addf %961, %995 : vector<8x15xf32>
    %c223 = arith.constant 223 : index
    %997 = memref.load %arg3[%c223] : memref<288xf32, #tpu.memory_space<smem>>
    %998 = vector.broadcast %997 : f32 to vector<8x15xf32>
    %999 = arith.mulf %998, %968 : vector<8x15xf32>
    %1000 = arith.addf %965, %999 : vector<8x15xf32>
    %c0_92 = arith.constant 0 : index
    %c0_93 = arith.constant 0 : index
    %1001 = arith.index_cast %860 : i32 to index
    %c1_94 = arith.constant 1 : index
    %1002 = vector.load %arg2[%c0_92, %c0_93, %1001, %c1_94] : memref<1x4x18x17xf32, #tpu.memory_space<vmem>>, vector<1x1x8x15xf32>
    %1003 = vector.shape_cast %1002 : vector<1x1x8x15xf32> to vector<8x15xf32>
    %c224 = arith.constant 224 : index
    %1004 = memref.load %arg3[%c224] : memref<288xf32, #tpu.memory_space<smem>>
    %1005 = vector.broadcast %1004 : f32 to vector<8x15xf32>
    %1006 = arith.mulf %1005, %1003 : vector<8x15xf32>
    %1007 = arith.addf %972, %1006 : vector<8x15xf32>
    %c225 = arith.constant 225 : index
    %1008 = memref.load %arg3[%c225] : memref<288xf32, #tpu.memory_space<smem>>
    %1009 = vector.broadcast %1008 : f32 to vector<8x15xf32>
    %1010 = arith.mulf %1009, %1003 : vector<8x15xf32>
    %1011 = arith.addf %976, %1010 : vector<8x15xf32>
    %c226 = arith.constant 226 : index
    %1012 = memref.load %arg3[%c226] : memref<288xf32, #tpu.memory_space<smem>>
    %1013 = vector.broadcast %1012 : f32 to vector<8x15xf32>
    %1014 = arith.mulf %1013, %1003 : vector<8x15xf32>
    %1015 = arith.addf %980, %1014 : vector<8x15xf32>
    %c227 = arith.constant 227 : index
    %1016 = memref.load %arg3[%c227] : memref<288xf32, #tpu.memory_space<smem>>
    %1017 = vector.broadcast %1016 : f32 to vector<8x15xf32>
    %1018 = arith.mulf %1017, %1003 : vector<8x15xf32>
    %1019 = arith.addf %984, %1018 : vector<8x15xf32>
    %c228 = arith.constant 228 : index
    %1020 = memref.load %arg3[%c228] : memref<288xf32, #tpu.memory_space<smem>>
    %1021 = vector.broadcast %1020 : f32 to vector<8x15xf32>
    %1022 = arith.mulf %1021, %1003 : vector<8x15xf32>
    %1023 = arith.addf %988, %1022 : vector<8x15xf32>
    %c229 = arith.constant 229 : index
    %1024 = memref.load %arg3[%c229] : memref<288xf32, #tpu.memory_space<smem>>
    %1025 = vector.broadcast %1024 : f32 to vector<8x15xf32>
    %1026 = arith.mulf %1025, %1003 : vector<8x15xf32>
    %1027 = arith.addf %992, %1026 : vector<8x15xf32>
    %c230 = arith.constant 230 : index
    %1028 = memref.load %arg3[%c230] : memref<288xf32, #tpu.memory_space<smem>>
    %1029 = vector.broadcast %1028 : f32 to vector<8x15xf32>
    %1030 = arith.mulf %1029, %1003 : vector<8x15xf32>
    %1031 = arith.addf %996, %1030 : vector<8x15xf32>
    %c231 = arith.constant 231 : index
    %1032 = memref.load %arg3[%c231] : memref<288xf32, #tpu.memory_space<smem>>
    %1033 = vector.broadcast %1032 : f32 to vector<8x15xf32>
    %1034 = arith.mulf %1033, %1003 : vector<8x15xf32>
    %1035 = arith.addf %1000, %1034 : vector<8x15xf32>
    %c0_95 = arith.constant 0 : index
    %c1_96 = arith.constant 1 : index
    %1036 = arith.index_cast %860 : i32 to index
    %c1_97 = arith.constant 1 : index
    %1037 = vector.load %arg2[%c0_95, %c1_96, %1036, %c1_97] : memref<1x4x18x17xf32, #tpu.memory_space<vmem>>, vector<1x1x8x15xf32>
    %1038 = vector.shape_cast %1037 : vector<1x1x8x15xf32> to vector<8x15xf32>
    %c232 = arith.constant 232 : index
    %1039 = memref.load %arg3[%c232] : memref<288xf32, #tpu.memory_space<smem>>
    %1040 = vector.broadcast %1039 : f32 to vector<8x15xf32>
    %1041 = arith.mulf %1040, %1038 : vector<8x15xf32>
    %1042 = arith.addf %1007, %1041 : vector<8x15xf32>
    %c233 = arith.constant 233 : index
    %1043 = memref.load %arg3[%c233] : memref<288xf32, #tpu.memory_space<smem>>
    %1044 = vector.broadcast %1043 : f32 to vector<8x15xf32>
    %1045 = arith.mulf %1044, %1038 : vector<8x15xf32>
    %1046 = arith.addf %1011, %1045 : vector<8x15xf32>
    %c234 = arith.constant 234 : index
    %1047 = memref.load %arg3[%c234] : memref<288xf32, #tpu.memory_space<smem>>
    %1048 = vector.broadcast %1047 : f32 to vector<8x15xf32>
    %1049 = arith.mulf %1048, %1038 : vector<8x15xf32>
    %1050 = arith.addf %1015, %1049 : vector<8x15xf32>
    %c235 = arith.constant 235 : index
    %1051 = memref.load %arg3[%c235] : memref<288xf32, #tpu.memory_space<smem>>
    %1052 = vector.broadcast %1051 : f32 to vector<8x15xf32>
    %1053 = arith.mulf %1052, %1038 : vector<8x15xf32>
    %1054 = arith.addf %1019, %1053 : vector<8x15xf32>
    %c236 = arith.constant 236 : index
    %1055 = memref.load %arg3[%c236] : memref<288xf32, #tpu.memory_space<smem>>
    %1056 = vector.broadcast %1055 : f32 to vector<8x15xf32>
    %1057 = arith.mulf %1056, %1038 : vector<8x15xf32>
    %1058 = arith.addf %1023, %1057 : vector<8x15xf32>
    %c237 = arith.constant 237 : index
    %1059 = memref.load %arg3[%c237] : memref<288xf32, #tpu.memory_space<smem>>
    %1060 = vector.broadcast %1059 : f32 to vector<8x15xf32>
    %1061 = arith.mulf %1060, %1038 : vector<8x15xf32>
    %1062 = arith.addf %1027, %1061 : vector<8x15xf32>
    %c238 = arith.constant 238 : index
    %1063 = memref.load %arg3[%c238] : memref<288xf32, #tpu.memory_space<smem>>
    %1064 = vector.broadcast %1063 : f32 to vector<8x15xf32>
    %1065 = arith.mulf %1064, %1038 : vector<8x15xf32>
    %1066 = arith.addf %1031, %1065 : vector<8x15xf32>
    %c239 = arith.constant 239 : index
    %1067 = memref.load %arg3[%c239] : memref<288xf32, #tpu.memory_space<smem>>
    %1068 = vector.broadcast %1067 : f32 to vector<8x15xf32>
    %1069 = arith.mulf %1068, %1038 : vector<8x15xf32>
    %1070 = arith.addf %1035, %1069 : vector<8x15xf32>
    %c0_98 = arith.constant 0 : index
    %c2_99 = arith.constant 2 : index
    %1071 = arith.index_cast %860 : i32 to index
    %c1_100 = arith.constant 1 : index
    %1072 = vector.load %arg2[%c0_98, %c2_99, %1071, %c1_100] : memref<1x4x18x17xf32, #tpu.memory_space<vmem>>, vector<1x1x8x15xf32>
    %1073 = vector.shape_cast %1072 : vector<1x1x8x15xf32> to vector<8x15xf32>
    %c240 = arith.constant 240 : index
    %1074 = memref.load %arg3[%c240] : memref<288xf32, #tpu.memory_space<smem>>
    %1075 = vector.broadcast %1074 : f32 to vector<8x15xf32>
    %1076 = arith.mulf %1075, %1073 : vector<8x15xf32>
    %1077 = arith.addf %1042, %1076 : vector<8x15xf32>
    %c241 = arith.constant 241 : index
    %1078 = memref.load %arg3[%c241] : memref<288xf32, #tpu.memory_space<smem>>
    %1079 = vector.broadcast %1078 : f32 to vector<8x15xf32>
    %1080 = arith.mulf %1079, %1073 : vector<8x15xf32>
    %1081 = arith.addf %1046, %1080 : vector<8x15xf32>
    %c242 = arith.constant 242 : index
    %1082 = memref.load %arg3[%c242] : memref<288xf32, #tpu.memory_space<smem>>
    %1083 = vector.broadcast %1082 : f32 to vector<8x15xf32>
    %1084 = arith.mulf %1083, %1073 : vector<8x15xf32>
    %1085 = arith.addf %1050, %1084 : vector<8x15xf32>
    %c243 = arith.constant 243 : index
    %1086 = memref.load %arg3[%c243] : memref<288xf32, #tpu.memory_space<smem>>
    %1087 = vector.broadcast %1086 : f32 to vector<8x15xf32>
    %1088 = arith.mulf %1087, %1073 : vector<8x15xf32>
    %1089 = arith.addf %1054, %1088 : vector<8x15xf32>
    %c244 = arith.constant 244 : index
    %1090 = memref.load %arg3[%c244] : memref<288xf32, #tpu.memory_space<smem>>
    %1091 = vector.broadcast %1090 : f32 to vector<8x15xf32>
    %1092 = arith.mulf %1091, %1073 : vector<8x15xf32>
    %1093 = arith.addf %1058, %1092 : vector<8x15xf32>
    %c245 = arith.constant 245 : index
    %1094 = memref.load %arg3[%c245] : memref<288xf32, #tpu.memory_space<smem>>
    %1095 = vector.broadcast %1094 : f32 to vector<8x15xf32>
    %1096 = arith.mulf %1095, %1073 : vector<8x15xf32>
    %1097 = arith.addf %1062, %1096 : vector<8x15xf32>
    %c246 = arith.constant 246 : index
    %1098 = memref.load %arg3[%c246] : memref<288xf32, #tpu.memory_space<smem>>
    %1099 = vector.broadcast %1098 : f32 to vector<8x15xf32>
    %1100 = arith.mulf %1099, %1073 : vector<8x15xf32>
    %1101 = arith.addf %1066, %1100 : vector<8x15xf32>
    %c247 = arith.constant 247 : index
    %1102 = memref.load %arg3[%c247] : memref<288xf32, #tpu.memory_space<smem>>
    %1103 = vector.broadcast %1102 : f32 to vector<8x15xf32>
    %1104 = arith.mulf %1103, %1073 : vector<8x15xf32>
    %1105 = arith.addf %1070, %1104 : vector<8x15xf32>
    %c0_101 = arith.constant 0 : index
    %c3_102 = arith.constant 3 : index
    %1106 = arith.index_cast %860 : i32 to index
    %c1_103 = arith.constant 1 : index
    %1107 = vector.load %arg2[%c0_101, %c3_102, %1106, %c1_103] : memref<1x4x18x17xf32, #tpu.memory_space<vmem>>, vector<1x1x8x15xf32>
    %1108 = vector.shape_cast %1107 : vector<1x1x8x15xf32> to vector<8x15xf32>
    %c248 = arith.constant 248 : index
    %1109 = memref.load %arg3[%c248] : memref<288xf32, #tpu.memory_space<smem>>
    %1110 = vector.broadcast %1109 : f32 to vector<8x15xf32>
    %1111 = arith.mulf %1110, %1108 : vector<8x15xf32>
    %1112 = arith.addf %1077, %1111 : vector<8x15xf32>
    %c249 = arith.constant 249 : index
    %1113 = memref.load %arg3[%c249] : memref<288xf32, #tpu.memory_space<smem>>
    %1114 = vector.broadcast %1113 : f32 to vector<8x15xf32>
    %1115 = arith.mulf %1114, %1108 : vector<8x15xf32>
    %1116 = arith.addf %1081, %1115 : vector<8x15xf32>
    %c250 = arith.constant 250 : index
    %1117 = memref.load %arg3[%c250] : memref<288xf32, #tpu.memory_space<smem>>
    %1118 = vector.broadcast %1117 : f32 to vector<8x15xf32>
    %1119 = arith.mulf %1118, %1108 : vector<8x15xf32>
    %1120 = arith.addf %1085, %1119 : vector<8x15xf32>
    %c251 = arith.constant 251 : index
    %1121 = memref.load %arg3[%c251] : memref<288xf32, #tpu.memory_space<smem>>
    %1122 = vector.broadcast %1121 : f32 to vector<8x15xf32>
    %1123 = arith.mulf %1122, %1108 : vector<8x15xf32>
    %1124 = arith.addf %1089, %1123 : vector<8x15xf32>
    %c252 = arith.constant 252 : index
    %1125 = memref.load %arg3[%c252] : memref<288xf32, #tpu.memory_space<smem>>
    %1126 = vector.broadcast %1125 : f32 to vector<8x15xf32>
    %1127 = arith.mulf %1126, %1108 : vector<8x15xf32>
    %1128 = arith.addf %1093, %1127 : vector<8x15xf32>
    %c253 = arith.constant 253 : index
    %1129 = memref.load %arg3[%c253] : memref<288xf32, #tpu.memory_space<smem>>
    %1130 = vector.broadcast %1129 : f32 to vector<8x15xf32>
    %1131 = arith.mulf %1130, %1108 : vector<8x15xf32>
    %1132 = arith.addf %1097, %1131 : vector<8x15xf32>
    %c254 = arith.constant 254 : index
    %1133 = memref.load %arg3[%c254] : memref<288xf32, #tpu.memory_space<smem>>
    %1134 = vector.broadcast %1133 : f32 to vector<8x15xf32>
    %1135 = arith.mulf %1134, %1108 : vector<8x15xf32>
    %1136 = arith.addf %1101, %1135 : vector<8x15xf32>
    %c255 = arith.constant 255 : index
    %1137 = memref.load %arg3[%c255] : memref<288xf32, #tpu.memory_space<smem>>
    %1138 = vector.broadcast %1137 : f32 to vector<8x15xf32>
    %1139 = arith.mulf %1138, %1108 : vector<8x15xf32>
    %1140 = arith.addf %1105, %1139 : vector<8x15xf32>
    %c0_104 = arith.constant 0 : index
    %c0_105 = arith.constant 0 : index
    %1141 = arith.index_cast %860 : i32 to index
    %c2_106 = arith.constant 2 : index
    %1142 = vector.load %arg2[%c0_104, %c0_105, %1141, %c2_106] : memref<1x4x18x17xf32, #tpu.memory_space<vmem>>, vector<1x1x8x15xf32>
    %1143 = vector.shape_cast %1142 : vector<1x1x8x15xf32> to vector<8x15xf32>
    %c256 = arith.constant 256 : index
    %1144 = memref.load %arg3[%c256] : memref<288xf32, #tpu.memory_space<smem>>
    %1145 = vector.broadcast %1144 : f32 to vector<8x15xf32>
    %1146 = arith.mulf %1145, %1143 : vector<8x15xf32>
    %1147 = arith.addf %1112, %1146 : vector<8x15xf32>
    %c257 = arith.constant 257 : index
    %1148 = memref.load %arg3[%c257] : memref<288xf32, #tpu.memory_space<smem>>
    %1149 = vector.broadcast %1148 : f32 to vector<8x15xf32>
    %1150 = arith.mulf %1149, %1143 : vector<8x15xf32>
    %1151 = arith.addf %1116, %1150 : vector<8x15xf32>
    %c258 = arith.constant 258 : index
    %1152 = memref.load %arg3[%c258] : memref<288xf32, #tpu.memory_space<smem>>
    %1153 = vector.broadcast %1152 : f32 to vector<8x15xf32>
    %1154 = arith.mulf %1153, %1143 : vector<8x15xf32>
    %1155 = arith.addf %1120, %1154 : vector<8x15xf32>
    %c259 = arith.constant 259 : index
    %1156 = memref.load %arg3[%c259] : memref<288xf32, #tpu.memory_space<smem>>
    %1157 = vector.broadcast %1156 : f32 to vector<8x15xf32>
    %1158 = arith.mulf %1157, %1143 : vector<8x15xf32>
    %1159 = arith.addf %1124, %1158 : vector<8x15xf32>
    %c260 = arith.constant 260 : index
    %1160 = memref.load %arg3[%c260] : memref<288xf32, #tpu.memory_space<smem>>
    %1161 = vector.broadcast %1160 : f32 to vector<8x15xf32>
    %1162 = arith.mulf %1161, %1143 : vector<8x15xf32>
    %1163 = arith.addf %1128, %1162 : vector<8x15xf32>
    %c261 = arith.constant 261 : index
    %1164 = memref.load %arg3[%c261] : memref<288xf32, #tpu.memory_space<smem>>
    %1165 = vector.broadcast %1164 : f32 to vector<8x15xf32>
    %1166 = arith.mulf %1165, %1143 : vector<8x15xf32>
    %1167 = arith.addf %1132, %1166 : vector<8x15xf32>
    %c262 = arith.constant 262 : index
    %1168 = memref.load %arg3[%c262] : memref<288xf32, #tpu.memory_space<smem>>
    %1169 = vector.broadcast %1168 : f32 to vector<8x15xf32>
    %1170 = arith.mulf %1169, %1143 : vector<8x15xf32>
    %1171 = arith.addf %1136, %1170 : vector<8x15xf32>
    %c263 = arith.constant 263 : index
    %1172 = memref.load %arg3[%c263] : memref<288xf32, #tpu.memory_space<smem>>
    %1173 = vector.broadcast %1172 : f32 to vector<8x15xf32>
    %1174 = arith.mulf %1173, %1143 : vector<8x15xf32>
    %1175 = arith.addf %1140, %1174 : vector<8x15xf32>
    %c0_107 = arith.constant 0 : index
    %c1_108 = arith.constant 1 : index
    %1176 = arith.index_cast %860 : i32 to index
    %c2_109 = arith.constant 2 : index
    %1177 = vector.load %arg2[%c0_107, %c1_108, %1176, %c2_109] : memref<1x4x18x17xf32, #tpu.memory_space<vmem>>, vector<1x1x8x15xf32>
    %1178 = vector.shape_cast %1177 : vector<1x1x8x15xf32> to vector<8x15xf32>
    %c264 = arith.constant 264 : index
    %1179 = memref.load %arg3[%c264] : memref<288xf32, #tpu.memory_space<smem>>
    %1180 = vector.broadcast %1179 : f32 to vector<8x15xf32>
    %1181 = arith.mulf %1180, %1178 : vector<8x15xf32>
    %1182 = arith.addf %1147, %1181 : vector<8x15xf32>
    %c265 = arith.constant 265 : index
    %1183 = memref.load %arg3[%c265] : memref<288xf32, #tpu.memory_space<smem>>
    %1184 = vector.broadcast %1183 : f32 to vector<8x15xf32>
    %1185 = arith.mulf %1184, %1178 : vector<8x15xf32>
    %1186 = arith.addf %1151, %1185 : vector<8x15xf32>
    %c266 = arith.constant 266 : index
    %1187 = memref.load %arg3[%c266] : memref<288xf32, #tpu.memory_space<smem>>
    %1188 = vector.broadcast %1187 : f32 to vector<8x15xf32>
    %1189 = arith.mulf %1188, %1178 : vector<8x15xf32>
    %1190 = arith.addf %1155, %1189 : vector<8x15xf32>
    %c267 = arith.constant 267 : index
    %1191 = memref.load %arg3[%c267] : memref<288xf32, #tpu.memory_space<smem>>
    %1192 = vector.broadcast %1191 : f32 to vector<8x15xf32>
    %1193 = arith.mulf %1192, %1178 : vector<8x15xf32>
    %1194 = arith.addf %1159, %1193 : vector<8x15xf32>
    %c268 = arith.constant 268 : index
    %1195 = memref.load %arg3[%c268] : memref<288xf32, #tpu.memory_space<smem>>
    %1196 = vector.broadcast %1195 : f32 to vector<8x15xf32>
    %1197 = arith.mulf %1196, %1178 : vector<8x15xf32>
    %1198 = arith.addf %1163, %1197 : vector<8x15xf32>
    %c269 = arith.constant 269 : index
    %1199 = memref.load %arg3[%c269] : memref<288xf32, #tpu.memory_space<smem>>
    %1200 = vector.broadcast %1199 : f32 to vector<8x15xf32>
    %1201 = arith.mulf %1200, %1178 : vector<8x15xf32>
    %1202 = arith.addf %1167, %1201 : vector<8x15xf32>
    %c270 = arith.constant 270 : index
    %1203 = memref.load %arg3[%c270] : memref<288xf32, #tpu.memory_space<smem>>
    %1204 = vector.broadcast %1203 : f32 to vector<8x15xf32>
    %1205 = arith.mulf %1204, %1178 : vector<8x15xf32>
    %1206 = arith.addf %1171, %1205 : vector<8x15xf32>
    %c271 = arith.constant 271 : index
    %1207 = memref.load %arg3[%c271] : memref<288xf32, #tpu.memory_space<smem>>
    %1208 = vector.broadcast %1207 : f32 to vector<8x15xf32>
    %1209 = arith.mulf %1208, %1178 : vector<8x15xf32>
    %1210 = arith.addf %1175, %1209 : vector<8x15xf32>
    %c0_110 = arith.constant 0 : index
    %c2_111 = arith.constant 2 : index
    %1211 = arith.index_cast %860 : i32 to index
    %c2_112 = arith.constant 2 : index
    %1212 = vector.load %arg2[%c0_110, %c2_111, %1211, %c2_112] : memref<1x4x18x17xf32, #tpu.memory_space<vmem>>, vector<1x1x8x15xf32>
    %1213 = vector.shape_cast %1212 : vector<1x1x8x15xf32> to vector<8x15xf32>
    %c272 = arith.constant 272 : index
    %1214 = memref.load %arg3[%c272] : memref<288xf32, #tpu.memory_space<smem>>
    %1215 = vector.broadcast %1214 : f32 to vector<8x15xf32>
    %1216 = arith.mulf %1215, %1213 : vector<8x15xf32>
    %1217 = arith.addf %1182, %1216 : vector<8x15xf32>
    %c273 = arith.constant 273 : index
    %1218 = memref.load %arg3[%c273] : memref<288xf32, #tpu.memory_space<smem>>
    %1219 = vector.broadcast %1218 : f32 to vector<8x15xf32>
    %1220 = arith.mulf %1219, %1213 : vector<8x15xf32>
    %1221 = arith.addf %1186, %1220 : vector<8x15xf32>
    %c274 = arith.constant 274 : index
    %1222 = memref.load %arg3[%c274] : memref<288xf32, #tpu.memory_space<smem>>
    %1223 = vector.broadcast %1222 : f32 to vector<8x15xf32>
    %1224 = arith.mulf %1223, %1213 : vector<8x15xf32>
    %1225 = arith.addf %1190, %1224 : vector<8x15xf32>
    %c275 = arith.constant 275 : index
    %1226 = memref.load %arg3[%c275] : memref<288xf32, #tpu.memory_space<smem>>
    %1227 = vector.broadcast %1226 : f32 to vector<8x15xf32>
    %1228 = arith.mulf %1227, %1213 : vector<8x15xf32>
    %1229 = arith.addf %1194, %1228 : vector<8x15xf32>
    %c276 = arith.constant 276 : index
    %1230 = memref.load %arg3[%c276] : memref<288xf32, #tpu.memory_space<smem>>
    %1231 = vector.broadcast %1230 : f32 to vector<8x15xf32>
    %1232 = arith.mulf %1231, %1213 : vector<8x15xf32>
    %1233 = arith.addf %1198, %1232 : vector<8x15xf32>
    %c277 = arith.constant 277 : index
    %1234 = memref.load %arg3[%c277] : memref<288xf32, #tpu.memory_space<smem>>
    %1235 = vector.broadcast %1234 : f32 to vector<8x15xf32>
    %1236 = arith.mulf %1235, %1213 : vector<8x15xf32>
    %1237 = arith.addf %1202, %1236 : vector<8x15xf32>
    %c278 = arith.constant 278 : index
    %1238 = memref.load %arg3[%c278] : memref<288xf32, #tpu.memory_space<smem>>
    %1239 = vector.broadcast %1238 : f32 to vector<8x15xf32>
    %1240 = arith.mulf %1239, %1213 : vector<8x15xf32>
    %1241 = arith.addf %1206, %1240 : vector<8x15xf32>
    %c279 = arith.constant 279 : index
    %1242 = memref.load %arg3[%c279] : memref<288xf32, #tpu.memory_space<smem>>
    %1243 = vector.broadcast %1242 : f32 to vector<8x15xf32>
    %1244 = arith.mulf %1243, %1213 : vector<8x15xf32>
    %1245 = arith.addf %1210, %1244 : vector<8x15xf32>
    %c0_113 = arith.constant 0 : index
    %c3_114 = arith.constant 3 : index
    %1246 = arith.index_cast %860 : i32 to index
    %c2_115 = arith.constant 2 : index
    %1247 = vector.load %arg2[%c0_113, %c3_114, %1246, %c2_115] : memref<1x4x18x17xf32, #tpu.memory_space<vmem>>, vector<1x1x8x15xf32>
    %1248 = vector.shape_cast %1247 : vector<1x1x8x15xf32> to vector<8x15xf32>
    %c280 = arith.constant 280 : index
    %1249 = memref.load %arg3[%c280] : memref<288xf32, #tpu.memory_space<smem>>
    %1250 = vector.broadcast %1249 : f32 to vector<8x15xf32>
    %1251 = arith.mulf %1250, %1248 : vector<8x15xf32>
    %1252 = arith.addf %1217, %1251 : vector<8x15xf32>
    %c281 = arith.constant 281 : index
    %1253 = memref.load %arg3[%c281] : memref<288xf32, #tpu.memory_space<smem>>
    %1254 = vector.broadcast %1253 : f32 to vector<8x15xf32>
    %1255 = arith.mulf %1254, %1248 : vector<8x15xf32>
    %1256 = arith.addf %1221, %1255 : vector<8x15xf32>
    %c282 = arith.constant 282 : index
    %1257 = memref.load %arg3[%c282] : memref<288xf32, #tpu.memory_space<smem>>
    %1258 = vector.broadcast %1257 : f32 to vector<8x15xf32>
    %1259 = arith.mulf %1258, %1248 : vector<8x15xf32>
    %1260 = arith.addf %1225, %1259 : vector<8x15xf32>
    %c283 = arith.constant 283 : index
    %1261 = memref.load %arg3[%c283] : memref<288xf32, #tpu.memory_space<smem>>
    %1262 = vector.broadcast %1261 : f32 to vector<8x15xf32>
    %1263 = arith.mulf %1262, %1248 : vector<8x15xf32>
    %1264 = arith.addf %1229, %1263 : vector<8x15xf32>
    %c284 = arith.constant 284 : index
    %1265 = memref.load %arg3[%c284] : memref<288xf32, #tpu.memory_space<smem>>
    %1266 = vector.broadcast %1265 : f32 to vector<8x15xf32>
    %1267 = arith.mulf %1266, %1248 : vector<8x15xf32>
    %1268 = arith.addf %1233, %1267 : vector<8x15xf32>
    %c285 = arith.constant 285 : index
    %1269 = memref.load %arg3[%c285] : memref<288xf32, #tpu.memory_space<smem>>
    %1270 = vector.broadcast %1269 : f32 to vector<8x15xf32>
    %1271 = arith.mulf %1270, %1248 : vector<8x15xf32>
    %1272 = arith.addf %1237, %1271 : vector<8x15xf32>
    %c286 = arith.constant 286 : index
    %1273 = memref.load %arg3[%c286] : memref<288xf32, #tpu.memory_space<smem>>
    %1274 = vector.broadcast %1273 : f32 to vector<8x15xf32>
    %1275 = arith.mulf %1274, %1248 : vector<8x15xf32>
    %1276 = arith.addf %1241, %1275 : vector<8x15xf32>
    %c287 = arith.constant 287 : index
    %1277 = memref.load %arg3[%c287] : memref<288xf32, #tpu.memory_space<smem>>
    %1278 = vector.broadcast %1277 : f32 to vector<8x15xf32>
    %1279 = arith.mulf %1278, %1248 : vector<8x15xf32>
    %1280 = arith.addf %1245, %1279 : vector<8x15xf32>
    %c0_116 = arith.constant 0 : index
    %c0_117 = arith.constant 0 : index
    %c0_118 = arith.constant 0 : index
    %c0_119 = arith.constant 0 : index
    %1281 = vector.load %arg5[%c0_116, %c0_117, %c0_118, %c0_119] : memref<1x8x8x15xf32, #tpu.memory_space<vmem>>, vector<1x1x8x15xf32>
    %1282 = vector.shape_cast %1281 : vector<1x1x8x15xf32> to vector<8x15xf32>
    %1283 = vector.shape_cast %1252 : vector<8x15xf32> to vector<1x1x8x15xf32>
    tpu.vector_store %arg5[%c0_116, %c0_117, %c0_118, %c0_119], %1283 {strides = array<i32>} : memref<1x8x8x15xf32, #tpu.memory_space<vmem>>, vector<1x1x8x15xf32>,
    %c0_120 = arith.constant 0 : index
    %c1_121 = arith.constant 1 : index
    %c0_122 = arith.constant 0 : index
    %c0_123 = arith.constant 0 : index
    %1284 = vector.load %arg5[%c0_120, %c1_121, %c0_122, %c0_123] : memref<1x8x8x15xf32, #tpu.memory_space<vmem>>, vector<1x1x8x15xf32>
    %1285 = vector.shape_cast %1284 : vector<1x1x8x15xf32> to vector<8x15xf32>
    %1286 = vector.shape_cast %1256 : vector<8x15xf32> to vector<1x1x8x15xf32>
    tpu.vector_store %arg5[%c0_120, %c1_121, %c0_122, %c0_123], %1286 {strides = array<i32>} : memref<1x8x8x15xf32, #tpu.memory_space<vmem>>, vector<1x1x8x15xf32>,
    %c0_124 = arith.constant 0 : index
    %c2_125 = arith.constant 2 : index
    %c0_126 = arith.constant 0 : index
    %c0_127 = arith.constant 0 : index
    %1287 = vector.load %arg5[%c0_124, %c2_125, %c0_126, %c0_127] : memref<1x8x8x15xf32, #tpu.memory_space<vmem>>, vector<1x1x8x15xf32>
    %1288 = vector.shape_cast %1287 : vector<1x1x8x15xf32> to vector<8x15xf32>
    %1289 = vector.shape_cast %1260 : vector<8x15xf32> to vector<1x1x8x15xf32>
    tpu.vector_store %arg5[%c0_124, %c2_125, %c0_126, %c0_127], %1289 {strides = array<i32>} : memref<1x8x8x15xf32, #tpu.memory_space<vmem>>, vector<1x1x8x15xf32>,
    %c0_128 = arith.constant 0 : index
    %c3_129 = arith.constant 3 : index
    %c0_130 = arith.constant 0 : index
    %c0_131 = arith.constant 0 : index
    %1290 = vector.load %arg5[%c0_128, %c3_129, %c0_130, %c0_131] : memref<1x8x8x15xf32, #tpu.memory_space<vmem>>, vector<1x1x8x15xf32>
    %1291 = vector.shape_cast %1290 : vector<1x1x8x15xf32> to vector<8x15xf32>
    %1292 = vector.shape_cast %1264 : vector<8x15xf32> to vector<1x1x8x15xf32>
    tpu.vector_store %arg5[%c0_128, %c3_129, %c0_130, %c0_131], %1292 {strides = array<i32>} : memref<1x8x8x15xf32, #tpu.memory_space<vmem>>, vector<1x1x8x15xf32>,
    %c0_132 = arith.constant 0 : index
    %c4_133 = arith.constant 4 : index
    %c0_134 = arith.constant 0 : index
    %c0_135 = arith.constant 0 : index
    %1293 = vector.load %arg5[%c0_132, %c4_133, %c0_134, %c0_135] : memref<1x8x8x15xf32, #tpu.memory_space<vmem>>, vector<1x1x8x15xf32>
    %1294 = vector.shape_cast %1293 : vector<1x1x8x15xf32> to vector<8x15xf32>
    %1295 = vector.shape_cast %1268 : vector<8x15xf32> to vector<1x1x8x15xf32>
    tpu.vector_store %arg5[%c0_132, %c4_133, %c0_134, %c0_135], %1295 {strides = array<i32>} : memref<1x8x8x15xf32, #tpu.memory_space<vmem>>, vector<1x1x8x15xf32>,
    %c0_136 = arith.constant 0 : index
    %c5_137 = arith.constant 5 : index
    %c0_138 = arith.constant 0 : index
    %c0_139 = arith.constant 0 : index
    %1296 = vector.load %arg5[%c0_136, %c5_137, %c0_138, %c0_139] : memref<1x8x8x15xf32, #tpu.memory_space<vmem>>, vector<1x1x8x15xf32>
    %1297 = vector.shape_cast %1296 : vector<1x1x8x15xf32> to vector<8x15xf32>
    %1298 = vector.shape_cast %1272 : vector<8x15xf32> to vector<1x1x8x15xf32>
    tpu.vector_store %arg5[%c0_136, %c5_137, %c0_138, %c0_139], %1298 {strides = array<i32>} : memref<1x8x8x15xf32, #tpu.memory_space<vmem>>, vector<1x1x8x15xf32>,
    %c0_140 = arith.constant 0 : index
    %c6_141 = arith.constant 6 : index
    %c0_142 = arith.constant 0 : index
    %c0_143 = arith.constant 0 : index
    %1299 = vector.load %arg5[%c0_140, %c6_141, %c0_142, %c0_143] : memref<1x8x8x15xf32, #tpu.memory_space<vmem>>, vector<1x1x8x15xf32>
    %1300 = vector.shape_cast %1299 : vector<1x1x8x15xf32> to vector<8x15xf32>
    %1301 = vector.shape_cast %1276 : vector<8x15xf32> to vector<1x1x8x15xf32>
    tpu.vector_store %arg5[%c0_140, %c6_141, %c0_142, %c0_143], %1301 {strides = array<i32>} : memref<1x8x8x15xf32, #tpu.memory_space<vmem>>, vector<1x1x8x15xf32>,
    %c0_144 = arith.constant 0 : index
    %c7_145 = arith.constant 7 : index
    %c0_146 = arith.constant 0 : index
    %c0_147 = arith.constant 0 : index
    %1302 = vector.load %arg5[%c0_144, %c7_145, %c0_146, %c0_147] : memref<1x8x8x15xf32, #tpu.memory_space<vmem>>, vector<1x1x8x15xf32>
    %1303 = vector.shape_cast %1302 : vector<1x1x8x15xf32> to vector<8x15xf32>
    %1304 = vector.shape_cast %1280 : vector<8x15xf32> to vector<1x1x8x15xf32>
    tpu.vector_store %arg5[%c0_144, %c7_145, %c0_146, %c0_147], %1304 {strides = array<i32>} : memref<1x8x8x15xf32, #tpu.memory_space<vmem>>, vector<1x1x8x15xf32>,
    return
  }
  func.func @transform_0(%arg0: i32, %arg1: i32) -> (i32, i32, i32, i32) {
    %c0_i32 = arith.constant 0 : i32
    %c0_i32_0 = arith.constant 0 : i32
    %c0_i32_1 = arith.constant 0 : i32
    %c0_i32_2 = arith.constant 0 : i32
    return %arg0, %c0_i32, %c0_i32_0, %c0_i32_1 : i32, i32, i32, i32
  }
  func.func @transform_1(%arg0: i32, %arg1: i32) -> i32 {
    %c0_i32 = arith.constant 0 : i32
    %c0_i32_0 = arith.constant 0 : i32
    return %c0_i32 : i32
  }
  func.func @transform_2(%arg0: i32, %arg1: i32) -> i32 {
    %c0_i32 = arith.constant 0 : i32
    %c0_i32_0 = arith.constant 0 : i32
    return %c0_i32 : i32
  }
  func.func @transform_3(%arg0: i32, %arg1: i32) -> (i32, i32, i32, i32) {
    %c0_i32 = arith.constant 0 : i32
    %c0_i32_0 = arith.constant 0 : i32
    %c0_i32_1 = arith.constant 0 : i32
    return %arg0, %c0_i32, %arg1, %c0_i32_0 : i32, i32, i32, i32
  }
}

</mosaic_0001>

<bundles_post_ra>
// kernel: tpu_custom_call.1
= control target key start
LH: loop header
LB: loop body
LE: loop exit
PB: predicated region body
PF: predicated region fallthrough
CT: control target
= control target key end

     0   :  { %s4795_s0 = inlined_call_operand.vmem [shape: f32[2,4,18,17], index: 0, kind: input, shape index: {}]   ;;  %s4796_s1 = inlined_call_operand.vmem [shape: f32[288], index: 1, kind: input, shape index: {}]   ;;  %s4797_s2 = inlined_call_operand.vmem [shape: f32[8], index: 2, kind: input, shape index: {}]   ;;  %s4798_s3 = inlined_call_operand.vmem [shape: f32[2,8,16,15], index: 3, kind: output, shape index: {}]  }
   0x1   :  { %4818 = sst [smem:[#allocation74_spill]] %s4795_s0 }
   0x2   :  { %4819 = sst [smem:[#allocation75_spill]] %s4796_s1 }
   0x3   :  { %4820 = sst [smem:[#allocation76_spill]] %s4797_s2 }
   0x4   :  { %4821 = sst [smem:[#allocation77_spill]] %s4798_s3 }
   0x5   :  { %8 = vsyncpa [#allocation3], 0 }
   0x6   :  { %9 = vsyncpa [#allocation5], 0  ;;  %s2934_s12 = smov 0   ;;  %s2936_s13 = smov 0  }
   0x7   :  { %s2938_s14 = smov 0   ;;  %s2940_s15 = smov 0  }
   0x8   :  { %s2942_s16 = smov 0   ;;  %s2944_s17 = smov 0  }
   0x9   :  { %s2946_s18 = smov 0  }
   0xa LB: > { %4822 = sst [smem:[#allocation9_spill]] %s2884_s12  ;;  %s2387_s19 = sadd.s32 4294967295, %s2908_s18   ;;  %s2908_s18 = sphi %s2946_s18, %s15_s18   ;;  %s2904_s17 = sphi %s2944_s17, %s4979_s17   ;;  %s2900_s16 = sphi %s2942_s16, %s4978_s16   ;;  %s2896_s15 = sphi %s2940_s15, %s4977_s15   ;;  %s2892_s14 = sphi %s2938_s14, %s4976_s14   ;;  %s2888_s13 = sphi %s2936_s13, %s4975_s13   ;;  %s2884_s12 = sphi %s2934_s12, %s4974_s12  }
   0xb   : > { %4823 = sst [smem:[#allocation10_spill]] %s2888_s13  ;;  %s24_s20 = sadd.s32 1, %s2900_s16 }
   0xc   : > { %4824 = sst [smem:[#allocation11_spill]] %s2892_s14  ;;  %p25_p0 = scmp.ge.s32.totalorder %s24_s20, 2 }
   0xd   : > { %4825 = sst [smem:[#allocation12_spill]] %s2896_s15  ;;  %s27_s21 = sadd.s32 1, %s2904_s17 }
   0xe   : > { %4826 = sst [smem:[#allocation13_spill]] %s2900_s16  ;;  %s104_s22 = sadd.s32 1, %s2888_s13 }
   0xf   : > { %4827 = sst [smem:[#allocation14_spill]] %s2904_s17  ;;  %p114_p1 = scmp.ne.s32.totalorder %s2888_s13, %s2884_s12 }
  0x10   : > { %4828 = sst [smem:[#allocation15_spill]] %s2908_s18  ;;  %s4981_s20 = smov (%p25_p0, %s24_s20), 0 }
  0x11   : > { %4829 = sst [smem:[#allocation16_spill]] %s4981_s20  ;;  %s4983_s21 = smov (!%p25_p0, %s27_s21), %s2904_s17 }
  0x12   : > { %s100_s23 = ssub.s32 %s2900_s16, %s4981_s20  ;;  %p115_p2 = scmp.eq.s32.totalorder %s2387_s19, 3 }
  0x13   : > { %p29_p3 = scmp.ge.s32.totalorder %s4983_s21, 2  ;;  %p2389_p4 = scmp.ge.s32.totalorder %s2908_s18, 1 }
  0x14   : > { %p2981_p5 = por %p115_p2, %p114_p1  ;;  %p128_p6 = scmp.lt.s32.totalorder %s2908_s18, 5 }
  0x15   : > { %s4985_s21 = smov (%p29_p3, %s4983_s21), 0  ;;  %p2994_p8 = scmp.eq.s32.totalorder %s2387_s19, 0 }
  0x16   : > { %s4830_s24 = scalar_select %p2981_p5, 1, 0 }
  0x17   : > { %4832 = sst [smem:[#allocation18_spill]] %s4985_s21  ;;  %p2988_p7 = pnand %p2389_p4, %p128_p6 }
  0x18   : > { %4831 = sst [smem:[#allocation17_spill]] %s4830_s24  ;;  %s99_s26 = ssub.s32 %s2904_s17, %s4985_s21 }
  0x19   : > { %s101_s28 = sor.u32 %s100_s23, %s99_s26  ;;  %p2736_p9 = pneg %p2988_p7 }
  0x1a   : > { %p102_p10 = scmp.eq.s32.totalorder %s101_s28, 0  ;;  %s4835_s1 = sld [smem:[#allocation75_spill]] }
  0x1b   : > { %p3005_p11 = pnand %p2994_p8, %p2736_p9 }
  0x1c   : > { %s3010_s6 = scalar_select %p102_p10, %s2888_s13, %s104_s22  }
  0x1d   : > { %p2818_p13 = pneg %p3005_p11 }
  0x1e   : > { %4837 = sst [smem:[#allocation19_spill]] %s3010_s6 }
  0x20   : > { %s141_s4 = sshll.u32 %s4835_s1, 4  ;;  %s142_s4 = int_to_ptr.vmem [resolvable:$true] %s141_s4 }
  0x21   : > { %s2816_s7 = scalar_lea.vmem %s142_s4, 48  ;;  %s2823_s8 = scalar_lea.vmem %s142_s4, 64 }
  0x22   : > { %p2817_p12 = scmp.ne.s32.totalorder %s142_s4, %s2816_s7  ;;  %p2824_p2 = scmp.lt.s32.totalorder %s142_s4, %s142_s4 }
  0x23   : > { %p2825_p3 = scmp.lt.s32.totalorder %s2823_s8, %s2816_s7 }
  0x24   : > { %p2819_p0 = pnand %p2818_p13, %p2817_p12 }
  0x25   : > { %p2826_p4 = por %p2825_p3, %p2824_p2 }
  0x26   : > { %p2820_p1 = pneg %p2819_p0 }
  0x28   : > { %p2827_p6 = pnand %p2826_p4, %p2820_p1 }
  0x2a   : > { %2830 = shalt.err (!%p2827_p6)
}
  0x2b   : > { %s2910_s9 = smov [#allocation2]   ;;  %s4838_s2 = sld [smem:[#allocation76_spill]] }
  0x2c   : > { %2739 = dma.vmem_to_smem (!%p3005_p11), %s142_s4, 48, %s2910_s9, [#allocation3]  }
  0x31   : > { %s152_s19 = sshll.u32 %s4838_s2, 4  ;;  %s153_s19 = int_to_ptr.vmem [resolvable:$true] %s152_s19 }
  0x32   : > { %s2831_s22 = scalar_lea.vmem %s153_s19, 16  ;;  %p2839_p0 = scmp.lt.s32.totalorder %s153_s19, %s153_s19 }
  0x33   : > { %p2832_p9 = scmp.ne.s32.totalorder %s153_s19, %s2831_s22  ;;  %p2840_p2 = scmp.lt.s32.totalorder %s2831_s22, %s2831_s22 }
  0x35   : > { %p2834_p10 = pnand %p2832_p9, %p2818_p13  ;;  %p2841_p1 = por %p2840_p2, %p2839_p0 }
  0x37   : > { %p2835_p12 = pneg %p2834_p10 }
  0x39   : > { %p2842_p3 = pnand %p2841_p1, %p2835_p12 }
  0x3b   : > { %2845 = shalt.err (!%p2842_p3)
}
  0x3c   : > { %s2911_s23 = smov [#allocation4]   ;;  %173 = sbr.rel (%p2988_p7) target bundleno = 592 (0x250), region = 32 }
  0x3d   : > { %2742 = dma.vmem_to_smem (!%p3005_p11), %s153_s19, 16, %s2911_s23, [#allocation5]  }
  0x41   : > { %2875 = dma.done.wait (%p2994_p8), [#allocation3], 48  }
  0x42   : > { %2877 = vsyncadd (%p2994_p8), [#allocation3], 4294967248 }
  0x43   : > { %2879 = dma.done.wait (%p2994_p8), [#allocation5], 16  }
  0x44   : > { %2881 = vsyncadd (%p2994_p8), [#allocation5], 4294967280 }
  0x45   : > { %183 = sfence }
  0x46   : > { %p201_p11 = scmp.lt.s32.totalorder %s2896_s15, 1  ;;  %s2445_s26 = sld [smem:[#allocation2 + $0x22]]  ;;  %vm2178_vm0 = vcmask 121856  }
  0x47   : > { %s2398_s28 = sshll.u32 %s2892_s14, 3  ;;  %s2443_s29 = sld [smem:[#allocation2 + $0x20]] }
  0x48   : > { %s202_s25 = scalar_select %p201_p11, %s2896_s15, 1 }
  0x49   : > { %s2446_s4 = sld [smem:[#allocation2 + $0x23]]  ;;  %s4812_s23 = smov 127  }
  0x4a   : > { %s2727_s30 = smul.u32 96, %s202_s25  ;;  %s2444_s5 = sld [smem:[#allocation2 + $0x21]] }
  0x4b   : > { %s4839_s0 = sld [smem:[#allocation74_spill]] }
  0x4c   : > { %s2448_s10 = sld [smem:[#allocation2 + $0x25]]  ;;  %v379_v0 = vstv %s2445_s26 }
  0x4d   : > { %s2447_s27 = sld [smem:[#allocation2 + $0x24]]  ;;  %v363_v3 = vstv %s2443_s29 }
  0x4e   : > { %s2450_s19 = sld [smem:[#allocation2 + $0x27]] }
  0x4f   : > { %s2449_s22 = sld [smem:[#allocation2 + $0x26]]  ;;  %v387_v5 = vstv %s2446_s4 }
  0x50   : > { %v371_v7 = vstv %s2444_s5  ;;  %s2452_s26 = sld [smem:[#allocation2 + $0x29]] }
  0x51   : > { %s205_s9 = scalar_lea.vmem %s4839_s0, %s2727_s30  ;;  %s2451_s25 = sld [smem:[#allocation2 + $0x28]] }
  0x52   : > { %s3043_s11 = scalar_lea.vmem %s205_s9, %s2398_s28  ;;  %v403_v9 = vstv %s2448_s10  ;;  %s2454_s28 = sld [smem:[#allocation2 + $0x2b]] }
  0x53   : > { %v3046_v1 = vld [vmem:[%s3043_s11] sm:$0xff]  ;;  %v395_v10 = vstv %s2447_s27  ;;  %s2453_s29 = sld [smem:[#allocation2 + $0x2a]]  ;;  %v3063_v17 = vld [vmem:[%s3043_s11 + $0x18] sm:$0xff]  ;;  %v3082_v34 = vld [vmem:[%s3043_s11 + $0x30] sm:$0xff] }
  0x54   : > { %v380_v2 = vmul.f32 %v379_v0, %v3046_v1  ;;  %v364_v4 = vmul.f32 %v363_v3, %v3046_v1  ;;  %v388_v6 = vmul.f32 %v387_v5, %v3046_v1  ;;  %v372_v8 = vmul.f32 %v371_v7, %v3046_v1  ;;  %s2456_s30 = sld [smem:[#allocation2 + $0x2d]]  ;;  %v3101_v51 = vld [vmem:[%s3043_s11 + $0x48] sm:$0xff] }
  0x55   : > { %v404_v11 = vmul.f32 %v403_v9, %v3046_v1  ;;  %v396_v12 = vmul.f32 %v395_v10, %v3046_v1  ;;  %v419_v13 = vstv %s2450_s19  ;;  %v411_v14 = vstv %s2449_s22  ;;  %s2455_s4 = sld [smem:[#allocation2 + $0x2c]] }
  0x56   : > { %382 = vrot.lane.b32.xlu1 %v380_v2, %s4812_s23  ;;  %366 = vrot.lane.b32.xlu0 %v364_v4, %s4812_s23  ;;  %v420_v15 = vmul.f32 %v419_v13, %v3046_v1  ;;  %v412_v16 = vmul.f32 %v411_v14, %v3046_v1  ;;  %v435_v18 = vstv %s2452_s26  ;;  %s2458_s5 = sld [smem:[#allocation2 + $0x2f]] }
  0x57   : > { %v427_v19 = vstv %s2451_s25  ;;  %v436_v20 = vmul.f32 %v3063_v17, %v435_v18  ;;  %s2457_s7 = sld [smem:[#allocation2 + $0x2e]] }
  0x58   : > { %v428_v21 = vmul.f32 %v3063_v17, %v427_v19  ;;  %v451_v22 = vstv %s2454_s28  ;;  %s2460_s8 = sld [smem:[#allocation2 + $0x31]] }
  0x59   : > { %v443_v23 = vstv %s2453_s29  ;;  %v452_v24 = vmul.f32 %v3063_v17, %v451_v22  ;;  %s2459_s9 = sld [smem:[#allocation2 + $0x30]] }
  0x5a   : > { %390 = vrot.lane.b32.xlu1 %v388_v6, %s4812_s23  ;;  %374 = vrot.lane.b32.xlu0 %v372_v8, %s4812_s23  ;;  %v444_v25 = vmul.f32 %v3063_v17, %v443_v23  ;;  %v467_v26 = vstv %s2456_s30  ;;  %s2462_s10 = sld [smem:[#allocation2 + $0x33]] }
  0x5b   : > { %v459_v27 = vstv %s2455_s4  ;;  %v468_v28 = vmul.f32 %v3063_v17, %v467_v26  ;;  %s2461_s27 = sld [smem:[#allocation2 + $0x32]] }
  0x5c   : > { %v460_v29 = vmul.f32 %v3063_v17, %v459_v27  ;;  %v483_v30 = vstv %s2458_s5  ;;  %s2464_s19 = sld [smem:[#allocation2 + $0x35]] }
  0x5d   : > { %v475_v31 = vstv %s2457_s7  ;;  %v484_v32 = vmul.f32 %v3063_v17, %v483_v30  ;;  %s2463_s22 = sld [smem:[#allocation2 + $0x34]] }
  0x5e   : > { %406 = vrot.lane.b32.xlu1 %v404_v11, %s4812_s23  ;;  %398 = vrot.lane.b32.xlu0 %v396_v12, %s4812_s23  ;;  %v476_v33 = vmul.f32 %v3063_v17, %v475_v31  ;;  %v499_v35 = vstv %s2460_s8  ;;  %s2466_s26 = sld [smem:[#allocation2 + $0x37]] }
  0x5f   : > { %v491_v36 = vstv %s2459_s9  ;;  %v500_v37 = vmul.f32 %v3082_v34, %v499_v35  ;;  %s2465_s25 = sld [smem:[#allocation2 + $0x36]] }
  0x60   : > { %v492_v38 = vmul.f32 %v3082_v34, %v491_v36  ;;  %v515_v39 = vstv %s2462_s10  ;;  %s2468_s28 = sld [smem:[#allocation2 + $0x39]] }
  0x61   : > { %v507_v40 = vstv %s2461_s27  ;;  %v516_v41 = vmul.f32 %v3082_v34, %v515_v39  ;;  %s2467_s29 = sld [smem:[#allocation2 + $0x38]] }
  0x62   : > { %422 = vrot.lane.b32.xlu1 %v420_v15, %s4812_s23  ;;  %414 = vrot.lane.b32.xlu0 %v412_v16, %s4812_s23  ;;  %v508_v42 = vmul.f32 %v3082_v34, %v507_v40  ;;  %v531_v43 = vstv %s2464_s19  ;;  %s2470_s30 = sld [smem:[#allocation2 + $0x3b]] }
  0x63   : > { %v523_v44 = vstv %s2463_s22  ;;  %v532_v45 = vmul.f32 %v3082_v34, %v531_v43  ;;  %s2469_s4 = sld [smem:[#allocation2 + $0x3a]] }
  0x64   : > { %v524_v46 = vmul.f32 %v3082_v34, %v523_v44  ;;  %v547_v47 = vstv %s2466_s26  ;;  %s2472_s5 = sld [smem:[#allocation2 + $0x3d]] }
  0x65   : > { %v539_v48 = vstv %s2465_s25  ;;  %v548_v49 = vmul.f32 %v3082_v34, %v547_v47  ;;  %s2471_s7 = sld [smem:[#allocation2 + $0x3c]] }
  0x66   : > { %438 = vrot.lane.b32.xlu1 %v436_v20, %s4812_s23  ;;  %430 = vrot.lane.b32.xlu0 %v428_v21, %s4812_s23  ;;  %v540_v50 = vmul.f32 %v3082_v34, %v539_v48  ;;  %v563_v52 = vstv %s2468_s28  ;;  %s2474_s8 = sld [smem:[#allocation2 + $0x3f]] }
  0x67   : > { %v555_v53 = vstv %s2467_s29  ;;  %v564_v54 = vmul.f32 %v3101_v51, %v563_v52  ;;  %s2473_s9 = sld [smem:[#allocation2 + $0x3e]] }
  0x68   : > { %v556_v55 = vmul.f32 %v3101_v51, %v555_v53  ;;  %v579_v56 = vstv %s2470_s30  ;;  %s2476_s10 = sld [smem:[#allocation2 + $0x41]]  ;;  %s4799_s30 = smov 126  }
  0x69   : > { %v571_v57 = vstv %s2469_s4  ;;  %v580_v58 = vmul.f32 %v3101_v51, %v579_v56  ;;  %s2475_s27 = sld [smem:[#allocation2 + $0x40]] }
  0x6a   : > { %454 = vrot.lane.b32.xlu1 %v452_v24, %s4812_s23  ;;  %446 = vrot.lane.b32.xlu0 %v444_v25, %s4812_s23  ;;  %v572_v59 = vmul.f32 %v3101_v51, %v571_v57  ;;  %v595_v60 = vstv %s2472_s5  ;;  %s2478_s19 = sld [smem:[#allocation2 + $0x43]] }
  0x6b   : > { %v587_v61 = vstv %s2471_s7  ;;  %v596_v62 = vmul.f32 %v3101_v51, %v595_v60  ;;  %s2477_s22 = sld [smem:[#allocation2 + $0x42]] }
  0x6c   : > { %v588_v63 = vmul.f32 %v3101_v51, %v587_v61  ;;  %v611_v0 = vstv %s2474_s8  ;;  %s2480_s26 = sld [smem:[#allocation2 + $0x45]] }
  0x6d   : > { %v603_v2 = vstv %s2473_s9  ;;  %v612_v3 = vmul.f32 %v3101_v51, %v611_v0  ;;  %s2479_s25 = sld [smem:[#allocation2 + $0x44]] }
  0x6e   : > { %470 = vrot.lane.b32.xlu1 %v468_v28, %s4812_s23  ;;  %462 = vrot.lane.b32.xlu0 %v460_v29, %s4812_s23  ;;  %v604_v4 = vmul.f32 %v3101_v51, %v603_v2  ;;  %v627_v5 = vstv %s2476_s10  ;;  %s2482_s28 = sld [smem:[#allocation2 + $0x47]] }
  0x6f   : > { %v619_v6 = vstv %s2475_s27  ;;  %v628_v7 = vmul.f32 %v627_v5, %v3046_v1  ;;  %s2481_s29 = sld [smem:[#allocation2 + $0x46]] }
  0x70   : > { %v620_v8 = vmul.f32 %v619_v6, %v3046_v1  ;;  %v643_v9 = vstv %s2478_s19  ;;  %s2484_s4 = sld [smem:[#allocation2 + $0x49]] }
  0x71   : > { %v635_v10 = vstv %s2477_s22  ;;  %v644_v11 = vmul.f32 %v643_v9, %v3046_v1  ;;  %s2483_s5 = sld [smem:[#allocation2 + $0x48]] }
  0x72   : > { %486 = vrot.lane.b32.xlu1 %v484_v32, %s4812_s23  ;;  %478 = vrot.lane.b32.xlu0 %v476_v33, %s4812_s23  ;;  %v636_v12 = vmul.f32 %v635_v10, %v3046_v1  ;;  %v659_v13 = vstv %s2480_s26  ;;  %s2486_s7 = sld [smem:[#allocation2 + $0x4b]] }
  0x73   : > { %v651_v14 = vstv %s2479_s25  ;;  %v660_v15 = vmul.f32 %v659_v13, %v3046_v1  ;;  %s2485_s8 = sld [smem:[#allocation2 + $0x4a]] }
  0x74   : > { %v652_v16 = vmul.f32 %v651_v14, %v3046_v1  ;;  %v675_v18 = vstv %s2482_s28  ;;  %s2488_s9 = sld [smem:[#allocation2 + $0x4d]] }
  0x75   : > { %v667_v19 = vstv %s2481_s29  ;;  %v676_v20 = vmul.f32 %v675_v18, %v3046_v1  ;;  %s2487_s10 = sld [smem:[#allocation2 + $0x4c]] }
  0x76   : > { %502 = vrot.lane.b32.xlu1 %v500_v37, %s4812_s23  ;;  %494 = vrot.lane.b32.xlu0 %v492_v38, %s4812_s23  ;;  %v668_v21 = vmul.f32 %v667_v19, %v3046_v1  ;;  %v691_v22 = vstv %s2484_s4  ;;  %s2490_s27 = sld [smem:[#allocation2 + $0x4f]] }
  0x77   : > { %v683_v23 = vstv %s2483_s5  ;;  %v692_v24 = vmul.f32 %v3063_v17, %v691_v22  ;;  %s2489_s19 = sld [smem:[#allocation2 + $0x4e]] }
  0x78   : > { %v684_v25 = vmul.f32 %v3063_v17, %v683_v23  ;;  %v707_v26 = vstv %s2486_s7  ;;  %s2492_s22 = sld [smem:[#allocation2 + $0x51]] }
  0x79   : > { %v699_v27 = vstv %s2485_s8  ;;  %v708_v1 = vmul.f32 %v3063_v17, %v707_v26  ;;  %s2491_s26 = sld [smem:[#allocation2 + $0x50]] }
  0x7a   : > { %518 = vrot.lane.b32.xlu1 %v516_v41, %s4812_s23  ;;  %510 = vrot.lane.b32.xlu0 %v508_v42, %s4812_s23  ;;  %v700_v28 = vmul.f32 %v3063_v17, %v699_v27  ;;  %v723_v29 = vstv %s2488_s9  ;;  %s2494_s25 = sld [smem:[#allocation2 + $0x53]] }
  0x7b   : > { %v715_v30 = vstv %s2487_s10  ;;  %v724_v31 = vmul.f32 %v3063_v17, %v723_v29  ;;  %s2493_s28 = sld [smem:[#allocation2 + $0x52]] }
  0x7c   : > { %v716_v32 = vmul.f32 %v3063_v17, %v715_v30  ;;  %v739_v33 = vstv %s2490_s27  ;;  %s2496_s29 = sld [smem:[#allocation2 + $0x55]] }
  0x7d   : > { %v731_v35 = vstv %s2489_s19  ;;  %v740_v36 = vmul.f32 %v3063_v17, %v739_v33  ;;  %s2495_s4 = sld [smem:[#allocation2 + $0x54]] }
  0x7e   : > { %534 = vrot.lane.b32.xlu1 %v532_v45, %s4812_s23  ;;  %526 = vrot.lane.b32.xlu0 %v524_v46, %s4812_s23  ;;  %v732_v37 = vmul.f32 %v3063_v17, %v731_v35  ;;  %v755_v38 = vstv %s2492_s22  ;;  %s2498_s5 = sld [smem:[#allocation2 + $0x57]] }
  0x7f   : > { %v747_v39 = vstv %s2491_s26  ;;  %v756_v40 = vmul.f32 %v3082_v34, %v755_v38  ;;  %s2497_s7 = sld [smem:[#allocation2 + $0x56]]  ;;  %v3231_v38 = vld [vmem:[%s3043_s11 + $0x19] sm:$0xff] }
  0x80   : > { %v748_v41 = vmul.f32 %v3082_v34, %v747_v39  ;;  %v771_v42 = vstv %s2494_s25  ;;  %s2500_s8 = sld [smem:[#allocation2 + $0x59]] }
  0x81   : > { %v763_v43 = vstv %s2493_s28  ;;  %v772_v44 = vmul.f32 %v3082_v34, %v771_v42  ;;  %s2499_s9 = sld [smem:[#allocation2 + $0x58]] }
  0x82   : > { %550 = vrot.lane.b32.xlu1 %v548_v49, %s4812_s23  ;;  %542 = vrot.lane.b32.xlu0 %v540_v50, %s4812_s23  ;;  %v764_v45 = vmul.f32 %v3082_v34, %v763_v43  ;;  %v787_v46 = vstv %s2496_s29  ;;  %s2502_s10 = sld [smem:[#allocation2 + $0x5b]] }
  0x83   : > { %v779_v47 = vstv %s2495_s4  ;;  %v788_v48 = vmul.f32 %v3082_v34, %v787_v46  ;;  %s2501_s27 = sld [smem:[#allocation2 + $0x5a]] }
  0x84   : > { %v780_v49 = vmul.f32 %v3082_v34, %v779_v47  ;;  %v803_v50 = vstv %s2498_s5  ;;  %s2504_s19 = sld [smem:[#allocation2 + $0x5d]] }
  0x85   : > { %v795_v52 = vstv %s2497_s7  ;;  %v804_v53 = vmul.f32 %v3082_v34, %v803_v50  ;;  %s2503_s22 = sld [smem:[#allocation2 + $0x5c]] }
  0x86   : > { %566 = vrot.lane.b32.xlu1 %v564_v54, %s4812_s23  ;;  %558 = vrot.lane.b32.xlu0 %v556_v55, %s4812_s23  ;;  %v796_v54 = vmul.f32 %v3082_v34, %v795_v52  ;;  %v819_v55 = vstv %s2500_s8  ;;  %s2506_s26 = sld [smem:[#allocation2 + $0x5f]] }
  0x87   : > { %v811_v56 = vstv %s2499_s9  ;;  %v820_v57 = vmul.f32 %v3101_v51, %v819_v55  ;;  %s2505_s25 = sld [smem:[#allocation2 + $0x5e]] }
  0x88   : > { %s2548_s28 = sld [smem:[#allocation2 + $0x81]] }
  0x89   : > { %v827_v60 = vstv %s2501_s27  ;;  %s2547_s29 = sld [smem:[#allocation2 + $0x80]] }
  0x8a   : > { %582 = vrot.lane.b32.xlu1 %v580_v58, %s4812_s23  ;;  %574 = vrot.lane.b32.xlu0 %v572_v59, %s4812_s23  ;;  %v812_v58 = vmul.f32 %v3101_v51, %v811_v56  ;;  %v835_v59 = vstv %s2502_s10  ;;  %s2550_s4 = sld [smem:[#allocation2 + $0x83]] }
  0x8b   : > { %v836_v61 = vmul.f32 %v3101_v51, %v835_v59  ;;  %v843_v2 = vstv %s2503_s22  ;;  %s2549_s5 = sld [smem:[#allocation2 + $0x82]] }
  0x8c   : > { %v844_v5 = vmul.f32 %v3101_v51, %v843_v2  ;;  %v867_v6 = vstv %s2506_s26  ;;  %s2552_s7 = sld [smem:[#allocation2 + $0x85]]  ;;  %v3304_v2 = vld [vmem:[%s3043_s11 + $0x31] sm:$0xff] }
  0x8d   : > { %v868_v10 = vmul.f32 %v3101_v51, %v867_v6  ;;  %s2551_s8 = sld [smem:[#allocation2 + $0x84]] }
  0x8e   : > { %598 = vrot.lane.b32.xlu1 %v596_v62, %s4812_s23  ;;  %590 = vrot.lane.b32.xlu0 %v588_v63, %s4812_s23  ;;  %v828_v62 = vmul.f32 %v3101_v51, %v827_v60  ;;  %v851_v63 = vstv %s2504_s19  ;;  %v1023_v13 = vstv %s2548_s28  ;;  %s2554_s9 = sld [smem:[#allocation2 + $0x87]] }
  0x8f   : > { %s2553_s10 = sld [smem:[#allocation2 + $0x86]] }
  0x90   : > { %s2556_s27 = sld [smem:[#allocation2 + $0x89]] }
  0x91   : > { %v1031_v22 = vstv %s2549_s5  ;;  %s2555_s19 = sld [smem:[#allocation2 + $0x88]] }
  0x92   : > { %614 = vrot.lane.b32.xlu1 %v612_v3, %s4812_s23  ;;  %606 = vrot.lane.b32.xlu0 %v604_v4, %s4812_s23  ;;  %v852_v4 = vmul.f32 %v3101_v51, %v851_v63  ;;  %v1055_v26 = vstv %s2552_s7  ;;  %s3218_s22 = sld [smem:[#allocation2 + $0x8b]] }
  0x93   : > { %s3222_s26 = sld [smem:[#allocation2 + $0x8a]] }
  0x94   : > { %s3237_s28 = sld [smem:[#allocation2 + $0x8c]] }
  0x95   : > { %v1063_v33 = vstv %s2553_s10  ;;  %s3250_s5 = sld [smem:[#allocation2 + $0x8f]] }
  0x96   : > { %630 = vrot.lane.b32.xlu1 %v628_v7, %s4799_s30  ;;  %622 = vrot.lane.b32.xlu0 %v620_v8, %s4799_s30  ;;  %v859_v8 = vstv %s2505_s25  ;;  %v1087_v39 = vstv %s2556_s27  ;;  %s3233_s25 = sld [smem:[#allocation2 + $0x8d]] }
  0x97   : > { %v1088_v43 = vmul.f32 %v3231_v38, %v1087_v39  ;;  %s3255_s7 = sld [smem:[#allocation2 + $0x8e]] }
  0x98   : > { %s3268_s10 = sld [smem:[#allocation2 + $0x91]] }
  0x99   : > { %v1095_v47 = vstv %s3222_s26  ;;  %s3273_s27 = sld [smem:[#allocation2 + $0x90]] }
  0x9a   : > { %646 = vrot.lane.b32.xlu1 %v644_v11, %s4799_s30  ;;  %638 = vrot.lane.b32.xlu0 %v636_v12, %s4799_s30  ;;  %v860_v11 = vmul.f32 %v3101_v51, %v859_v8  ;;  %v3192_v12 = vld [vmem:[%s3043_s11 + $0x1] sm:$0xff]  ;;  %v1096_v50 = vmul.f32 %v3231_v38, %v1095_v47  ;;  %s3286_s26 = sld [smem:[#allocation2 + $0x93]] }
  0x9b   : > { %v1024_v18 = vmul.f32 %v3192_v12, %v1023_v13  ;;  %v1056_v29 = vmul.f32 %v3192_v12, %v1055_v26  ;;  %s3314_s0 = sld [smem:[#allocation2 + $0x10]] }
  0x9c   : > { %v1119_v52 = vstv %s3233_s25  ;;  %s3291_s25 = sld [smem:[#allocation2 + $0x92]] }
  0x9d   : > { %v1120_v56 = vmul.f32 %v3231_v38, %v1119_v52  ;;  %v1127_v60 = vstv %s3255_s7  ;;  %s3312_s7 = sld [smem:[#allocation2 + $0x94]] }
  0x9e   : > { %662 = vrot.lane.b32.xlu1 %v660_v15, %s4799_s30  ;;  %654 = vrot.lane.b32.xlu0 %v652_v16, %s4799_s30  ;;  %v1015_v15 = vstv %s2547_s29  ;;  %s3239_s29 = sld [smem:[#allocation4 + $0x2]]  ;;  %v1128_v63 = vmul.f32 %v3231_v38, %v1127_v60 }
  0x9f   : > { %v1016_v19 = vmul.f32 %v3192_v12, %v1015_v15  ;;  %v1143_v6 = vstv %s3273_s27  ;;  %s3318_s1 = sld [smem:[#allocation2 + $0x18]] }
  0xa0   : > { %v1167_v13 = vstv %s3286_s26  ;;  %s3330_s27 = sld [smem:[#allocation2 + $0x96]] }
  0xa1   : > { %s3332_s2 = sld [smem:[#allocation4 + $0x3]] }
  0xa2   : > { %678 = vrot.lane.b32.xlu1 %v676_v20, %s4799_s30  ;;  %670 = vrot.lane.b32.xlu0 %v668_v21, %s4799_s30  ;;  %v1039_v20 = vstv %s2550_s4  ;;  %s3243_s4 = sld [smem:[#allocation2 + $0x2]] }
  0xa3   : > { %s3336_s21 = sld [smem:[#allocation2 + $0x3]]  ;;  %v1175_v26 = vstv %s3312_s7 }
  0xa4   : > { %s3343_s26 = sld [smem:[#allocation2 + $0x99]] }
  0xa5   : > { %s3350_s20 = sld [smem:[#allocation2 + $0xb]] }
  0xa6   : > { %694 = vrot.lane.b32.xlu1 %v692_v24, %s4799_s30  ;;  %686 = vrot.lane.b32.xlu0 %v684_v25, %s4799_s30  ;;  %v1040_v24 = vmul.f32 %v3192_v12, %v1039_v20  ;;  %v1032_v25 = vmul.f32 %v3192_v12, %v1031_v22  ;;  %v1168_v20 = vmul.f32 %v3304_v2, %v1167_v13  ;;  %s3354_s17 = sld [smem:[#allocation2 + $0x13]] }
  0xa7   : > { %s3366_s7 = sld [smem:[#allocation2 + $0x9a]] }
  0xa8   : > { %s3368_s16 = sld [smem:[#allocation2 + $0x1b]] }
  0xa9   : > { %s3372_s6 = sld [smem:[#allocation4 + $0x1]] }
  0xaa   : > { %710 = vrot.lane.b32.xlu1 %v708_v1, %s4799_s30  ;;  %702 = vrot.lane.b32.xlu0 %v700_v28, %s4799_s30  ;;  %v1047_v1 = vstv %s2551_s8  ;;  %s3257_s8 = sld [smem:[#allocation2 + $0xa]] }
  0xab   : > { %v1048_v30 = vmul.f32 %v3192_v12, %v1047_v1  ;;  %s3389_s13 = sld [smem:[#allocation2 + $0x1]] }
  0xac   : > { %s3393_s18 = sld [smem:[#allocation2 + $0x9]] }
  0xad   : > { %s3407_s3 = sld [smem:[#allocation2 + $0x11]] }
  0xae   : > { %726 = vrot.lane.b32.xlu1 %v724_v31, %s4799_s30  ;;  %718 = vrot.lane.b32.xlu0 %v716_v32, %s4799_s30  ;;  %v1071_v31 = vstv %s2554_s9  ;;  %s3261_s9 = sld [smem:[#allocation2 + $0x12]] }
  0xaf   : > { %s3411_s14 = sld [smem:[#allocation2 + $0x19]] }
  0xb0   : > { %s3425_s15 = sld [smem:[#allocation4 + $0x5]] }
  0xb1   : > { %s3429_s24 = sld [smem:[#allocation2 + $0x5]] }
  0xb2   : > { %742 = vrot.lane.b32.xlu1 %v740_v36, %s4799_s30  ;;  %734 = vrot.lane.b32.xlu0 %v732_v37, %s4799_s30  ;;  %v1072_v36 = vmul.f32 %v3192_v12, %v1071_v31  ;;  %v1064_v37 = vmul.f32 %v3192_v12, %v1063_v33  ;;  %s3443_s12 = sld [smem:[#allocation2 + $0xd]] }
  0xb5   : > { %4847 = sst [smem:[#allocation27_spill]] %s3411_s14 }
  0xb6   : > { %758 = vrot.lane.b32.xlu1 %v756_v40, %s4799_s30  ;;  %750 = vrot.lane.b32.xlu0 %v748_v41, %s4799_s30  ;;  %v1079_v41 = vstv %s2555_s19  ;;  %s3275_s19 = sld [smem:[#allocation2 + $0x1a]] }
  0xb7   : > { %4849 = sst [smem:[#allocation29_spill]] %s3425_s15 }
  0xb8   : > { %4852 = sst [smem:[#allocation32_spill]] %s3443_s12  ;;  %s4862_s12 = smov 126  }
  0xb9   : > { %s3447_s15 = sld [smem:[#allocation2 + $0x15]] }
  0xba   : > { %774 = vrot.lane.b32.xlu1 %v772_v44, %s4799_s30  ;;  %766 = vrot.lane.b32.xlu0 %v764_v45, %s4799_s30  ;;  %v1080_v44 = vmul.f32 %v3231_v38, %v1079_v41  ;;  %v1103_v45 = vstv %s3218_s22  ;;  %s3279_s22 = sld [smem:[#allocation4]] }
  0xbb   : > { %s3461_s14 = sld [smem:[#allocation2 + $0x1d]] }
  0xbe   : > { %790 = vrot.lane.b32.xlu1 %v788_v48, %s4799_s30  ;;  %782 = vrot.lane.b32.xlu0 %v780_v49, %s4799_s30  ;;  %v1104_v49 = vmul.f32 %v3231_v38, %v1103_v45 }
  0xbf   : > { %4854 = sst [smem:[#allocation34_spill]] %s3447_s15 }
  0xc0   : > { %s3465_s15 = sld [smem:[#allocation4 + $0x4]] }
  0xc1   : > { %4856 = sst [smem:[#allocation36_spill]] %s3461_s14 }
  0xc2   : > { %806 = vrot.lane.b32.xlu1 %v804_v53, %s4799_s30  ;;  %798 = vrot.lane.b32.xlu0 %v796_v54, %s4799_s30  ;;  %v1111_v54 = vstv %s3237_s28  ;;  %s3293_s28 = sld [smem:[#allocation2]] }
  0xc3   : > { %s3479_s14 = sld [smem:[#allocation2 + $0x4]] }
  0xc6   : > { %822 = vrot.lane.b32.xlu1 %v820_v57, %s4799_s30  ;;  %814 = vrot.lane.b32.xlu0 %v812_v58, %s4799_s30  ;;  %v1112_v57 = vmul.f32 %v3231_v38, %v1111_v54  ;;  %v1135_v58 = vstv %s3250_s5  ;;  %s3307_s5 = sld [smem:[#allocation2 + $0x95]] }
  0xc7   : > { %4858 = sst [smem:[#allocation38_spill]] %s3465_s15 }
  0xc8   : > { %v3175_v0 = vpop.permute.xlu1 %382  ;;  %v3177_v3 = vpop.permute.xlu0 %366  ;;  %s3483_s15 = sld [smem:[#allocation2 + $0xc]] }
  0xca   : > { %838 = vrot.lane.b32.xlu1 %v836_v61, %s4799_s30  ;;  %830 = vrot.lane.b32.xlu0 %v828_v62, %s4799_s30  ;;  %v1136_v62 = vmul.f32 %v3231_v38, %v1135_v58 }
  0xcc   : > { %v3183_v7 = vpop.permute.xlu1 %390  ;;  %v3185_v9 = vpop.permute.xlu0 %374 }
  0xce   : > { %854 = vrot.lane.b32.xlu1 %v852_v4, %s4799_s30  ;;  %846 = vrot.lane.b32.xlu0 %v844_v5, %s4799_s30  ;;  %v1151_v4 = vstv %s3268_s10  ;;  %s3325_s10 = sld [smem:[#allocation2 + $0x97]] }
  0xcf   : > { %4861 = sst [smem:[#allocation41_spill]] %s3483_s15 }
  0xd0   : > { %v3194_v14 = vpop.permute.xlu1 %406  ;;  %v3196_v16 = vpop.permute.xlu0 %398  ;;  %s3501_s15 = sld [smem:[#allocation2 + $0x1c]] }
  0xd2   : > { %870 = vrot.lane.b32.xlu1 %v868_v10, %s4799_s30  ;;  %862 = vrot.lane.b32.xlu0 %v860_v11, %s4799_s30  ;;  %s3297_s30 = sld [smem:[#allocation2 + $0x8]]  ;;  %v1152_v10 = vmul.f32 %v3304_v2, %v1151_v4  ;;  %v1144_v11 = vmul.f32 %v3304_v2, %v1143_v6 }
  0xd4   : > { %v3202_v21 = vpop.permute.xlu1 %422  ;;  %v3204_v23 = vpop.permute.xlu0 %414  ;;  %v1199_v31 = vstv %s3325_s10  ;;  %s3382_s10 = sld [smem:[#allocation2 + $0x9d]] }
  0xd5   : > { %v1200_v39 = vmul.f32 %v3304_v2, %v1199_v31 }
  0xd6   : > { %1026 = vrot.lane.b32.xlu1 %v1024_v18, %s4812_s23  ;;  %1018 = vrot.lane.b32.xlu0 %v1016_v19, %s4812_s23  ;;  %v1159_v18 = vstv %s3291_s25  ;;  %s3348_s25 = sld [smem:[#allocation2 + $0x98]] }
  0xd7   : > { %v1160_v22 = vmul.f32 %v3304_v2, %v1159_v18  ;;  %4866 = sst [smem:[#allocation45_spill]] %s3501_s15 }
  0xd8   : > { %v3210_v27 = vpop.permute.xlu1 %438  ;;  %v3212_v28 = vpop.permute.xlu0 %430  ;;  %s3519_s15 = sld [smem:[#allocation2 + $0x7]] }
  0xda   : > { %1042 = vrot.lane.b32.xlu1 %v1040_v24, %s4812_s23  ;;  %1034 = vrot.lane.b32.xlu0 %v1032_v25, %s4812_s23  ;;  %v1183_v24 = vstv %s3307_s5  ;;  %s3361_s5 = sld [smem:[#allocation2 + $0x9b]] }
  0xdc   : > { %v3220_v32 = vpop.permute.xlu1 %454  ;;  %v3224_v35 = vpop.permute.xlu0 %446  ;;  %v1207_v47 = vstv %s3348_s25  ;;  %s3405_s25 = sld [smem:[#allocation2 + $0x9e]] }
  0xde   : > { %1058 = vrot.lane.b32.xlu1 %v1056_v29, %s4812_s23  ;;  %1050 = vrot.lane.b32.xlu0 %v1048_v30, %s4812_s23  ;;  %v1184_v29 = vmul.f32 %v3304_v2, %v1183_v24  ;;  %v1176_v30 = vmul.f32 %v3304_v2, %v1175_v26  ;;  %4870 = sst [smem:[#allocation49_spill]] %s3519_s15 }
  0xdf   : > { %s3537_s15 = sld [smem:[#allocation2 + $0x17]] }
  0xe0   : > { %v3235_v40 = vpop.permute.xlu1 %470  ;;  %v3241_v42 = vpop.permute.xlu0 %462  ;;  %v1231_v54 = vstv %s3361_s5  ;;  %s3418_s5 = sld [smem:[#allocation2 + $0xa1]] }
  0xe2   : > { %1074 = vrot.lane.b32.xlu1 %v1072_v36, %s4812_s23  ;;  %1066 = vrot.lane.b32.xlu0 %v1064_v37, %s4812_s23  ;;  %v1191_v36 = vstv %s3330_s27  ;;  %s3387_s27 = sld [smem:[#allocation2 + $0x9c]] }
  0xe3   : > { %v1192_v41 = vmul.f32 %v3304_v2, %v1191_v36 }
  0xe4   : > { %v3252_v46 = vpop.permute.xlu1 %486  ;;  %v3259_v48 = vpop.permute.xlu0 %478 }
  0xe5   : > { %4874 = sst [smem:[#allocation53_spill]] %s3537_s15 }
  0xe6   : > { %1090 = vrot.lane.b32.xlu1 %v1088_v43, %s4812_s23  ;;  %1082 = vrot.lane.b32.xlu0 %v1080_v44, %s4812_s23  ;;  %v3379_v43 = vld [vmem:[%s3043_s11 + $0x49] sm:$0xff]  ;;  %v1215_v44 = vstv %s3343_s26  ;;  %s3400_s26 = sld [smem:[#allocation2 + $0x9f]] }
  0xe7   : > { %v1208_v52 = vmul.f32 %v3379_v43, %v1207_v47  ;;  %v1232_v60 = vmul.f32 %v3379_v43, %v1231_v54  ;;  %s3553_s15 = sld [smem:[#allocation2 + $0x1f]] }
  0xe8   : > { %v3270_v53 = vpop.permute.xlu1 %502  ;;  %v3277_v55 = vpop.permute.xlu0 %494  ;;  %v1239_v6 = vstv %s3387_s27  ;;  %s3441_s27 = sld [smem:[#allocation2 + $0xa2]] }
  0xe9   : > { %v1240_v13 = vmul.f32 %v3379_v43, %v1239_v6 }
  0xea   : > { %1106 = vrot.lane.b32.xlu1 %v1104_v49, %s4812_s23  ;;  %1098 = vrot.lane.b32.xlu0 %v1096_v50, %s4812_s23  ;;  %v1216_v50 = vmul.f32 %v3379_v43, %v1215_v44 }
  0xec   : > { %v3288_v59 = vpop.permute.xlu1 %518  ;;  %v3295_v61 = vpop.permute.xlu0 %510  ;;  %v1263_v18 = vstv %s3400_s26  ;;  %s3454_s26 = sld [smem:[#allocation2 + $0xa5]] }
  0xed   : > { %v1264_v26 = vmul.f32 %v3379_v43, %v1263_v18 }
  0xee   : > { %1122 = vrot.lane.b32.xlu1 %v1120_v56, %s4812_s23  ;;  %1114 = vrot.lane.b32.xlu0 %v1112_v57, %s4812_s23  ;;  %v1223_v57 = vstv %s3366_s7  ;;  %s3423_s7 = sld [smem:[#allocation2 + $0xa0]] }
  0xf0   : > { %v3309_v5 = vpop.permute.xlu1 %534  ;;  %v3316_v8 = vpop.permute.xlu0 %526 }
  0xf2   : > { %1138 = vrot.lane.b32.xlu1 %v1136_v62, %s4812_s23  ;;  %1130 = vrot.lane.b32.xlu0 %v1128_v63, %s4812_s23  ;;  %v1224_v62 = vmul.f32 %v3379_v43, %v1223_v57  ;;  %v1247_v63 = vstv %s3382_s10  ;;  %s3436_s10 = sld [smem:[#allocation2 + $0xa3]] }
  0xf4   : > { %v3327_v15 = vpop.permute.xlu1 %550  ;;  %v3334_v19 = vpop.permute.xlu0 %542  ;;  %v1271_v36 = vstv %s3423_s7  ;;  %s3477_s7 = sld [smem:[#allocation2 + $0xa6]] }
  0xf5   : > { %v1272_v44 = vmul.f32 %v3192_v12, %v1271_v36 }
  0xf6   : > { %1154 = vrot.lane.b32.xlu1 %v1152_v10, %s4812_s23  ;;  %1146 = vrot.lane.b32.xlu0 %v1144_v11, %s4812_s23  ;;  %v1248_v11 = vmul.f32 %v3379_v43, %v1247_v63 }
  0xf8   : > { %v3345_v25 = vpop.permute.xlu1 %566  ;;  %v3352_v1 = vpop.permute.xlu0 %558  ;;  %v1295_v47 = vstv %s3436_s10  ;;  %s3490_s10 = sld [smem:[#allocation2 + $0xa9]] }
  0xf9   : > { %4840 = vst [vmem:[#allocation20_spill] sm:$0xff] %v3352_v1  ;;  %v1296_v57 = vmul.f32 %v3192_v12, %v1295_v47 }
  0xfa   : > { %1170 = vrot.lane.b32.xlu1 %v1168_v20, %s4812_s23  ;;  %1162 = vrot.lane.b32.xlu0 %v1160_v22, %s4812_s23  ;;  %v1255_v22 = vstv %s3405_s25  ;;  %s3459_s25 = sld [smem:[#allocation2 + $0xa4]] }
  0xfc   : > { %v3363_v33 = vpop.permute.xlu1 %582  ;;  %v3370_v37 = vpop.permute.xlu0 %574 }
  0xfd   : > { %4841 = vst [vmem:[#allocation21_spill] sm:$0xff] %v3363_v33  ;;  %4842 = vst [vmem:[#allocation22_spill] sm:$0xff] %v3370_v37 }
  0xfe   : > { %1186 = vrot.lane.b32.xlu1 %v1184_v29, %s4812_s23  ;;  %1178 = vrot.lane.b32.xlu0 %v1176_v30, %s4812_s23  ;;  %v1256_v29 = vmul.f32 %v3379_v43, %v1255_v22  ;;  %v1279_v30 = vstv %s3418_s5  ;;  %s3472_s5 = sld [smem:[#allocation2 + $0xa7]] }
 0x100   : > { %v3384_v45 = vpop.permute.xlu1 %598  ;;  %v3391_v49 = vpop.permute.xlu0 %590  ;;  %v1303_v6 = vstv %s3459_s25  ;;  %s3513_s25 = sld [smem:[#allocation2 + $0xaa]] }
 0x101   : > { %4843 = vst [vmem:[#allocation23_spill] sm:$0xff] %v3384_v45  ;;  %4844 = vst [vmem:[#allocation24_spill] sm:$0xff] %v3391_v49  ;;  %v1304_v18 = vmul.f32 %v3192_v12, %v1303_v6  ;;  %v234_v6 = vstv %s3243_s4  ;;  %s3569_s4 = sld [smem:[#allocation2 + $0xb1]] }
 0x102   : > { %1202 = vrot.lane.b32.xlu1 %v1200_v39, %s4812_s23  ;;  %1194 = vrot.lane.b32.xlu0 %v1192_v41, %s4812_s23  ;;  %v1280_v41 = vmul.f32 %v3192_v12, %v1279_v30 }
 0x104   : > { %v3402_v56 = vpop.permute.xlu1 %614  ;;  %v3409_v58 = vpop.permute.xlu0 %606  ;;  %v1327_v22 = vstv %s3472_s5  ;;  %s3526_s5 = sld [smem:[#allocation2 + $0xad]] }
 0x105   : > { %4845 = vst [vmem:[#allocation25_spill] sm:$0xff] %v3402_v56  ;;  %4846 = vst [vmem:[#allocation26_spill] sm:$0xff] %v3409_v58  ;;  %v1328_v36 = vmul.f32 %v3192_v12, %v1327_v22  ;;  %v226_v22 = vstv %s3293_s28  ;;  %s3580_s28 = sld [smem:[#allocation2 + $0x6]] }
 0x106   : > { %1218 = vrot.lane.b32.xlu1 %v1216_v50, %s4812_s23  ;;  %1210 = vrot.lane.b32.xlu0 %v1208_v52, %s4812_s23  ;;  %v1287_v52 = vstv %s3441_s27  ;;  %s3495_s27 = sld [smem:[#allocation2 + $0xa8]] }
 0x108   : > { %v3420_v4 = vpop.permute.xlu1 %630  ;;  %v3427_v10 = vpop.permute.xlu0 %622 }
 0x109   : > { %4848 = vst [vmem:[#allocation28_spill] sm:$0xff] %v3420_v4  ;;  %4850 = vst [vmem:[#allocation30_spill] sm:$0xff] %v3427_v10 }
 0x10a   : > { %1234 = vrot.lane.b32.xlu1 %v1232_v60, %s4812_s23  ;;  %1226 = vrot.lane.b32.xlu0 %v1224_v62, %s4812_s23  ;;  %v1288_v60 = vmul.f32 %v3192_v12, %v1287_v52  ;;  %v1311_v62 = vstv %s3454_s26  ;;  %s3508_s26 = sld [smem:[#allocation2 + $0xab]] }
 0x10c   : > { %v3438_v20 = vpop.permute.xlu1 %646  ;;  %v3445_v24 = vpop.permute.xlu0 %638  ;;  %v1335_v52 = vstv %s3495_s27  ;;  %s3550_s27 = sld [smem:[#allocation2 + $0xae]] }
 0x10d   : > { %4851 = vst [vmem:[#allocation31_spill] sm:$0xff] %v3438_v20  ;;  %4853 = vst [vmem:[#allocation33_spill] sm:$0xff] %v3445_v24  ;;  %v331_v24 = vstv %s3318_s1  ;;  %s3648_s1 = sld [smem:[#allocation2 + $0x69]] }
 0x10e   : > { %1250 = vrot.lane.b32.xlu1 %v1248_v11, %s4812_s23  ;;  %1242 = vrot.lane.b32.xlu0 %v1240_v13, %s4812_s23  ;;  %v1312_v13 = vmul.f32 %v3192_v12, %v1311_v62 }
 0x110   : > { %v3456_v31 = vpop.permute.xlu1 %662  ;;  %v3463_v39 = vpop.permute.xlu0 %654  ;;  %v1359_v62 = vstv %s3508_s26  ;;  %s3690_s26 = sld [smem:[#allocation2 + $0x68]] }
 0x111   : > { %4855 = vst [vmem:[#allocation35_spill] sm:$0xff] %v3456_v31  ;;  %4857 = vst [vmem:[#allocation37_spill] sm:$0xff] %v3463_v39  ;;  %v304_v39 = vstv %s3261_s9  ;;  %v296_v31 = vstv %s3314_s0  ;;  %s3610_s9 = sld [smem:[#allocation2 + $0x16]] }
 0x112   : > { %1266 = vrot.lane.b32.xlu1 %v1264_v26, %s4812_s23  ;;  %1258 = vrot.lane.b32.xlu0 %v1256_v29, %s4812_s23  ;;  %s3497_s23 = sld [smem:[#allocation2 + $0x14]]  ;;  %v1319_v29 = vstv %s3477_s7 }
 0x113   : > { %s3531_s7 = sld [smem:[#allocation2 + $0xac]] }
 0x114   : > { %v3474_v50 = vpop.permute.xlu1 %678  ;;  %v3481_v54 = vpop.permute.xlu0 %670  ;;  %s3619_s0 = sld [smem:[#allocation2 + $0x1e]] }
 0x115   : > { %4859 = vst [vmem:[#allocation39_spill] sm:$0xff] %v3474_v50  ;;  %4860 = vst [vmem:[#allocation40_spill] sm:$0xff] %v3481_v54 }
 0x116   : > { %1282 = vrot.lane.b32.xlu1 %v1280_v41, %s4862_s12  ;;  %1274 = vrot.lane.b32.xlu0 %v1272_v44, %s4862_s12  ;;  %v1320_v41 = vmul.f32 %v3192_v12, %v1319_v29  ;;  %v1343_v44 = vstv %s3490_s10  ;;  %s3544_s10 = sld [smem:[#allocation2 + $0xaf]] }
 0x117   : > { %v1344_v12 = vmul.f32 %v3231_v38, %v1343_v44  ;;  %v3563_v44 = vld [vmem:[%s3043_s11] sm:$0xff] }
 0x118   : > { %v3492_v63 = vpop.permute.xlu1 %694  ;;  %4864 = sst [smem:[#allocation43_spill]] %s3497_s23  ;;  %v3499_v11 = vpop.permute.xlu0 %686 }
 0x119   : > { %4863 = vst [vmem:[#allocation42_spill] sm:$0xff] %v3492_v63  ;;  %4865 = vst [vmem:[#allocation44_spill] sm:$0xff] %v3499_v11  ;;  %s3515_s23 = sld [smem:[#allocation4 + $0x7]]  ;;  %v208_v11 = vstv %s3279_s22  ;;  %v238_v63 = vstv %s3336_s21 }
 0x11a   : > { %1298 = vrot.lane.b32.xlu1 %v1296_v57, %s4862_s12  ;;  %1290 = vrot.lane.b32.xlu0 %v1288_v60, %s4862_s12  ;;  %v1336_v60 = vmul.f32 %v3231_v38, %v1335_v52  ;;  %v235_v52 = vmul.f32 %v3563_v44, %v234_v6  ;;  %v261_v6 = vstv %s3297_s30  ;;  %s3595_s30 = sld [smem:[#allocation2 + $0xb3]] }
 0x11b   : > { %s3605_s21 = sld [smem:[#allocation2 + $0xb2]] }
 0x11c   : > { %v3510_v26 = vpop.permute.xlu1 %710  ;;  %v3517_v30 = vpop.permute.xlu0 %702  ;;  %s3684_s22 = sld [smem:[#allocation2 + $0x60]] }
 0x11d   : > { %4867 = vst [vmem:[#allocation46_spill] sm:$0xff] %v3510_v26  ;;  %4869 = vst [vmem:[#allocation48_spill] sm:$0xff] %v3517_v30  ;;  %v212_v30 = vstv %s3239_s29  ;;  %s3587_s29 = sld [smem:[#allocation2 + $0xe]] }
 0x11e   : > { %1314 = vrot.lane.b32.xlu1 %v1312_v13, %s4862_s12  ;;  %1306 = vrot.lane.b32.xlu0 %v1304_v18, %s4862_s12  ;;  %v1351_v18 = vstv %s3513_s25  ;;  %s4889_s25 = sld [smem:[#allocation38_spill]] }
 0x11f   : > { %4868 = sst [smem:[#allocation47_spill]] %s3515_s23 }
 0x120   : > { %v3528_v47 = vpop.permute.xlu1 %726  ;;  %s3533_s23 = sld [smem:[#allocation2 + $0xf]]  ;;  %v3535_v57 = vpop.permute.xlu0 %718 }
 0x121   : > { %4871 = vst [vmem:[#allocation50_spill] sm:$0xff] %v3528_v47  ;;  %4873 = vst [vmem:[#allocation52_spill] sm:$0xff] %v3535_v57  ;;  %v1352_v57 = vmul.f32 %v3231_v38, %v1351_v18  ;;  %v1375_v47 = vstv %s3526_s5  ;;  %s4890_s5 = sld [smem:[#allocation41_spill]] }
 0x122   : > { %1330 = vrot.lane.b32.xlu1 %v1328_v36, %s4862_s12  ;;  %1322 = vrot.lane.b32.xlu0 %v1320_v41, %s4862_s12  ;;  %v1360_v36 = vmul.f32 %v3231_v38, %v1359_v62  ;;  %v269_v41 = vstv %s3257_s8  ;;  %v1367_v62 = vstv %s3531_s7  ;;  %s3576_s8 = sld [smem:[#allocation2 + $0xb0]] }
 0x123   : > { %v270_v18 = vmul.f32 %v3063_v17, %v269_v41  ;;  %v3598_v17 = vld [vmem:[%s3043_s11 + $0x18] sm:$0xff]  ;;  %s4891_s7 = sld [smem:[#allocation47_spill]]  ;;  %v285_v45 = vstv %s3587_s29 }
 0x124   : > { %v3547_v13 = vpop.permute.xlu1 %742  ;;  %v3555_v29 = vpop.permute.xlu0 %734  ;;  %v262_v41 = vmul.f32 %v3598_v17, %v261_v6  ;;  %s4901_s29 = sld [smem:[#allocation45_spill]] }
 0x125   : > { %4875 = vst [vmem:[#allocation54_spill] sm:$0xff] %v3547_v13  ;;  %4876 = vst [vmem:[#allocation55_spill] sm:$0xff] %v3555_v29  ;;  %v236_v29 = vadd.f32 %v235_v52, %v212_v30  ;;  %v1368_v13 = vmul.f32 %v3231_v38, %v1367_v62  ;;  %v305_v30 = vmul.f32 %v3082_v34, %v304_v39  ;;  %v230_v52 = vstv %s3389_s13  ;;  %s3634_s13 = sld [smem:[#allocation2 + $0xb4]] }
 0x126   : > { %4872 = sst [smem:[#allocation51_spill]] %s3533_s23  ;;  %1346 = vrot.lane.b32.xlu1 %v1344_v12, %s4862_s12  ;;  %1338 = vrot.lane.b32.xlu0 %v1336_v60, %s4862_s12  ;;  %v227_v12 = vmul.f32 %v3563_v44, %v226_v22  ;;  %v1376_v22 = vmul.f32 %v3231_v38, %v1375_v47  ;;  %v1383_v47 = vstv %s3550_s27 }
 0x127   : > { %s3557_s23 = sld [smem:[#allocation4 + $0x6]] }
 0x128   : > { %v3573_v26 = vpop.permute.xlu1 %758  ;;  %v3582_v60 = vpop.permute.xlu0 %750  ;;  %s4894_s27 = sld [smem:[#allocation34_spill]] }
 0x129   : > { %4877 = vst [vmem:[#allocation56_spill] sm:$0xff] %v3573_v26  ;;  %4878 = vst [vmem:[#allocation57_spill] sm:$0xff] %v3582_v60  ;;  %v339_v26 = vstv %s3275_s19  ;;  %v1391_v60 = vstv %s3544_s10  ;;  %s4887_s19 = sld [smem:[#allocation29_spill]] }
 0x12a   : > { %1362 = vrot.lane.b32.xlu1 %v1360_v36, %s4862_s12  ;;  %1354 = vrot.lane.b32.xlu0 %v1352_v57, %s4862_s12  ;;  %v228_v36 = vadd.f32 %v227_v12, %v208_v11  ;;  %v239_v57 = vmul.f32 %v3563_v44, %v238_v63  ;;  %v3615_v6 = vmul.f32 %v3101_v51, %v339_v26  ;;  %v214_v11 = vstv %s3332_s2  ;;  %s3627_s2 = sld [smem:[#allocation2 + $0xb5]] }
 0x12b   : > { %v273_v12 = vstv %s3350_s20  ;;  %v1392_v39 = vmul.f32 %v3231_v38, %v1391_v60  ;;  %v271_v63 = vadd.f32 %v270_v18, %v236_v29  ;;  %v1384_v26 = vmul.f32 %v3231_v38, %v1383_v47  ;;  %s3641_s20 = sld [smem:[#allocation2 + $0x61]] }
 0x12c   : > { %v3602_v54 = vpop.permute.xlu1 %774  ;;  %v3612_v62 = vpop.permute.xlu0 %766  ;;  %v263_v50 = vadd.f32 %v262_v41, %v228_v36  ;;  %v1399_v60 = vstv %s3576_s8  ;;  %v265_v29 = vstv %s3393_s18  ;;  %v308_v47 = vstv %s3354_s17  ;;  %s4885_s17 = sld [smem:[#allocation27_spill]] }
 0x12d   : > { %4879 = vst [vmem:[#allocation58_spill] sm:$0xff] %v3602_v54  ;;  %4880 = vst [vmem:[#allocation59_spill] sm:$0xff] %v3612_v62  ;;  %v297_v54 = vmul.f32 %v3082_v34, %v296_v31  ;;  %v1407_v62 = vstv %s3569_s4  ;;  %v274_v34 = vmul.f32 %v3598_v17, %v273_v12  ;;  %v240_v31 = vadd.f32 %v239_v57, %v214_v11  ;;  %s4886_s18 = sld [smem:[#allocation49_spill]] }
 0x12e   : > { %1378 = vrot.lane.b32.xlu1 %v1376_v22, %s4862_s12  ;;  %1370 = vrot.lane.b32.xlu0 %v1368_v13, %s4862_s12  ;;  %v231_v22 = vmul.f32 %v3563_v44, %v230_v52  ;;  %v210_v13 = vstv %s3372_s6  ;;  %v343_v41 = vstv %s3368_s16  ;;  %v1408_v52 = vmul.f32 %v3304_v2, %v1407_v62  ;;  %s4883_s16 = sld [smem:[#allocation32_spill]] }
 0x12f   : > { %v300_v36 = vstv %s3407_s3  ;;  %v3650_v12 = vadd.f32 %v305_v30, %v271_v63  ;;  %v3653_v57 = vmul.f32 %v3101_v51, %v331_v24  ;;  %v1400_v11 = vmul.f32 %v3304_v2, %v1399_v60  ;;  %s3658_s3 = sld [smem:[#allocation2 + $0xb7]]  ;;  %v3669_v63 = vld [vmem:[%s3043_s11 + $0x30] sm:$0xff] }
 0x130   : > { %v3631_v20 = vpop.permute.xlu1 %790  ;;  %v3639_v18 = vpop.permute.xlu0 %782  ;;  %v266_v62 = vmul.f32 %v3598_v17, %v265_v29  ;;  %v1415_v24 = vstv %s3605_s21  ;;  %s3666_s6 = sld [smem:[#allocation2 + $0xb6]]  ;;  %v3675_v60 = vmul.f32 %v3101_v51, %v343_v41  ;;  %v1431_v4 = vstv %s3634_s13 }
 0x131   : > { %4881 = vst [vmem:[#allocation60_spill] sm:$0xff] %v3631_v20  ;;  %4882 = vst [vmem:[#allocation61_spill] sm:$0xff] %v3639_v18  ;;  %v1423_v18 = vstv %s3595_s30  ;;  %v232_v20 = vadd.f32 %v231_v22, %v210_v13  ;;  %v246_v13 = vstv %s3429_s24  ;;  %v1416_v41 = vmul.f32 %v3304_v2, %v1415_v24  ;;  %s3698_s24 = sld [smem:[#allocation2 + $0xb9]] }
 0x132   : > { %1394 = vrot.lane.b32.xlu1 %v1392_v39, %s4862_s12  ;;  %1386 = vrot.lane.b32.xlu0 %v1384_v26, %s4862_s12  ;;  %v3660_v39 = vadd.f32 %v297_v54, %v263_v50  ;;  %v3672_v26 = vmul.f32 %v3669_v63, %v308_v47  ;;  %v3677_v50 = vadd.f32 %v274_v34, %v240_v31  ;;  %v242_v47 = vstv %s3479_s14  ;;  %s4892_s14 = sld [smem:[#allocation51_spill]] }
 0x133   : > { %v3680_v54 = vmul.f32 %v3669_v63, %v300_v36  ;;  %v1424_v51 = vmul.f32 %v3304_v2, %v1423_v18  ;;  %v254_v31 = vstv %s4886_s18  ;;  %v1439_v36 = vstv %s3627_s2  ;;  %s3707_s10 = sld [smem:[#allocation2 + $0xb8]] }
 0x134   : > { %v3663_v30 = vpop.permute.xlu1 %806  ;;  %v3682_v22 = vpop.permute.xlu0 %798  ;;  %v281_v29 = vstv %s4883_s16  ;;  %v216_v24 = vstv %s4889_s25  ;;  %v243_v34 = vmul.f32 %v3563_v44, %v242_v47  ;;  %s3715_s4 = sld [smem:[#allocation2 + $0x63]]  ;;  %v255_v58 = vmul.f32 %v3563_v44, %v254_v31 }
 0x135   : > { %4884 = vst [vmem:[#allocation62_spill] sm:$0xff] %v3663_v30  ;;  %4888 = vst [vmem:[#allocation63_spill] sm:$0xff] %v3682_v22  ;;  %v3700_v22 = vadd.f32 %v266_v62, %v232_v20  ;;  %v218_v30 = vstv %s4887_s19  ;;  %v282_v18 = vmul.f32 %v3598_v17, %v281_v29  ;;  %v277_v62 = vstv %s4890_s5  ;;  %s3721_s8 = sld [smem:[#allocation2 + $0x6b]] }
 0x136   : > { %1410 = vrot.lane.b32.xlu1 %v1408_v52, %s4862_s12  ;;  %1402 = vrot.lane.b32.xlu0 %v1400_v11, %s4862_s12  ;;  %v250_v52 = vstv %s3580_s28  ;;  %v247_v11 = vmul.f32 %v3563_v44, %v246_v13  ;;  %s4896_s28 = sld [smem:[#allocation43_spill]]  ;;  %v1440_v13 = vmul.f32 %v3304_v2, %v1439_v36  ;;  %v1455_v56 = vstv %s3658_s3 }
 0x137   : > { %v251_v47 = vmul.f32 %v3563_v44, %v250_v52  ;;  %s4897_s30 = sld [smem:[#allocation53_spill]]  ;;  %v316_v49 = vstv %s4894_s27  ;;  %v220_v31 = vstv %s3557_s23  ;;  %v1447_v37 = vstv %s3666_s6 }
 0x138   : > { %v3704_v10 = vpop.permute.xlu1 %822  ;;  %v3713_v20 = vpop.permute.xlu0 %814  ;;  %v289_v29 = vstv %s4892_s14  ;;  %s3729_s21 = sld [smem:[#allocation2 + $0xbb]]  ;;  %v248_v36 = vadd.f32 %v247_v11, %v218_v30  ;;  %v278_v44 = vmul.f32 %v3598_v17, %v277_v62  ;;  %v1456_v30 = vmul.f32 %v3304_v2, %v1455_v56 }
 0x139   : > { %4893 = vst [vmem:[#allocation64_spill] sm:$0xff] %v3704_v10  ;;  %4895 = vst [vmem:[#allocation65_spill] sm:$0xff] %v3713_v20  ;;  %v222_v10 = vstv %s4891_s7  ;;  %v1432_v20 = vmul.f32 %v3304_v2, %v1431_v4  ;;  %s3737_s2 = sld [smem:[#allocation2 + $0xba]]  ;;  %v290_v33 = vmul.f32 %v3598_v17, %v289_v29  ;;  %v252_v11 = vadd.f32 %v251_v47, %v220_v31 }
 0x13a   : > { %1426 = vrot.lane.b32.xlu1 %v1424_v51, %s4862_s12  ;;  %1418 = vrot.lane.b32.xlu0 %v1416_v41, %s4862_s12  ;;  %v244_v41 = vadd.f32 %v243_v34, %v216_v24  ;;  %s4899_s13 = sld [smem:[#allocation36_spill]]  ;;  %v286_v34 = vmul.f32 %v3598_v17, %v285_v45  ;;  %v1448_v24 = vmul.f32 %v3304_v2, %v1447_v37  ;;  %v1471_v62 = vstv %s3698_s24 }
 0x13b   : > { %s3741_s16 = sld [smem:[#allocation2 + $0x62]]  ;;  %v320_v29 = vstv %s3610_s9  ;;  %v283_v56 = vadd.f32 %v282_v18, %v248_v36  ;;  %v347_v17 = vstv %s4901_s29  ;;  %v1472_v18 = vmul.f32 %v3379_v43, %v1471_v62  ;;  %s4909_s29 = smov 127  }
 0x13c   : > { %v3734_v51 = vpop.permute.xlu1 %838  ;;  %v312_v52 = vstv %s4896_s28  ;;  %v3743_v4 = vpop.permute.xlu0 %830  ;;  %s3747_s23 = sld [smem:[#allocation2 + $0x6a]]  ;;  %v321_v31 = vmul.f32 %v3669_v63, %v320_v29  ;;  %v287_v36 = vadd.f32 %v286_v34, %v252_v11 }
 0x13d   : > { %4898 = vst [vmem:[#allocation66_spill] sm:$0xff] %v3734_v51  ;;  %4900 = vst [vmem:[#allocation67_spill] sm:$0xff] %v3743_v4  ;;  %v324_v1 = vstv %s4897_s30  ;;  %v256_v51 = vadd.f32 %v255_v58, %v222_v10  ;;  %s3755_s3 = sld [smem:[#allocation2 + $0xbd]]  ;;  %v317_v58 = vmul.f32 %v3669_v63, %v316_v49  ;;  %v313_v45 = vmul.f32 %v3669_v63, %v312_v52 }
 0x13e   : > { %1442 = vrot.lane.b32.xlu1 %v1440_v13, %s4862_s12  ;;  %1434 = vrot.lane.b32.xlu0 %v1432_v20, %s4862_s12  ;;  %v1463_v13 = vstv %s3707_s10  ;;  %s3763_s18 = sld [smem:[#allocation2 + $0xbc]]  ;;  %v279_v20 = vadd.f32 %v278_v44, %v244_v41  ;;  %v325_v37 = vmul.f32 %v3669_v63, %v324_v1  ;;  %v359_v49 = vstv %s3553_s15 }
 0x13f   : > { %s3767_s6 = sld [smem:[#allocation2 + $0x65]]  ;;  %v291_v47 = vadd.f32 %v290_v33, %v256_v51  ;;  %v1464_v44 = vmul.f32 %v3379_v43, %v1463_v13  ;;  %v1487_v52 = vstv %s3729_s21  ;;  %v310_v1 = vadd.f32 %v3672_v26, %v3677_v50  ;;  %v2810_v33 = vld [vmem:[%s3043_s11 + $0x48] sm:$0xff] }
 0x140   : > { %v351_v10 = vstv %s4899_s13  ;;  %v3760_v4 = vpop.permute.xlu1 %854  ;;  %v3769_v2 = vpop.permute.xlu0 %846  ;;  %s3773_s9 = sld [smem:[#allocation2 + $0x6d]]  ;;  %v4904_v51 = vstv %s4885_s17  ;;  %v1479_v62 = vstv %s3737_s2  ;;  %v302_v63 = vadd.f32 %v3680_v54, %v3700_v22 }
 0x141   : > { %4902 = vst [vmem:[#allocation68_spill] sm:$0xff] %v3760_v4  ;;  %4903 = vst [vmem:[#allocation69_spill] sm:$0xff] %v3769_v2  ;;  %s3781_s19 = sld [smem:[#allocation2 + $0xbf]]  ;;  %v336_v41 = vmul.f32 %v2810_v33, %v4904_v51  ;;  %v355_v2 = vstv %s3619_s0  ;;  %v352_v34 = vmul.f32 %v2810_v33, %v351_v10  ;;  %v318_v11 = vadd.f32 %v317_v58, %v283_v56 }
 0x142   : > { %1458 = vrot.lane.b32.xlu1 %v1456_v30, %s4862_s12  ;;  %1450 = vrot.lane.b32.xlu0 %v1448_v24, %s4862_s12  ;;  %s3792_s15 = sld [smem:[#allocation2 + $0xbe]]  ;;  %v348_v24 = vmul.f32 %v2810_v33, %v347_v17  ;;  %v314_v50 = vadd.f32 %v313_v45, %v279_v20  ;;  %v360_v29 = vmul.f32 %v2810_v33, %v359_v49 }
 0x143   : > { %s3796_s25 = sld [smem:[#allocation2 + $0x64]]  ;;  %v326_v13 = vadd.f32 %v325_v37, %v291_v47  ;;  %v1488_v51 = vmul.f32 %v3379_v43, %v1487_v52  ;;  %v356_v4 = vmul.f32 %v2810_v33, %v355_v2  ;;  %v322_v54 = vadd.f32 %v321_v31, %v287_v36 }
 0x144   : > { %v3789_v30 = vpop.permute.xlu1 %870  ;;  %v3798_v26 = vpop.permute.xlu0 %862  ;;  %s3800_s0 = sld [smem:[#allocation2 + $0x6c]]  ;;  %v1480_v22 = vmul.f32 %v3379_v43, %v1479_v62  ;;  %v1503_v58 = vstv %s3755_s3  ;;  %v1495_v56 = vstv %s3763_s18  ;;  %v341_v45 = vadd.f32 %v3615_v6, %v3650_v12 }
 0x145   : > { %s3807_s17 = sld [smem:[#allocation2 + $0xe1]]  ;;  %v333_v17 = vadd.f32 %v3653_v57, %v3660_v39  ;;  %v345_v20 = vadd.f32 %v3675_v60, %v310_v1  ;;  %v337_v2 = vadd.f32 %v336_v41, %v302_v63  ;;  %v353_v49 = vadd.f32 %v352_v34, %v318_v11 }
 0x146   : > { %1474 = vrot.lane.b32.xlu1 %v1472_v18, %s4862_s12  ;;  %1466 = vrot.lane.b32.xlu0 %v1464_v44, %s4862_s12  ;;  %s3812_s5 = sld [smem:[#allocation2 + $0xe0]]  ;;  %v349_v47 = vadd.f32 %v348_v24, %v314_v50  ;;  %v361_v18 = vadd.f32 %v360_v29, %v326_v13  ;;  %v1504_v6 = vmul.f32 %v3379_v43, %v1503_v58  ;;  %v878_v13 = vstv %s3684_s22 }
 0x147   : > { %s3819_s7 = sld [smem:[#allocation2 + $0x67]]  ;;  %v357_v12 = vadd.f32 %v356_v4, %v322_v54  ;;  %v1496_v57 = vmul.f32 %v3379_v43, %v1495_v56  ;;  %v1519_v39 = vstv %s3781_s19  ;;  %v385_v36 = vadd.f32 %v3175_v0, %v341_v45 }
 0x148   : > { %v3809_v10 = vpop.permute.xlu1 %1026  ;;  %v3821_v37 = vpop.permute.xlu0 %1018  ;;  %s3823_s24 = sld [smem:[#allocation2 + $0x6f]]  ;;  %v1511_v31 = vstv %s3792_s15  ;;  %v369_v44 = vadd.f32 %v3177_v3, %v333_v17  ;;  %v393_v4 = vadd.f32 %v3183_v7, %v345_v20  ;;  %v377_v52 = vadd.f32 %v3185_v9, %v337_v2 }
 0x149   : > { %s3830_s14 = sld [smem:[#allocation2 + $0xe3]]  ;;  %v409_v33 = vadd.f32 %v3194_v14, %v353_v49  ;;  %v401_v41 = vadd.f32 %v3196_v16, %v349_v47  ;;  %v425_v62 = vadd.f32 %v3202_v21, %v361_v18  ;;  %v1520_v0 = vmul.f32 %v3379_v43, %v1519_v39  ;;  %v3857_v14 = vld [vmem:[%s3043_s11 + $0x2] sm:$0xff] }
 0x14a   : > { %1490 = vrot.lane.b32.xlu1 %v1488_v51, %s4862_s12  ;;  %1482 = vrot.lane.b32.xlu0 %v1480_v22, %s4862_s12  ;;  %s3835_s10 = sld [smem:[#allocation2 + $0xe2]]  ;;  %v417_v3 = vadd.f32 %v3204_v23, %v357_v12  ;;  %v441_v7 = vadd.f32 %v3210_v27, %v377_v52  ;;  %v1512_v9 = vmul.f32 %v3379_v43, %v1511_v31  ;;  %v913_v58 = vstv %s3690_s26 }
 0x14b   : > { %s3841_s27 = sld [smem:[#allocation2 + $0x66]]  ;;  %4906 = vst [vmem:[#allocation71_spill] sm:$0xff] %v3857_v14  ;;  %v1675_v16 = vstv %s3807_s17  ;;  %v433_v21 = vadd.f32 %v3212_v28, %v369_v44  ;;  %v457_v63 = vadd.f32 %v3220_v32, %v393_v4  ;;  %v449_v23 = vadd.f32 %v3224_v35, %v385_v36 }
 0x14c   : > { %v3832_v60 = vpop.permute.xlu1 %1042  ;;  %v3843_v1 = vpop.permute.xlu0 %1034  ;;  %s3848_s28 = sld [smem:[#allocation2 + $0x6e]]  ;;  %v1667_v27 = vstv %s3812_s5  ;;  %v473_v11 = vadd.f32 %v3235_v40, %v409_v33  ;;  %v465_v24 = vadd.f32 %v3241_v42, %v401_v41  ;;  %v489_v50 = vadd.f32 %v3252_v46, %v425_v62  ;;  %v2812_v62 = vld [vmem:[%s3043_s11 + $0x19] sm:$0xff] }
 0x14d   : > { %4905 = vst [vmem:[#allocation70_spill] sm:$0xff] %v3843_v1  ;;  %s3860_s30 = sld [smem:[#allocation2 + $0xe5]]  ;;  %v481_v29 = vadd.f32 %v3259_v48, %v417_v3  ;;  %v882_v32 = vstv %s3641_s20  ;;  %v917_v35 = vstv %s3648_s1  ;;  %v1676_v40 = vmul.f32 %v3857_v14, %v1675_v16 }
 0x14e   : > { %1506 = vrot.lane.b32.xlu1 %v1504_v6, %s4862_s12  ;;  %1498 = vrot.lane.b32.xlu0 %v1496_v57, %s4862_s12  ;;  %s3868_s21 = sld [smem:[#allocation2 + $0xe4]]  ;;  %v505_v42 = vadd.f32 %v3270_v53, %v441_v7  ;;  %v497_v46 = vadd.f32 %v3277_v55, %v433_v21  ;;  %v1668_v48 = vmul.f32 %v3857_v14, %v1667_v27  ;;  %v3901_v55 = vld [vmem:[%s3043_s11 + $0x1] sm:$0xff]  ;;  %v925_v49 = vstv %s3721_s8 }
 0x14f   : > { %s3874_s2 = sld [smem:[#allocation2 + $0x71]]  ;;  %v1691_v51 = vstv %s3830_s14  ;;  %v521_v54 = vadd.f32 %v3288_v59, %v457_v63  ;;  %v513_v22 = vadd.f32 %v3295_v61, %v449_v23  ;;  %v3904_v45 = vmul.f32 %v3901_v55, %v882_v32  ;;  %v4910_v63 = vld [vmem:[#allocation20_spill] sm:$0xff] }
 0x150   : > { %v3865_v34 = vpop.permute.xlu1 %1058  ;;  %v3876_v28 = vpop.permute.xlu0 %1050  ;;  %s3881_s13 = sld [smem:[#allocation2 + $0x79]]  ;;  %v1683_v53 = vstv %s3835_s10  ;;  %v3907_v17 = vmul.f32 %v3231_v38, %v917_v35  ;;  %v3910_v59 = vmul.f32 %v3901_v55, %v878_v13  ;;  %v890_v61 = vstv %s3715_s4 }
 0x151   : > { %4907 = vst [vmem:[#allocation72_spill] sm:$0xff] %v3865_v34  ;;  %4908 = vst [vmem:[#allocation73_spill] sm:$0xff] %v3876_v28  ;;  %s3890_s20 = sld [smem:[#allocation2 + $0xe7]]  ;;  %v537_v2 = vadd.f32 %v3309_v5, %v473_v11  ;;  %v886_v47 = vstv %s3741_s16  ;;  %v1692_v18 = vmul.f32 %v3857_v14, %v1691_v51  ;;  %v3925_v6 = vmul.f32 %v3231_v38, %v913_v58  ;;  %v4927_v28 = vld [vmem:[#allocation40_spill] sm:$0xff] }
 0x152   : > { %1522 = vrot.lane.b32.xlu1 %v1520_v0, %s4862_s12  ;;  %1514 = vrot.lane.b32.xlu0 %v1512_v9, %s4862_s12  ;;  %s3898_s1 = sld [smem:[#allocation2 + $0xe6]]  ;;  %v921_v12 = vstv %s3747_s23  ;;  %v1684_v57 = vmul.f32 %v3857_v14, %v1683_v53  ;;  %v529_v39 = vadd.f32 %v3316_v8, %v465_v24  ;;  %v553_v31 = vadd.f32 %v3327_v15, %v489_v50 }
 0x153   : > { %s3913_s22 = sld [smem:[#allocation2 + $0x70]]  ;;  %v1707_v5 = vstv %s3860_s30  ;;  %v3936_v36 = vmul.f32 %v3901_v55, %v890_v61  ;;  %v545_v52 = vadd.f32 %v3334_v19, %v481_v29  ;;  %v3945_v33 = vmul.f32 %v3231_v38, %v925_v49  ;;  %v4007_v61 = vld [vmem:[%s3043_s11 + $0x1a] sm:$0xff] }
 0x154   : > { %v3895_v56 = vpop.permute.xlu1 %1074  ;;  %v3915_v20 = vpop.permute.xlu0 %1066  ;;  %s3920_s26 = sld [smem:[#allocation2 + $0x78]]  ;;  %v1699_v4 = vstv %s3868_s21  ;;  %v3948_v41 = vmul.f32 %v3901_v55, %v886_v47  ;;  %v898_v8 = vstv %s3767_s6  ;;  %v3956_v0 = vmul.f32 %v2812_v62, %v921_v12  ;;  %v4916_v47 = vld [vmem:[#allocation23_spill] sm:$0xff]  ;;  %v4917_v12 = vld [vmem:[#allocation24_spill] sm:$0xff] }
 0x155   : > { %s3931_s4 = sld [smem:[#allocation2 + $0xe9]]  ;;  %v933_v3 = vstv %s3773_s9  ;;  %v894_v7 = vstv %s3796_s25  ;;  %v1708_v38 = vmul.f32 %v3857_v14, %v1707_v5  ;;  %v569_v19 = vadd.f32 %v3345_v25, %v505_v42  ;;  %v4912_v25 = vld [vmem:[#allocation21_spill] sm:$0xff]  ;;  %v4914_v42 = vld [vmem:[#allocation22_spill] sm:$0xff] }
 0x156   : > { %1678 = vrot.lane.b32.xlu1 %v1676_v40, %s4909_s29  ;;  %1670 = vrot.lane.b32.xlu0 %v1668_v48, %s4909_s29  ;;  %s3941_s8 = sld [smem:[#allocation2 + $0xe8]]  ;;  %v929_v9 = vstv %s3800_s0  ;;  %v1700_v16 = vmul.f32 %v3857_v14, %v1699_v4  ;;  %v561_v23 = vadd.f32 %v4910_v63, %v497_v46  ;;  %v3973_v27 = vmul.f32 %v3901_v55, %v898_v8 }
 0x157   : > { %s3951_s16 = sld [smem:[#allocation2 + $0x73]]  ;;  %v1723_v21 = vstv %s3890_s20  ;;  %v906_v11 = vstv %s3819_s7  ;;  %v585_v29 = vadd.f32 %v4912_v25, %v521_v54  ;;  %v3982_v32 = vmul.f32 %v2812_v62, %v933_v3  ;;  %4915 = vst [vmem:[#allocation22_spill] sm:$0xff] %v4007_v61 }
 0x158   : > { %v3938_v44 = vpop.permute.xlu1 %1090  ;;  %v3953_v15 = vpop.permute.xlu0 %1082  ;;  %s3960_s23 = sld [smem:[#allocation2 + $0x7b]]  ;;  %v1715_v50 = vstv %s3898_s1  ;;  %v3985_v35 = vmul.f32 %v3901_v55, %v894_v7  ;;  %v941_v13 = vstv %s3823_s24  ;;  %v577_v46 = vadd.f32 %v4914_v42, %v513_v22 }
 0x159   : > { %s3969_s3 = sld [smem:[#allocation2 + $0xeb]]  ;;  %v3993_v48 = vmul.f32 %v2812_v62, %v929_v9  ;;  %v902_v51 = vstv %s3841_s27  ;;  %v1724_v54 = vmul.f32 %v3857_v14, %v1723_v21  ;;  %v4001_v58 = vmul.f32 %v3901_v55, %v906_v11  ;;  %v4921_v11 = vld [vmem:[#allocation26_spill] sm:$0xff] }
 0x15a   : > { %1694 = vrot.lane.b32.xlu1 %v1692_v18, %s4909_s29  ;;  %1686 = vrot.lane.b32.xlu0 %v1684_v57, %s4909_s29  ;;  %s3979_s18 = sld [smem:[#allocation2 + $0xea]]  ;;  %v937_v53 = vstv %s3848_s28  ;;  %v1716_v22 = vmul.f32 %v3857_v14, %v1715_v50  ;;  %v601_v18 = vadd.f32 %v4916_v47, %v537_v2  ;;  %v4014_v57 = vadd.f32 %v4917_v12, %v529_v39  ;;  %v4920_v39 = vld [vmem:[#allocation25_spill] sm:$0xff]  ;;  %v4923_v47 = vld [vmem:[#allocation30_spill] sm:$0xff] }
 0x15b   : > { %s3988_s6 = sld [smem:[#allocation2 + $0x72]]  ;;  %v1739_v49 = vstv %s3931_s4  ;;  %v4016_v5 = vmul.f32 %v2812_v62, %v941_v13  ;;  %v4024_v3 = vmul.f32 %v3901_v55, %v902_v51  ;;  %v952_v7 = vstv %s3874_s2 }
 0x15c   : > { %v3976_v24 = vpop.permute.xlu1 %1106  ;;  %v3990_v40 = vpop.permute.xlu0 %1098  ;;  %s3996_s9 = sld [smem:[#allocation2 + $0x7a]]  ;;  %v1731_v8 = vstv %s3941_s8  ;;  %v948_v9 = vstv %s3913_s22  ;;  %v4034_v21 = vmul.f32 %v2812_v62, %v937_v53  ;;  %v983_v63 = vstv %s3920_s26 }
 0x15d   : > { %4911 = vst [vmem:[#allocation20_spill] sm:$0xff] %v3976_v24  ;;  %4913 = vst [vmem:[#allocation21_spill] sm:$0xff] %v3990_v40  ;;  %s4010_s19 = sld [smem:[#allocation2 + $0xed]]  ;;  %v1740_v55 = vmul.f32 %v4007_v61, %v1739_v49  ;;  %v609_v50 = vadd.f32 %v4921_v11, %v545_v52  ;;  %v960_v25 = vstv %s3951_s16  ;;  %v1732_v13 = vmul.f32 %v4007_v61, %v1731_v8 }
 0x15e   : > { %1710 = vrot.lane.b32.xlu1 %v1708_v38, %s4909_s29  ;;  %1702 = vrot.lane.b32.xlu0 %v1700_v16, %s4909_s29  ;;  %s4021_s15 = sld [smem:[#allocation2 + $0xec]]  ;;  %v987_v38 = vstv %s3881_s13  ;;  %v617_v16 = vadd.f32 %v4920_v39, %v553_v31  ;;  %v4049_v31 = vld [vmem:[%s3043_s11 + $0x31] sm:$0xff]  ;;  %v625_v12 = vadd.f32 %v4923_v47, %v561_v23  ;;  %v4068_v8 = vmul.f32 %v3379_v43, %v983_v63  ;;  %v4924_v23 = vld [vmem:[#allocation31_spill] sm:$0xff] }
 0x15f   : > { %s4029_s25 = sld [smem:[#allocation2 + $0x75]]  ;;  %v1755_v42 = vstv %s3969_s3  ;;  %v4052_v62 = vmul.f32 %v4049_v31, %v952_v7  ;;  %v4055_v51 = vmul.f32 %v3379_v43, %v987_v38  ;;  %v4058_v52 = vmul.f32 %v4049_v31, %v948_v9 }
 0x160   : > { %v4018_v4 = vpop.permute.xlu1 %1122  ;;  %v4031_v2 = vpop.permute.xlu0 %1114  ;;  %s4037_s0 = sld [smem:[#allocation2 + $0x77]]  ;;  %v1747_v53 = vstv %s3979_s18  ;;  %v995_v7 = vstv %s3960_s23  ;;  %v4076_v9 = vmul.f32 %v4049_v31, %v960_v25  ;;  %v649_v63 = vadd.f32 %v4924_v23, %v585_v29 }
 0x161   : > { %4918 = vst [vmem:[#allocation23_spill] sm:$0xff] %v4018_v4  ;;  %4919 = vst [vmem:[#allocation24_spill] sm:$0xff] %v4031_v2  ;;  %s4046_s17 = sld [smem:[#allocation2 + $0xef]]  ;;  %v956_v39 = vstv %s3988_s6  ;;  %v1748_v14 = vmul.f32 %v4007_v61, %v1747_v53  ;;  %v4926_v2 = vld [vmem:[#allocation33_spill] sm:$0xff]  ;;  %v673_v34 = vadd.f32 %v4927_v28, %v609_v50  ;;  %v4930_v53 = vld [vmem:[#allocation54_spill] sm:$0xff] }
 0x162   : > { %1726 = vrot.lane.b32.xlu1 %v1724_v54, %s4909_s29  ;;  %1718 = vrot.lane.b32.xlu0 %v1716_v22, %s4909_s29  ;;  %s4063_s5 = sld [smem:[#allocation2 + $0xee]]  ;;  %v4922_v22 = vld [vmem:[#allocation28_spill] sm:$0xff]  ;;  %v991_v11 = vstv %s3996_s9  ;;  %v641_v4 = vadd.f32 %v4926_v2, %v577_v46  ;;  %v4932_v2 = vld [vmem:[#allocation55_spill] sm:$0xff] }
 0x163   : > { %v633_v49 = vadd.f32 %v4922_v22, %v569_v19  ;;  %s4071_s7 = sld [smem:[#allocation2 + $0x7d]]  ;;  %v1756_v19 = vmul.f32 %v4007_v61, %v1755_v42  ;;  %v4925_v22 = vld [vmem:[#allocation39_spill] sm:$0xff]  ;;  %v1771_v25 = vstv %s4010_s19  ;;  %v4107_v46 = vmul.f32 %v3379_v43, %v991_v11 }
 0x164   : > { %v4060_v54 = vpop.permute.xlu1 %1138  ;;  %v4073_v38 = vpop.permute.xlu0 %1130  ;;  %s4080_s24 = sld [smem:[#allocation2 + $0x7f]]  ;;  %v681_v47 = vadd.f32 %v4925_v22, %v617_v16  ;;  %v1763_v29 = vstv %s4021_s15  ;;  %v4929_v16 = vld [vmem:[#allocation35_spill] sm:$0xff]  ;;  %v4104_v22 = vmul.f32 %v4049_v31, %v956_v39  ;;  %v737_v50 = vadd.f32 %v4932_v2, %v673_v34  ;;  %v4935_v34 = vld [vmem:[#allocation37_spill] sm:$0xff] }
 0x165   : > { %s4089_s14 = sld [smem:[#allocation2 + $0xf1]]  ;;  %v4933_v39 = vld [vmem:[#allocation42_spill] sm:$0xff]  ;;  %v657_v2 = vadd.f32 %v4935_v34, %v4014_v57 }
 0x166   : > { %1742 = vrot.lane.b32.xlu1 %v1740_v55, %s4909_s29  ;;  %1734 = vrot.lane.b32.xlu0 %v1732_v13, %s4909_s29  ;;  %v4094_v55 = vmul.f32 %v3379_v43, %v995_v7  ;;  %s4099_s10 = sld [smem:[#allocation2 + $0xf0]]  ;;  %v665_v13 = vadd.f32 %v4929_v16, %v601_v18  ;;  %v745_v23 = vadd.f32 %v4930_v53, %v681_v47  ;;  %v968_v7 = vstv %s4029_s25  ;;  %v4934_v43 = vld [vmem:[#allocation62_spill] sm:$0xff] }
 0x167   : > { %s4109_s27 = sld [smem:[#allocation2 + $0x76]]  ;;  %v976_v40 = vstv %s4037_s0  ;;  %v1772_v18 = vmul.f32 %v4007_v61, %v1771_v25  ;;  %v697_v47 = vadd.f32 %v4933_v39, %v633_v49  ;;  %v1764_v16 = vmul.f32 %v4007_v61, %v1763_v29  ;;  %v4937_v25 = vld [vmem:[#allocation63_spill] sm:$0xff]  ;;  %v4938_v49 = vld [vmem:[#allocation56_spill] sm:$0xff] }
 0x168   : > { %v4096_v42 = vpop.permute.xlu1 %1154  ;;  %v4111_v28 = vpop.permute.xlu0 %1146  ;;  %s4118_s28 = sld [smem:[#allocation2 + $0xf3]]  ;;  %v809_v11 = vadd.f32 %v4934_v43, %v745_v23  ;;  %v1787_v53 = vstv %s4046_s17  ;;  %v4137_v29 = vmul.f32 %v4049_v31, %v968_v7  ;;  %v4147_v34 = vmul.f32 %v4049_v31, %v976_v40  ;;  %v4940_v7 = vld [vmem:[#allocation46_spill] sm:$0xff] }
 0x169   : > { %4928 = vst [vmem:[#allocation25_spill] sm:$0xff] %v4096_v42  ;;  %4931 = vst [vmem:[#allocation26_spill] sm:$0xff] %v4111_v28  ;;  %s4125_s30 = sld [smem:[#allocation2 + $0xf2]]  ;;  %v801_v28 = vadd.f32 %v4937_v25, %v737_v50  ;;  %v1779_v42 = vstv %s4063_s5  ;;  %v761_v39 = vadd.f32 %v4938_v49, %v697_v47  ;;  %v713_v47 = vadd.f32 %v4940_v7, %v649_v63  ;;  %v4943_v25 = vld [vmem:[#allocation65_spill] sm:$0xff]  ;;  %v4945_v7 = vld [vmem:[#allocation58_spill] sm:$0xff] }
 0x16a   : > { %1758 = vrot.lane.b32.xlu1 %v1756_v19, %s4909_s29  ;;  %1750 = vrot.lane.b32.xlu0 %v1748_v14, %s4909_s29  ;;  %v4936_v19 = vld [vmem:[#allocation44_spill] sm:$0xff]  ;;  %v873_v14 = vadd.f32 %v3789_v30, %v809_v11  ;;  %s4140_s21 = sld [smem:[#allocation2 + $0x7e]]  ;;  %v1788_v30 = vmul.f32 %v4007_v61, %v1787_v53  ;;  %v4941_v11 = vld [vmem:[#allocation64_spill] sm:$0xff]  ;;  %v1011_v63 = vstv %s4080_s24 }
 0x16b   : > { %v689_v24 = vadd.f32 %v4936_v19, %v625_v12  ;;  %v4939_v12 = vld [vmem:[#allocation57_spill] sm:$0xff]  ;;  %v865_v50 = vadd.f32 %v3798_v26, %v801_v28  ;;  %s4151_s2 = sld [smem:[#allocation2 + $0xf5]]  ;;  %v825_v19 = vadd.f32 %v4941_v11, %v761_v39  ;;  %v4158_v26 = vld [vmem:[%s3043_s11 + $0x32] sm:$0xff]  ;;  %v1803_v40 = vstv %s4089_s14 }
 0x16c   : > { %v4131_v1 = vpop.permute.xlu1 %1170  ;;  %v4142_v57 = vpop.permute.xlu0 %1162  ;;  %s4161_s13 = sld [smem:[#allocation2 + $0xf4]]  ;;  %v4942_v28 = vld [vmem:[#allocation48_spill] sm:$0xff]  ;;  %v1795_v39 = vstv %s4099_s10  ;;  %v908_v11 = vadd.f32 %v4001_v58, %v873_v14  ;;  %v4948_v58 = vld [vmem:[#allocation66_spill] sm:$0xff] }
 0x16d   : > { %v753_v43 = vadd.f32 %v4939_v12, %v689_v24  ;;  %v1780_v24 = vmul.f32 %v4007_v61, %v1779_v42  ;;  %s4165_s20 = sld [smem:[#allocation2 + $0x74]]  ;;  %v4944_v12 = vld [vmem:[#allocation50_spill] sm:$0xff]  ;;  %v777_v42 = vadd.f32 %v4945_v7, %v713_v47  ;;  %v972_v23 = vstv %s4109_s27 }
 0x16e   : > { %1774 = vrot.lane.b32.xlu1 %v1772_v18, %s4909_s29  ;;  %1766 = vrot.lane.b32.xlu0 %v1764_v16, %s4909_s29  ;;  %v705_v18 = vadd.f32 %v4942_v28, %v641_v4  ;;  %v729_v16 = vadd.f32 %v4944_v12, %v665_v13  ;;  %s4174_s1 = sld [smem:[#allocation2 + $0x7c]]  ;;  %v4947_v28 = vld [vmem:[#allocation59_spill] sm:$0xff]  ;;  %v1804_v61 = vmul.f32 %v4158_v26, %v1803_v40  ;;  %v1819_v13 = vstv %s4118_s28 }
 0x16f   : > { %v817_v53 = vadd.f32 %v4943_v25, %v753_v43  ;;  %v904_v25 = vadd.f32 %v4024_v3, %v865_v50  ;;  %s4184_s22 = sld [smem:[#allocation2 + $0xf7]]  ;;  %v884_v47 = vadd.f32 %v3904_v45, %v825_v19  ;;  %v841_v14 = vadd.f32 %v4948_v58, %v777_v42  ;;  %v4949_v3 = vld [vmem:[#allocation52_spill] sm:$0xff]  ;;  %v4950_v40 = vld [vmem:[#allocation67_spill] sm:$0xff]  ;;  %v4951_v45 = vld [vmem:[#allocation60_spill] sm:$0xff] }
 0x170   : > { %v4168_v49 = vpop.permute.xlu1 %1186  ;;  %v4177_v4 = vpop.permute.xlu0 %1178  ;;  %v769_v43 = vadd.f32 %v4947_v28, %v705_v18  ;;  %v1796_v12 = vmul.f32 %v4158_v26, %v1795_v39  ;;  %v1811_v7 = vstv %s4125_s30  ;;  %s4191_s26 = sld [smem:[#allocation2 + $0xf6]]  ;;  %v721_v50 = vadd.f32 %v4949_v3, %v657_v2 }
 0x171   : > { %4946 = vst [vmem:[#allocation28_spill] sm:$0xff] %v4177_v4  ;;  %v973_v28 = vmul.f32 %v4049_v31, %v972_v23  ;;  %v793_v19 = vadd.f32 %v4951_v45, %v729_v16  ;;  %v1007_v39 = vstv %s4140_s21  ;;  %v1820_v58 = vmul.f32 %v4158_v26, %v1819_v13  ;;  %s4205_s4 = sld [smem:[#allocation2 + $0xf9]] }
 0x172   : > { %1790 = vrot.lane.b32.xlu1 %v1788_v30, %s4909_s29  ;;  %1782 = vrot.lane.b32.xlu0 %v1780_v24, %s4909_s29  ;;  %v880_v30 = vadd.f32 %v3910_v59, %v817_v53  ;;  %v833_v18 = vadd.f32 %v4950_v40, %v769_v43  ;;  %v943_v24 = vadd.f32 %v4016_v5, %v908_v11  ;;  %v4952_v59 = vld [vmem:[#allocation61_spill] sm:$0xff]  ;;  %v1835_v16 = vstv %s4151_s2  ;;  %s4212_s8 = sld [smem:[#allocation2 + $0xf8]]  ;;  %v4953_v43 = vld [vmem:[#allocation68_spill] sm:$0xff] }
 0x173   : > { %v785_v2 = vadd.f32 %v4952_v59, %v721_v50  ;;  %v939_v23 = vadd.f32 %v4034_v21, %v904_v25  ;;  %v1812_v53 = vmul.f32 %v4158_v26, %v1811_v7  ;;  %v919_v5 = vadd.f32 %v3907_v17, %v884_v47  ;;  %v2814_v59 = vld [vmem:[%s3043_s11 + $0x49] sm:$0xff]  ;;  %s4230_s16 = sld [smem:[#allocation2 + $0xfb]] }
 0x174   : > { %v4197_v4 = vpop.permute.xlu1 %1202  ;;  %v4202_v42 = vpop.permute.xlu0 %1194  ;;  %v892_v11 = vadd.f32 %v3936_v36, %v841_v14  ;;  %v857_v13 = vadd.f32 %v4953_v43, %v793_v19  ;;  %v1827_v3 = vstv %s4161_s13  ;;  %v915_v50 = vadd.f32 %v3925_v6, %v880_v30  ;;  %s4236_s23 = sld [smem:[#allocation2 + $0xfa]] }
 0x175   : > { %v888_v21 = vadd.f32 %v3948_v41, %v833_v18  ;;  %v964_v7 = vstv %s4165_s20  ;;  %v999_v45 = vstv %s4174_s1  ;;  %v1012_v17 = vmul.f32 %v2814_v59, %v1011_v63  ;;  %s4268_s3 = sld [smem:[#allocation2 + $0xfd]] }
 0x176   : > { %1806 = vrot.lane.b32.xlu1 %v1804_v61, %s4909_s29  ;;  %1798 = vrot.lane.b32.xlu0 %v1796_v12, %s4909_s29  ;;  %v4954_v61 = vld [vmem:[#allocation69_spill] sm:$0xff]  ;;  %v978_v36 = vadd.f32 %v4147_v34, %v943_v24  ;;  %v1008_v47 = vmul.f32 %v2814_v59, %v1007_v39  ;;  %v974_v6 = vadd.f32 %v973_v28, %v939_v23  ;;  %v1851_v30 = vstv %s4184_s22  ;;  %s4276_s18 = sld [smem:[#allocation2 + $0xfc]] }
 0x177   : > { %v849_v25 = vadd.f32 %v4954_v61, %v785_v2  ;;  %v1836_v41 = vmul.f32 %v4158_v26, %v1835_v16  ;;  %v1828_v12 = vmul.f32 %v4158_v26, %v1827_v3  ;;  %v927_v63 = vadd.f32 %v3945_v33, %v892_v11  ;;  %s4289_s6 = sld [smem:[#allocation2 + $0xff]] }
 0x178   : > { %v4223_v40 = vpop.permute.xlu1 %1218  ;;  %v4228_v14 = vpop.permute.xlu0 %1210  ;;  %v900_v34 = vadd.f32 %v3973_v27, %v857_v13  ;;  %v954_v18 = vadd.f32 %v4052_v62, %v919_v5  ;;  %v1843_v28 = vstv %s4191_s26  ;;  %v923_v19 = vadd.f32 %v3956_v0, %v888_v21  ;;  %s4296_s9 = sld [smem:[#allocation2 + $0xfe]] }
 0x179   : > { %v896_v24 = vadd.f32 %v3985_v35, %v849_v25  ;;  %v950_v39 = vadd.f32 %v4058_v52, %v915_v50  ;;  %v965_v33 = vmul.f32 %v4049_v31, %v964_v7  ;;  %v4251_v27 = vmul.f32 %v2814_v59, %v999_v45  ;;  %v4259_v35 = vld [vmem:[%s3043_s11 + $0x4a] sm:$0xff]  ;;  %s4301_s19 = sld [smem:[#allocation2 + $0x101]] }
 0x17a   : > { %1822 = vrot.lane.b32.xlu1 %v1820_v58, %s4909_s29  ;;  %1814 = vrot.lane.b32.xlu0 %v1812_v53, %s4909_s29  ;;  %v4955_v58 = vstv %s4071_s7  ;;  %v1013_v62 = vadd.f32 %v1012_v17, %v978_v36  ;;  %v1852_v53 = vmul.f32 %v4158_v26, %v1851_v30  ;;  %v1009_v5 = vadd.f32 %v1008_v47, %v974_v6  ;;  %s4308_s15 = sld [smem:[#allocation2 + $0x100]] }
 0x17b   : > { %v1004_v2 = vmul.f32 %v2814_v59, %v4955_v58  ;;  %v1844_v0 = vmul.f32 %v4158_v26, %v1843_v28  ;;  %v1867_v52 = vstv %s4205_s4  ;;  %v1859_v11 = vstv %s4212_s8  ;;  %s4316_s25 = sld [smem:[#allocation2 + $0x103]]  ;;  %v4960_v58 = vld [vmem:[#allocation21_spill] sm:$0xff] }
 0x17c   : > { %v4248_v23 = vpop.permute.xlu1 %1234  ;;  %v4253_v16 = vpop.permute.xlu0 %1226  ;;  %v935_v43 = vadd.f32 %v3982_v32, %v900_v34  ;;  %v989_v31 = vadd.f32 %v4055_v51, %v954_v18  ;;  %v962_v13 = vadd.f32 %v4076_v9, %v927_v63  ;;  %v1077_v3 = vadd.f32 %v3895_v56, %v1013_v62  ;;  %v4959_v18 = vld [vmem:[#allocation20_spill] sm:$0xff]  ;;  %s4322_s0 = sld [smem:[#allocation2 + $0x102]] }
 0x17d   : > { %v931_v50 = vadd.f32 %v3993_v48, %v896_v24  ;;  %v985_v21 = vadd.f32 %v4068_v8, %v950_v39  ;;  %v958_v61 = vadd.f32 %v4104_v22, %v923_v19  ;;  %v1069_v32 = vadd.f32 %v3915_v20, %v1009_v5  ;;  %s4328_s17 = sld [smem:[#allocation2 + $0x105]] }
 0x17e   : > { %1838 = vrot.lane.b32.xlu1 %v1836_v41, %s4909_s29  ;;  %1830 = vrot.lane.b32.xlu0 %v1828_v12, %s4909_s29  ;;  %v1029_v56 = vadd.f32 %v3809_v10, %v989_v31  ;;  %v1141_v51 = vadd.f32 %v4060_v54, %v1077_v3  ;;  %v1868_v7 = vmul.f32 %v4259_v35, %v1867_v52  ;;  %v1883_v20 = vstv %s4230_s16  ;;  %s4334_s5 = sld [smem:[#allocation2 + $0x104]]  ;;  %v4963_v3 = vld [vmem:[#allocation23_spill] sm:$0xff] }
 0x17f   : > { %v1860_v48 = vmul.f32 %v4259_v35, %v1859_v11  ;;  %v1021_v8 = vadd.f32 %v3821_v37, %v985_v21  ;;  %v1133_v22 = vadd.f32 %v4073_v38, %v1069_v32  ;;  %v1875_v45 = vstv %s4236_s23  ;;  %s4342_s7 = sld [smem:[#allocation2 + $0x107]] }
 0x180   : > { %v4274_v25 = vpop.permute.xlu1 %1250  ;;  %v4280_v9 = vpop.permute.xlu0 %1242  ;;  %v997_v10 = vadd.f32 %v4094_v55, %v962_v13  ;;  %v970_v54 = vadd.f32 %v4137_v29, %v935_v43  ;;  %v1093_v59 = vadd.f32 %v3938_v44, %v1029_v56  ;;  %v1205_v17 = vadd.f32 %v4197_v4, %v1141_v51  ;;  %v4956_v29 = vld [vmem:[#allocation25_spill] sm:$0xff]  ;;  %v4962_v43 = vld [vmem:[#allocation73_spill] sm:$0xff]  ;;  %s4349_s24 = sld [smem:[#allocation2 + $0x106]] }
 0x181   : > { %v993_v37 = vadd.f32 %v4107_v46, %v958_v61  ;;  %v966_v38 = vadd.f32 %v965_v33, %v931_v50  ;;  %v1085_v36 = vadd.f32 %v3953_v15, %v1021_v8  ;;  %v1197_v47 = vadd.f32 %v4202_v42, %v1133_v22  ;;  %v4957_v46 = vld [vmem:[#allocation70_spill] sm:$0xff]  ;;  %v4958_v15 = vld [vmem:[#allocation26_spill] sm:$0xff]  ;;  %s4354_s14 = sld [smem:[#allocation2 + $0x109]]  ;;  %v4965_v22 = vld [vmem:[#allocation28_spill] sm:$0xff] }
 0x182   : > { %1854 = vrot.lane.b32.xlu1 %v1852_v53, %s4909_s29  ;;  %1846 = vrot.lane.b32.xlu0 %v1844_v0, %s4909_s29  ;;  %v1045_v55 = vadd.f32 %v3832_v60, %v997_v10  ;;  %v1157_v44 = vadd.f32 %v4956_v29, %v1093_v59  ;;  %v1884_v12 = vmul.f32 %v4259_v35, %v1883_v20  ;;  %v1899_v24 = vstv %s4268_s3  ;;  %s4357_s10 = sld [smem:[#allocation2 + $0x108]] }
 0x183   : > { %v1037_v30 = vadd.f32 %v4957_v46, %v993_v37  ;;  %v1149_v42 = vadd.f32 %v4958_v15, %v1085_v36  ;;  %v1876_v60 = vmul.f32 %v4259_v35, %v1875_v45  ;;  %v1005_v34 = vadd.f32 %v1004_v2, %v970_v54  ;;  %v4961_v2 = vld [vmem:[#allocation72_spill] sm:$0xff]  ;;  %s4362_s27 = sld [smem:[#allocation2 + $0x10b]] }
 0x184   : > { %v1267_v6 = vpop.permute.xlu1 %1266  ;;  %v1259_v41 = vpop.permute.xlu0 %1258  ;;  %v1109_v28 = vadd.f32 %v4959_v18, %v1045_v55  ;;  %v1221_v19 = vadd.f32 %v4223_v40, %v1157_v44  ;;  %v1001_v39 = vadd.f32 %v4251_v27, %v966_v38  ;;  %v1891_v5 = vstv %s4276_s18  ;;  %s4368_s28 = sld [smem:[#allocation2 + $0x10a]] }
 0x185   : > { %v4305_v4 = vadd.f32 %v1267_v6, %v1205_v17  ;;  %v4312_v63 = vadd.f32 %v1259_v41, %v1197_v47  ;;  %v1101_v33 = vadd.f32 %v4960_v58, %v1037_v30  ;;  %v1213_v62 = vadd.f32 %v4228_v14, %v1149_v42  ;;  %s4372_s30 = sld [smem:[#allocation2 + $0x10d]]  ;;  %v4966_v47 = vld [vmem:[#allocation71_spill] sm:$0xff] }
 0x186   : > { %1870 = vrot.lane.b32.xlu1 %v1868_v7, %s4909_s29  ;;  %1862 = vrot.lane.b32.xlu0 %v1860_v48, %s4909_s29  ;;  %v1061_v0 = vadd.f32 %v4961_v2, %v1005_v34  ;;  %v1173_v40 = vadd.f32 %v4131_v1, %v1109_v28  ;;  %v1053_v27 = vadd.f32 %v4962_v43, %v1001_v39  ;;  %v1915_v61 = vstv %s4289_s6  ;;  %s4374_s21 = sld [smem:[#allocation2 + $0x10c]] }
 0x187   : > { %v1165_v31 = vadd.f32 %v4142_v57, %v1101_v33  ;;  %v1900_v13 = vmul.f32 %v4259_v35, %v1899_v24  ;;  %v1892_v21 = vmul.f32 %v4259_v35, %v1891_v5  ;;  %v4964_v57 = vld [vmem:[#allocation24_spill] sm:$0xff]  ;;  %v1907_v7 = vstv %s4296_s9  ;;  %s4378_s2 = sld [smem:[#allocation2 + $0x10f]] }
 0x188   : > { %v1283_v53 = vpop.permute.xlu1 %1282  ;;  %v1275_v11 = vpop.permute.xlu0 %1274  ;;  %v1125_v1 = vadd.f32 %v4963_v3, %v1061_v0  ;;  %v1237_v50 = vadd.f32 %v4248_v23, %v1173_v40  ;;  %v1117_v32 = vadd.f32 %v4964_v57, %v1053_v27  ;;  %v1916_v10 = vmul.f32 %v4259_v35, %v1915_v61  ;;  %s4383_s13 = sld [smem:[#allocation2 + $0x10e]] }
 0x189   : > { %v4332_v52 = vadd.f32 %v1283_v53, %v1221_v19  ;;  %v4338_v14 = vadd.f32 %v1275_v11, %v1213_v62  ;;  %v1229_v56 = vadd.f32 %v4253_v16, %v1165_v31  ;;  %v1931_v54 = vstv %s4301_s19  ;;  %s4386_s20 = sld [smem:[#allocation2 + $0x111]]  ;;  %v4967_v31 = vld [vmem:[#allocation22_spill] sm:$0xff] }
 0x18a   : > { %1886 = vrot.lane.b32.xlu1 %v1884_v12, %s4909_s29  ;;  %1878 = vrot.lane.b32.xlu0 %v1876_v60, %s4909_s29  ;;  %v1189_v48 = vadd.f32 %v4168_v49, %v1125_v1  ;;  %v1181_v20 = vadd.f32 %v4965_v22, %v1117_v32  ;;  %v1908_v49 = vmul.f32 %v4259_v35, %v1907_v7  ;;  %v1923_v37 = vstv %s4308_s15  ;;  %s4389_s1 = sld [smem:[#allocation2 + $0x110]] }
 0x18b   : > { %v1932_v6 = vmul.f32 %v4966_v47, %v1931_v54  ;;  %v1947_v55 = vstv %s4316_s25  ;;  %v1939_v44 = vstv %s4322_s0  ;;  %v1963_v42 = vstv %s4328_s17  ;;  %s4399_s22 = sld [smem:[#allocation2 + $0xc9]] }
 0x18c   : > { %v1299_v51 = vpop.permute.xlu1 %1298  ;;  %v1291_v8 = vpop.permute.xlu0 %1290  ;;  %v1253_v16 = vadd.f32 %v4274_v25, %v1189_v48  ;;  %v1245_v59 = vadd.f32 %v4280_v9, %v1181_v20  ;;  %v1924_v9 = vmul.f32 %v4966_v47, %v1923_v37  ;;  %v1948_v30 = vmul.f32 %v4966_v47, %v1947_v55  ;;  %s4402_s26 = sld [smem:[#allocation2 + $0xc0]] }
 0x18d   : > { %v1301_v23 = vadd.f32 %v1299_v51, %v1237_v50  ;;  %v1293_v45 = vadd.f32 %v1291_v8, %v1229_v56  ;;  %v1940_v15 = vmul.f32 %v4966_v47, %v1939_v44  ;;  %v1955_v60 = vstv %s4334_s5  ;;  %s4405_s4 = sld [smem:[#allocation2 + $0xc8]] }
 0x18e   : > { %1902 = vrot.lane.b32.xlu1 %v1900_v13, %s4909_s29  ;;  %1894 = vrot.lane.b32.xlu0 %v1892_v21, %s4909_s29  ;;  %v1964_v28 = vmul.f32 %v4966_v47, %v1963_v42  ;;  %s4410_s8 = sld [smem:[#allocation2 + $0x113]]  ;;  %v1956_v19 = vmul.f32 %v4966_v47, %v1955_v60  ;;  %v1979_v24 = vstv %s4342_s7  ;;  %v1971_v58 = vstv %s4349_s24 }
 0x18f   : > { %s4415_s16 = sld [smem:[#allocation2 + $0x112]]  ;;  %v1980_v5 = vmul.f32 %v4966_v47, %v1979_v24  ;;  %v1972_v2 = vmul.f32 %v4966_v47, %v1971_v58  ;;  %v1995_v0 = vstv %s4354_s14  ;;  %v2011_v3 = vstv %s4362_s27 }
 0x190   : > { %v1315_v17 = vpop.permute.xlu1 %1314  ;;  %v1307_v36 = vpop.permute.xlu0 %1306  ;;  %s4418_s23 = sld [smem:[#allocation2 + $0xc3]]  ;;  %v2003_v50 = vstv %s4368_s28  ;;  %v2012_v32 = vmul.f32 %v4967_v31, %v2011_v3  ;;  %v2027_v56 = vstv %s4372_s30  ;;  %v2019_v48 = vstv %s4374_s21 }
 0x191   : > { %v1317_v38 = vadd.f32 %v1315_v17, %v1253_v16  ;;  %v1309_v25 = vadd.f32 %v1307_v36, %v1245_v59  ;;  %s4422_s3 = sld [smem:[#allocation2 + $0xcb]]  ;;  %v2004_v51 = vmul.f32 %v4967_v31, %v2003_v50  ;;  %v2028_v22 = vmul.f32 %v4967_v31, %v2027_v56 }
 0x192   : > { %1918 = vrot.lane.b32.xlu1 %v1916_v10, %s4909_s29  ;;  %1910 = vrot.lane.b32.xlu0 %v1908_v49, %s4909_s29  ;;  %s4394_s29 = sld [smem:[#allocation2 + $0xc1]]  ;;  %v2043_v20 = vstv %s4378_s2  ;;  %v2035_v10 = vstv %s4383_s13  ;;  %v2020_v54 = vmul.f32 %v4967_v31, %v2019_v48 }
 0x193   : > { %s4428_s18 = sld [smem:[#allocation2 + $0xc2]]  ;;  %v2059_v16 = vstv %s4386_s20  ;;  %v2051_v49 = vstv %s4389_s1  ;;  %v1569_v17 = vstv %s4399_s22  ;;  %v1530_v37 = vstv %s4402_s26 }
 0x194   : > { %v1331_v29 = vpop.permute.xlu1 %1330  ;;  %v1323_v12 = vpop.permute.xlu0 %1322  ;;  %s4433_s6 = sld [smem:[#allocation2 + $0xca]]  ;;  %v2044_v36 = vmul.f32 %v4967_v31, %v2043_v20  ;;  %v2036_v55 = vmul.f32 %v4967_v31, %v2035_v10  ;;  %v2052_v44 = vmul.f32 %v4158_v26, %v2051_v49  ;;  %v2075_v42 = vstv %s4410_s8 }
 0x195   : > { %v1333_v41 = vadd.f32 %v1331_v29, %v4305_v4  ;;  %v1325_v46 = vadd.f32 %v1323_v12, %v4312_v63  ;;  %s4436_s9 = sld [smem:[#allocation2 + $0x115]]  ;;  %v2060_v29 = vmul.f32 %v4158_v26, %v2059_v16 }
 0x196   : > { %1934 = vrot.lane.b32.xlu1 %v1932_v6, %s4862_s12  ;;  %1926 = vrot.lane.b32.xlu0 %v1924_v9, %s4862_s12  ;;  %s4440_s19 = sld [smem:[#allocation2 + $0x114]]  ;;  %v1542_v60 = vstv %s4418_s23 }
 0x197   : > { %s4446_s15 = sld [smem:[#allocation2 + $0xc5]] }
 0x198   : > { %v1347_v4 = vpop.permute.xlu1 %1346  ;;  %v1339_v34 = vpop.permute.xlu0 %1338  ;;  %s4451_s25 = sld [smem:[#allocation2 + $0xcd]]  ;;  %v1534_v59 = vstv %s4394_s29 }
 0x199   : > { %v1349_v63 = vadd.f32 %v1347_v4, %v4332_v52  ;;  %v1341_v18 = vadd.f32 %v1339_v34, %v4338_v14  ;;  %v1987_v52 = vstv %s4357_s10  ;;  %v1996_v14 = vmul.f32 %v4967_v31, %v1995_v0  ;;  %s4454_s0 = sld [smem:[#allocation2 + $0xc4]] }
 0x19a   : > { %1950 = vrot.lane.b32.xlu1 %v1948_v30, %s4862_s12  ;;  %1942 = vrot.lane.b32.xlu0 %v1940_v15, %s4862_s12  ;;  %v1988_v13 = vmul.f32 %v4967_v31, %v1987_v52  ;;  %s4458_s17 = sld [smem:[#allocation2 + $0xcc]]  ;;  %v4512_v12 = vmul.f32 %v4966_v47, %v1534_v59  ;;  %v4518_v30 = vmul.f32 %v4966_v47, %v1530_v37  ;;  %v2067_v4 = vstv %s4415_s16 }
 0x19b   : > { %s4465_s5 = sld [smem:[#allocation2 + $0x117]]  ;;  %v1577_v34 = vstv %s4422_s3  ;;  %v1538_v47 = vstv %s4428_s18 }
 0x19c   : > { %v1363_v39 = vpop.permute.xlu1 %1362  ;;  %v1355_v62 = vpop.permute.xlu0 %1354  ;;  %s4469_s7 = sld [smem:[#allocation2 + $0x116]] }
 0x19d   : > { %v4420_v33 = vadd.f32 %v1363_v39, %v1301_v23  ;;  %v4424_v53 = vadd.f32 %v1355_v62, %v1293_v45  ;;  %s4472_s24 = sld [smem:[#allocation2 + $0xc7]]  ;;  %v2083_v39 = vstv %s4440_s19  ;;  %v1550_v58 = vstv %s4446_s15 }
 0x19e   : > { %1966 = vrot.lane.b32.xlu1 %v1964_v28, %s4862_s12  ;;  %1958 = vrot.lane.b32.xlu0 %v1956_v19, %s4862_s12  ;;  %s4478_s14 = sld [smem:[#allocation2 + $0xcf]]  ;;  %v2091_v28 = vstv %s4436_s9 }
 0x19f   : > { %s4486_s10 = sld [smem:[#allocation2 + $0xc6]] }
 0x1a0   : > { %v1379_v40 = vpop.permute.xlu1 %1378  ;;  %v1371_v43 = vpop.permute.xlu0 %1370  ;;  %s4493_s27 = sld [smem:[#allocation2 + $0xce]] }
 0x1a1   : > { %v4438_v11 = vadd.f32 %v1379_v40, %v1317_v38  ;;  %v4442_v27 = vadd.f32 %v1371_v43, %v1309_v25  ;;  %v1565_v25 = vstv %s4405_s4  ;;  %s4497_s28 = sld [smem:[#allocation2 + $0x119]]  ;;  %v4558_v40 = vmul.f32 %v4967_v31, %v1577_v34 }
 0x1a2   : > { %1982 = vrot.lane.b32.xlu1 %v1980_v5, %s4862_s12  ;;  %1974 = vrot.lane.b32.xlu0 %v1972_v2, %s4862_s12  ;;  %s4505_s30 = sld [smem:[#allocation2 + $0x118]]  ;;  %v4524_v15 = vmul.f32 %v4967_v31, %v1565_v25  ;;  %v2068_v5 = vmul.f32 %v4158_v26, %v2067_v4  ;;  %v2815_v2 = vld [vmem:[%s3043_s11 + $0x2] sm:$0xff]  ;;  %v2092_v43 = vmul.f32 %v4158_v26, %v2091_v28  ;;  %v2107_v56 = vstv %s4465_s5 }
 0x1a3   : > { %s4520_s21 = sld [smem:[#allocation2 + $0xd1]]  ;;  %v4552_v0 = vmul.f32 %v2815_v2, %v1542_v60  ;;  %v4560_v52 = vmul.f32 %v2815_v2, %v1538_v47  ;;  %v1558_v48 = vstv %s4472_s24 }
 0x1a4   : > { %v1395_v1 = vpop.permute.xlu1 %1394  ;;  %v1387_v61 = vpop.permute.xlu0 %1386  ;;  %s4529_s2 = sld [smem:[#allocation2 + $0xd9]] }
 0x1a5   : > { %v4456_v21 = vadd.f32 %v1395_v1, %v1333_v41  ;;  %v4460_v57 = vadd.f32 %v1387_v61, %v1325_v46  ;;  %v4515_v46 = vmul.f32 %v4967_v31, %v1569_v17  ;;  %s4535_s13 = sld [smem:[#allocation2 + $0xd0]]  ;;  %v1546_v1 = vstv %s4454_s0 }
 0x1a6   : > { %1998 = vrot.lane.b32.xlu1 %v1996_v14, %s4862_s12  ;;  %1990 = vrot.lane.b32.xlu0 %v1988_v13, %s4862_s12  ;;  %s4543_s20 = sld [smem:[#allocation2 + $0xd8]]  ;;  %v4569_v14 = vmul.f32 %v4158_v26, %v2083_v39  ;;  %v4571_v13 = vmul.f32 %v2815_v2, %v1550_v58  ;;  %v1589_v20 = vstv %s4493_s27 }
 0x1a7   : > { %s4554_s1 = sld [smem:[#allocation2 + $0x11b]]  ;;  %v2123_v10 = vstv %s4497_s28 }
 0x1a8   : > { %v1411_v7 = vpop.permute.xlu1 %1410  ;;  %v1403_v8 = vpop.permute.xlu0 %1402  ;;  %s4566_s11 = sld [smem:[#allocation2 + $0x11a]]  ;;  %v2115_v16 = vstv %s4505_s30 }
 0x1a9   : > { %v4474_v23 = vadd.f32 %v1411_v7, %v1349_v63  ;;  %v4480_v45 = vadd.f32 %v1403_v8, %v1341_v18  ;;  %v1573_v18 = vstv %s4433_s6  ;;  %s4577_s29 = sld [smem:[#allocation2 + $0xd3]]  ;;  %v1593_v8 = vstv %s4478_s14 }
 0x1aa   : > { %2014 = vrot.lane.b32.xlu1 %v2012_v32, %s4862_s12  ;;  %2006 = vrot.lane.b32.xlu0 %v2004_v51, %s4862_s12  ;;  %v1581_v32 = vstv %s4458_s17  ;;  %v2099_v51 = vstv %s4469_s7  ;;  %s4585_s22 = sld [smem:[#allocation2 + $0xdb]]  ;;  %v4616_v25 = vmul.f32 %v4967_v31, %v1593_v8 }
 0x1ab   : > { %s4594_s26 = sld [smem:[#allocation2 + $0xd2]]  ;;  %v2100_v59 = vmul.f32 %v4158_v26, %v2099_v51  ;;  %v1604_v17 = vstv %s4520_s21  ;;  %v1639_v4 = vstv %s4529_s2  ;;  %v1600_v60 = vstv %s4535_s13 }
 0x1ac   : > { %v1427_v38 = vpop.permute.xlu1 %1426  ;;  %v1419_v9 = vpop.permute.xlu0 %1418  ;;  %s4602_s4 = sld [smem:[#allocation2 + $0xda]]  ;;  %v1635_v34 = vstv %s4543_s20 }
 0x1ad   : > { %v4500_v6 = vadd.f32 %v1427_v38, %v4420_v33  ;;  %v4508_v41 = vadd.f32 %v1419_v9, %v4424_v53  ;;  %v1585_v33 = vstv %s4451_s25  ;;  %v2076_v53 = vmul.f32 %v4158_v26, %v2075_v42  ;;  %s4610_s8 = sld [smem:[#allocation2 + $0x11d]] }
 0x1ae   : > { %2030 = vrot.lane.b32.xlu1 %v2028_v22, %s4862_s12  ;;  %2022 = vrot.lane.b32.xlu0 %v2020_v54, %s4862_s12  ;;  %v4574_v3 = vmul.f32 %v4967_v31, %v1585_v33  ;;  %v1554_v22 = vstv %s4486_s10  ;;  %v2108_v54 = vmul.f32 %v4158_v26, %v2107_v56  ;;  %s4620_s16 = sld [smem:[#allocation2 + $0x11c]]  ;;  %v2139_v47 = vstv %s4554_s1 }
 0x1af   : > { %v4618_v9 = vmul.f32 %v2815_v2, %v1554_v22  ;;  %s4633_s23 = sld [smem:[#allocation2 + $0xd5]] }
 0x1b0   : > { %v1443_v63 = vpop.permute.xlu1 %1442  ;;  %v1435_v24 = vpop.permute.xlu0 %1434  ;;  %s4640_s3 = sld [smem:[#allocation2 + $0xd4]]  ;;  %v1647_v58 = vstv %s4585_s22 }
 0x1b1   : > { %v4538_v19 = vadd.f32 %v1443_v63, %v4438_v11  ;;  %v4546_v62 = vadd.f32 %v1435_v24, %v4442_v27  ;;  %v4563_v11 = vmul.f32 %v4967_v31, %v1573_v18  ;;  %v2131_v18 = vstv %s4566_s11  ;;  %s4655_s18 = sld [smem:[#allocation2 + $0xdd]] }
 0x1b2   : > { %2046 = vrot.lane.b32.xlu1 %v2044_v36, %s4862_s12  ;;  %2038 = vrot.lane.b32.xlu0 %v2036_v55, %s4862_s12  ;;  %v4613_v36 = vmul.f32 %v2815_v2, %v1558_v48  ;;  %s4663_s6 = sld [smem:[#allocation2 + $0xdc]]  ;;  %v1643_v56 = vstv %s4602_s4 }
 0x1b3   : > { %s4669_s9 = sld [smem:[#allocation2 + $0xd7]]  ;;  %v2155_v51 = vstv %s4610_s8 }
 0x1b4   : > { %v1459_v27 = vpop.permute.xlu1 %1458  ;;  %v1451_v61 = vpop.permute.xlu0 %1450  ;;  %s4675_s19 = sld [smem:[#allocation2 + $0xd6]]  ;;  %v2147_v8 = vstv %s4620_s16 }
 0x1b5   : > { %v4580_v50 = vadd.f32 %v1459_v27, %v4456_v21  ;;  %v4588_v7 = vadd.f32 %v1451_v61, %v4460_v57  ;;  %v4597_v21 = vmul.f32 %v2815_v2, %v1546_v1  ;;  %v4605_v57 = vmul.f32 %v4967_v31, %v1581_v32  ;;  %s4682_s15 = sld [smem:[#allocation2 + $0x11f]] }
 0x1b6   : > { %2062 = vrot.lane.b32.xlu1 %v2060_v29, %s4862_s12  ;;  %2054 = vrot.lane.b32.xlu0 %v2052_v44, %s4862_s12  ;;  %v4628_v29 = vmul.f32 %v4259_v35, %v2123_v10  ;;  %v4631_v44 = vmul.f32 %v4259_v35, %v2115_v16  ;;  %v1608_v1 = vstv %s4594_s26  ;;  %v1620_v22 = vstv %s4633_s23  ;;  %s4688_s25 = sld [smem:[#allocation2 + $0x11e]] }
 0x1b7   : > { %v1616_v10 = vstv %s4640_s3  ;;  %s4693_s0 = sld [smem:[#allocation2 + $0xdf]] }
 0x1b8   : > { %v1475_v49 = vpop.permute.xlu1 %1474  ;;  %v1467_v38 = vpop.permute.xlu0 %1466  ;;  %s4699_s17 = sld [smem:[#allocation2 + $0xde]] }
 0x1b9   : > { %v1477_v37 = vadd.f32 %v1475_v49, %v4474_v23  ;;  %v1469_v55 = vadd.f32 %v1467_v38, %v4480_v45  ;;  %v4625_v23 = vmul.f32 %v4967_v31, %v1589_v20  ;;  %v1605_v45 = vmul.f32 %v4158_v26, %v1604_v17  ;;  %s4970_s10 = sld [smem:[#allocation12_spill]] (%p2981_p5) }
 0x1ba   : > { %2078 = vrot.lane.b32.xlu1 %v2076_v53, %s4862_s12  ;;  %2070 = vrot.lane.b32.xlu0 %v2068_v5, %s4862_s12  ;;  %v1601_v5 = vmul.f32 %v4158_v26, %v1600_v60  ;;  %v1609_v20 = vmul.f32 %v4158_v26, %v1608_v1  ;;  %v1644_v49 = vmul.f32 %v4259_v35, %v1643_v56  ;;  %v1651_v60 = vstv %s4663_s6  ;;  %s4971_s27 = sld [smem:[#allocation11_spill]] (%p2981_p5) }
 0x1bb   : > { %v1536_v42 = vadd.f32 %v4512_v12, %v1477_v37  ;;  %v1532_v31 = vadd.f32 %v4518_v30, %v1469_v55  ;;  %v1612_v12 = vstv %s4577_s29  ;;  %v1640_v30 = vmul.f32 %v4259_v35, %v1639_v4  ;;  %s4972_s20 = sld [smem:[#allocation77_spill]] (%p2981_p5) }
 0x1bc   : > { %v1491_v63 = vpop.permute.xlu1 %1490  ;;  %v1483_v39 = vpop.permute.xlu0 %1482  ;;  %v1613_v27 = vmul.f32 %v4158_v26, %v1612_v12  ;;  %v2148_v37 = vmul.f32 %v4259_v35, %v2147_v8  ;;  %v1621_v38 = vmul.f32 %v4158_v26, %v1620_v22 }
 0x1bd   : > { %v1571_v28 = vadd.f32 %v4515_v46, %v1536_v42  ;;  %v1493_v24 = vadd.f32 %v1491_v63, %v4500_v6  ;;  %v1567_v33 = vadd.f32 %v4524_v15, %v1532_v31  ;;  %v1485_v53 = vadd.f32 %v1483_v39, %v4508_v41 }
 0x1be   : > { %2094 = vrot.lane.b32.xlu1 %v2092_v43, %s4862_s12  ;;  %2086 = vrot.lane.b32.xlu0 %v4569_v14, %s4862_s12  ;;  %v1636_v6 = vmul.f32 %v4259_v35, %v1635_v34  ;;  %v2140_v15 = vmul.f32 %v4259_v35, %v2139_v47  ;;  %v2132_v41 = vmul.f32 %v4259_v35, %v2131_v18  ;;  %v1655_v42 = vstv %s4655_s18 }
 0x1bf   : > { %v1544_v46 = vadd.f32 %v4552_v0, %v1493_v24  ;;  %v1540_v2 = vadd.f32 %v4560_v52, %v1485_v53  ;;  %v1648_v0 = vmul.f32 %v4259_v35, %v1647_v58  ;;  %v1602_v16 = vadd.f32 %v1601_v5, %v1567_v33  ;;  %s2723_s28 = sshll.u32 (%p2981_p5), %s4970_s10, 4 }
 0x1c0   : > { %v1507_v43 = vpop.permute.xlu1 %1506  ;;  %v1499_v32 = vpop.permute.xlu0 %1498  ;;  %v2171_v39 = vstv %s4682_s15  ;;  %s2202_s30 = sadd.s32 (%p2981_p5), %s4971_s27, %s2723_s28 }
 0x1c1   : > { %v1579_v14 = vadd.f32 %v4558_v40, %v1544_v46  ;;  %v1509_v61 = vadd.f32 %v1507_v43, %v4538_v19  ;;  %v1575_v52 = vadd.f32 %v4563_v11, %v1540_v2  ;;  %v1501_v48 = vadd.f32 %v1499_v32, %v4546_v62  ;;  %s2724_s21 = sshll.u32 (%p2981_p5), %s2202_s30, 3 }
 0x1c2   : > { %2110 = vrot.lane.b32.xlu1 %v2108_v54, %s4862_s12  ;;  %2102 = vrot.lane.b32.xlu0 %v2100_v59, %s4862_s12  ;;  %v1606_v19 = vadd.f32 %v1605_v45, %v1571_v28  ;;  %v2156_v54 = vmul.f32 %v4259_v35, %v2155_v51  ;;  %v1624_v28 = vstv %s4675_s19  ;;  %v1663_v46 = vstv %s4693_s0  ;;  %s2204_s1 = scalar_lea.vmem (%p2981_p5), %s4972_s20, %s2724_s21 }
 0x1c3   : > { %v1552_v40 = vadd.f32 %v4571_v13, %v1509_v61  ;;  %v1548_v11 = vadd.f32 %v4597_v21, %v1501_v48  ;;  %v1614_v4 = vadd.f32 %v1613_v27, %v1579_v14  ;;  %v1610_v63 = vadd.f32 %v1609_v20, %v1575_v52 }
 0x1c4   : > { %v1523_v62 = vpop.permute.xlu1 %1522  ;;  %v1515_v17 = vpop.permute.xlu0 %1514  ;;  %v1641_v45 = vadd.f32 %v1640_v30, %v1606_v19  ;;  %v1659_v43 = vstv %s4699_s17  ;;  %v2172_v27 = vmul.f32 %v4259_v35, %v2171_v39  ;;  %v1664_v1 = vmul.f32 %v4259_v35, %v1663_v46 }
 0x1c5   : > { %v1587_v13 = vadd.f32 %v4574_v3, %v1552_v40  ;;  %v1525_v59 = vadd.f32 %v1523_v62, %v4580_v50  ;;  %v1583_v21 = vadd.f32 %v4605_v57, %v1548_v11  ;;  %v1517_v55 = vadd.f32 %v1515_v17, %v4588_v7 }
 0x1c6   : > { %2126 = vrot.lane.b32.xlu1 %v4628_v29, %s4862_s12  ;;  %v1617_v3 = vmul.f32 %v4158_v26, %v1616_v10  ;;  %2118 = vrot.lane.b32.xlu0 %v4631_v44, %s4862_s12  ;;  %v1637_v7 = vadd.f32 %v1636_v6, %v1602_v16  ;;  %v1628_v29 = vstv %s4669_s9  ;;  %v1649_v12 = vadd.f32 %v1648_v0, %v1614_v4 }
 0x1c7   : > { %v1560_v50 = vadd.f32 %v4613_v36, %v1525_v59  ;;  %v1556_v57 = vadd.f32 %v4618_v9, %v1517_v55  ;;  %v1656_v36 = vmul.f32 %v4259_v35, %v1655_v42  ;;  %v1652_v9 = vmul.f32 %v4259_v35, %v1651_v60 }
 0x1c8   : > { %v1679_v31 = vpop.permute.xlu1 %1678  ;;  %v1671_v18 = vpop.permute.xlu0 %1670  ;;  %v1622_v58 = vadd.f32 %v1621_v38, %v1587_v13  ;;  %v1629_v33 = vmul.f32 %v4158_v26, %v1628_v29  ;;  %v1645_v30 = vadd.f32 %v1644_v49, %v1610_v63  ;;  %v1618_v5 = vadd.f32 %v1617_v3, %v1583_v21 }
 0x1c9   : > { %v1595_v34 = vadd.f32 %v4616_v25, %v1560_v50  ;;  %v1681_v47 = vadd.f32 %v1679_v31, %v1641_v45  ;;  %v1591_v44 = vadd.f32 %v4625_v23, %v1556_v57  ;;  %v1673_v24 = vadd.f32 %v1671_v18, %v1637_v7 }
 0x1ca   : > { %2142 = vrot.lane.b32.xlu1 %v2140_v15, %s4862_s12  ;;  %2134 = vrot.lane.b32.xlu0 %v2132_v41, %s4862_s12  ;;  %v2163_v25 = vstv %s4688_s25  ;;  %v1625_v23 = vmul.f32 %v4158_v26, %v1624_v28  ;;  %v1657_v41 = vadd.f32 %v1656_v36, %v1622_v58  ;;  %v1653_v32 = vadd.f32 %v1652_v9, %v1618_v5 }
 0x1cb   : > { %v2164_v0 = vmul.f32 %v4259_v35, %v2163_v25  ;;  %v1630_v14 = vadd.f32 %v1629_v33, %v1595_v34  ;;  %v1660_v26 = vmul.f32 %v4259_v35, %v1659_v43 }
 0x1cc   : > { %v1695_v53 = vpop.permute.xlu1 %1694  ;;  %v1687_v2 = vpop.permute.xlu0 %1686  ;;  %v1626_v56 = vadd.f32 %v1625_v23, %v1591_v44 }
 0x1cd   : > { %v1697_v6 = vadd.f32 %v1695_v53, %v1649_v12  ;;  %v1689_v15 = vadd.f32 %v1687_v2, %v1645_v30  ;;  %v1665_v8 = vadd.f32 %v1664_v1, %v1630_v14 }
 0x1ce   : > { %2158 = vrot.lane.b32.xlu1 %v2156_v54, %s4862_s12  ;;  %2150 = vrot.lane.b32.xlu0 %v2148_v37, %s4862_s12  ;;  %v1661_v40 = vadd.f32 %v1660_v26, %v1626_v56 }
 0x1d0   : > { %v1711_v61 = vpop.permute.xlu1 %1710  ;;  %v1703_v52 = vpop.permute.xlu0 %1702 }
 0x1d1   : > { %v1713_v51 = vadd.f32 %v1711_v61, %v1657_v41  ;;  %v1705_v48 = vadd.f32 %v1703_v52, %v1653_v32 }
 0x1d2   : > { %2174 = vrot.lane.b32.xlu1 %v2172_v27, %s4862_s12  ;;  %2166 = vrot.lane.b32.xlu0 %v2164_v0, %s4862_s12  ;;  %s4968_s12 = sld [smem:[#allocation9_spill]] }
 0x1d4   : > { %v1727_v22 = vpop.permute.xlu1 %1726  ;;  %v1719_v20 = vpop.permute.xlu0 %1718 }
 0x1d5   : > { %v1729_v19 = vadd.f32 %v1727_v22, %v1665_v8  ;;  %v1721_v10 = vadd.f32 %v1719_v20, %v1661_v40 }
 0x1d8   : > { %v1743_v11 = vpop.permute.xlu1 %1742  ;;  %v1735_v16 = vpop.permute.xlu0 %1734  ;;  %s198_s5 = sand.u32 1, %s4968_s12  }
 0x1d9   : > { %v1745_v62 = vadd.f32 %v1743_v11, %v1681_v47  ;;  %v1737_v49 = vadd.f32 %v1735_v16, %v1673_v24  ;;  %s2396_s7 = sshll.u32 %s198_s5, 6 }
 0x1da   : > { %s4739_s24 = scalar_lea.vmem [#allocation6], %s2396_s7 }
 0x1dc   : > { %v1759_v54 = vpop.permute.xlu1 %1758  ;;  %v1751_v13 = vpop.permute.xlu0 %1750 }
 0x1dd   : > { %v1761_v35 = vadd.f32 %v1759_v54, %v1697_v6  ;;  %v1753_v59 = vadd.f32 %v1751_v13, %v1689_v15 }
 0x1e0   : > { %v1775_v17 = vpop.permute.xlu1 %1774  ;;  %v1767_v38 = vpop.permute.xlu0 %1766 }
 0x1e1   : > { %v1777_v37 = vadd.f32 %v1775_v17, %v1713_v51  ;;  %v1769_v21 = vadd.f32 %v1767_v38, %v1705_v48 }
 0x1e4   : > { %v1791_v55 = vpop.permute.xlu1 %1790  ;;  %v1783_v3 = vpop.permute.xlu0 %1782 }
 0x1e5   : > { %v1793_v42 = vadd.f32 %v1791_v55, %v1729_v19  ;;  %v1785_v50 = vadd.f32 %v1783_v3, %v1721_v10 }
 0x1e8   : > { %v1807_v45 = vpop.permute.xlu1 %1806  ;;  %v1799_v60 = vpop.permute.xlu0 %1798 }
 0x1e9   : > { %v1809_v4 = vadd.f32 %v1807_v45, %v1745_v62  ;;  %v1801_v57 = vadd.f32 %v1799_v60, %v1737_v49 }
 0x1ec   : > { %v1823_v31 = vpop.permute.xlu1 %1822  ;;  %v1815_v63 = vpop.permute.xlu0 %1814 }
 0x1ed   : > { %v1825_v7 = vadd.f32 %v1823_v31, %v1761_v35  ;;  %v1817_v29 = vadd.f32 %v1815_v63, %v1753_v59 }
 0x1f0   : > { %v1839_v34 = vpop.permute.xlu1 %1838  ;;  %v1831_v18 = vpop.permute.xlu0 %1830 }
 0x1f1   : > { %v1841_v47 = vadd.f32 %v1839_v34, %v1777_v37  ;;  %v1833_v36 = vadd.f32 %v1831_v18, %v1769_v21 }
 0x1f4   : > { %v1855_v28 = vpop.permute.xlu1 %1854  ;;  %v1847_v24 = vpop.permute.xlu0 %1846 }
 0x1f5   : > { %v4734_v44 = vadd.f32 %v1855_v28, %v1793_v42  ;;  %v4736_v9 = vadd.f32 %v1847_v24, %v1785_v50 }
 0x1f8   : > { %v1871_v39 = vpop.permute.xlu1 %1870  ;;  %v1863_v12 = vpop.permute.xlu0 %1862 }
 0x1f9   : > { %v1873_v19 = vadd.f32 %v1871_v39, %v1809_v4  ;;  %v1865_v10 = vadd.f32 %v1863_v12, %v1801_v57 }
 0x1fc   : > { %v1887_v58 = vpop.permute.xlu1 %1886  ;;  %v1879_v25 = vpop.permute.xlu0 %1878 }
 0x1fd   : > { %v1889_v49 = vadd.f32 %v1887_v58, %v1825_v7  ;;  %v1881_v13 = vadd.f32 %v1879_v25, %v1817_v29 }
 0x200   : > { %v1903_v33 = vpop.permute.xlu1 %1902  ;;  %v1895_v53 = vpop.permute.xlu0 %1894 }
 0x201   : > { %v1905_v42 = vadd.f32 %v1903_v33, %v1841_v47  ;;  %v1897_v4 = vadd.f32 %v1895_v53, %v1833_v36 }
 0x204   : > { %v1919_v30 = vpop.permute.xlu1 %1918  ;;  %v1911_v5 = vpop.permute.xlu0 %1910 }
 0x205   : > { %v1921_v47 = vadd.f32 %v1919_v30, %v4734_v44  ;;  %v1913_v24 = vadd.f32 %v1911_v5, %v4736_v9 }
 0x208   : > { %v1935_v46 = vpop.permute.xlu1 %1934  ;;  %v1927_v23 = vpop.permute.xlu0 %1926 }
 0x209   : > { %v1937_v11 = vadd.f32 %v1935_v46, %v1873_v19  ;;  %v1929_v62 = vadd.f32 %v1927_v23, %v1865_v10 }
 0x20c   : > { %v1951_v6 = vpop.permute.xlu1 %1950  ;;  %v1943_v2 = vpop.permute.xlu0 %1942 }
 0x20d   : > { %v1953_v17 = vadd.f32 %v1951_v6, %v1889_v49  ;;  %v1945_v38 = vadd.f32 %v1943_v2, %v1881_v13 }
 0x210   : > { %v1967_v43 = vpop.permute.xlu1 %1966  ;;  %v1959_v15 = vpop.permute.xlu0 %1958 }
 0x211   : > { %v1969_v31 = vadd.f32 %v1967_v43, %v1905_v42  ;;  %v1961_v63 = vadd.f32 %v1959_v15, %v1897_v4 }
 0x214   : > { %v1983_v27 = vpop.permute.xlu1 %1982  ;;  %v1975_v41 = vpop.permute.xlu0 %1974 }
 0x215   : > { %v1985_v58 = vadd.f32 %v1983_v27, %v1921_v47  ;;  %v1977_v33 = vadd.f32 %v1975_v41, %v1913_v24 }
 0x218   : > { %v1999_v0 = vpop.permute.xlu1 %1998  ;;  %v1991_v1 = vpop.permute.xlu0 %1990 }
 0x219   : > { %v2001_v54 = vadd.f32 %v1999_v0, %v1937_v11  ;;  %v1993_v59 = vadd.f32 %v1991_v1, %v1929_v62 }
 0x21c   : > { %v2015_v14 = vpop.permute.xlu1 %2014  ;;  %v2007_v61 = vpop.permute.xlu0 %2006 }
 0x21d   : > { %v2017_v3 = vadd.f32 %v2015_v14, %v1953_v17  ;;  %v2009_v60 = vadd.f32 %v2007_v61, %v1945_v38 }
 0x220   : > { %v2031_v32 = vpop.permute.xlu1 %2030  ;;  %v2023_v26 = vpop.permute.xlu0 %2022 }
 0x221   : > { %v2033_v18 = vadd.f32 %v2031_v32, %v1969_v31  ;;  %v2025_v39 = vadd.f32 %v2023_v26, %v1961_v63 }
 0x224   : > { %v2047_v56 = vpop.permute.xlu1 %2046  ;;  %v2039_v51 = vpop.permute.xlu0 %2038 }
 0x225   : > { %v2049_v30 = vadd.f32 %v2047_v56, %v1985_v58  ;;  %v2041_v6 = vadd.f32 %v2039_v51, %v1977_v33 }
 0x228   : > { %v2063_v52 = vpop.permute.xlu1 %2062  ;;  %v2055_v48 = vpop.permute.xlu0 %2054 }
 0x229   : > { %v2065_v37 = vadd.f32 %v2063_v52, %v2001_v54  ;;  %v2057_v21 = vadd.f32 %v2055_v48, %v1993_v59 }
 0x22c   : > { %v2079_v8 = vpop.permute.xlu1 %2078  ;;  %v2071_v22 = vpop.permute.xlu0 %2070 }
 0x22d   : > { %v2081_v7 = vadd.f32 %v2079_v8, %v2017_v3  ;;  %v2073_v29 = vadd.f32 %v2071_v22, %v2009_v60 }
 0x230   : > { %v2095_v40 = vpop.permute.xlu1 %2094  ;;  %v2087_v20 = vpop.permute.xlu0 %2086 }
 0x231   : > { %v2097_v25 = vadd.f32 %v2095_v40, %v2033_v18  ;;  %v2089_v53 = vadd.f32 %v2087_v20, %v2025_v39 }
 0x234   : > { %v2111_v16 = vpop.permute.xlu1 %2110  ;;  %v2103_v35 = vpop.permute.xlu0 %2102 }
 0x235   : > { %v2113_v5 = vadd.f32 %v2111_v16, %v2049_v30  ;;  %v2105_v2 = vadd.f32 %v2103_v35, %v2041_v6 }
 0x238   : > { %v2127_v55 = vpop.permute.xlu1 %2126  ;;  %v2119_v45 = vpop.permute.xlu0 %2118 }
 0x239   : > { %v2129_v50 = vadd.f32 %v2127_v55, %v2065_v37  ;;  %v2121_v57 = vadd.f32 %v2119_v45, %v2057_v21 }
 0x23b   : > { %2715 = vst.msk [vmem:[%s4739_s24 + $0x8] sm:$0xff] %vm2178_vm0, %v2129_v50  ;;  %2179 = vst.msk [vmem:[%s4739_s24] sm:$0xff] %vm2178_vm0, %v2121_v57 }
 0x23c   : > { %v2143_v34 = vpop.permute.xlu1 %2142  ;;  %v2135_v28 = vpop.permute.xlu0 %2134 }
 0x23d   : > { %v2145_v36 = vadd.f32 %v2143_v34, %v2081_v7  ;;  %v2137_v12 = vadd.f32 %v2135_v28, %v2073_v29 }
 0x23f   : > { %2717 = vst.msk [vmem:[%s4739_s24 + $0x18] sm:$0xff] %vm2178_vm0, %v2145_v36  ;;  %2716 = vst.msk [vmem:[%s4739_s24 + $0x10] sm:$0xff] %vm2178_vm0, %v2137_v12 }
 0x240   : > { %v2159_v44 = vpop.permute.xlu1 %2158  ;;  %v2151_v23 = vpop.permute.xlu0 %2150 }
 0x241   : > { %v2161_v46 = vadd.f32 %v2159_v44, %v2097_v25  ;;  %v2153_v9 = vadd.f32 %v2151_v23, %v2089_v53 }
 0x242   : > { %v2247_v0 = vld [vmem:[%s4739_s24] sm:$0xff] (%p2981_p5)  ;;  %v2249_v1 = vld [vmem:[%s4739_s24 + $0x8] sm:$0xff] (%p2981_p5) }
 0x243   : > { %2719 = vst.msk [vmem:[%s4739_s24 + $0x28] sm:$0xff] %vm2178_vm0, %v2161_v46  ;;  %2718 = vst.msk [vmem:[%s4739_s24 + $0x20] sm:$0xff] %vm2178_vm0, %v2153_v9  ;;  %2200 = sbr.rel (!%p2981_p5) target bundleno = 592 (0x250), region = 44 }
 0x244   : > { %v2175_v43 = vpop.permute.xlu1 %2174  ;;  %v2167_v27 = vpop.permute.xlu0 %2166  ;;  %2248 = vst [vmem:[%s2204_s1] sm:$0xff] (%p2981_p5), %v2247_v0  ;;  %2250 = vst [vmem:[%s2204_s1 + $0x10] sm:$0xff] (%p2981_p5), %v2249_v1 }
 0x245   : > { %v2177_v15 = vadd.f32 %v2175_v43, %v2113_v5  ;;  %v2169_v41 = vadd.f32 %v2167_v27, %v2105_v2 }
 0x246   : > { %v2251_v14 = vld [vmem:[%s4739_s24 + $0x10] sm:$0xff] (%p2981_p5)  ;;  %v2253_v61 = vld [vmem:[%s4739_s24 + $0x18] sm:$0xff] (%p2981_p5) }
 0x247   : > { %2721 = vst.msk [vmem:[%s4739_s24 + $0x38] sm:$0xff] %vm2178_vm0, %v2177_v15  ;;  %2720 = vst.msk [vmem:[%s4739_s24 + $0x30] sm:$0xff] %vm2178_vm0, %v2169_v41 }
 0x248   : > { %2252 = vst [vmem:[%s2204_s1 + $0x20] sm:$0xff] %v2251_v14  ;;  %2254 = vst [vmem:[%s2204_s1 + $0x30] sm:$0xff] %v2253_v61 }
 0x24a   : > { %v2255_v32 = vld [vmem:[%s4739_s24 + $0x20] sm:$0xff]  ;;  %v2257_v26 = vld [vmem:[%s4739_s24 + $0x28] sm:$0xff] }
 0x24b   : > { %2256 = vst [vmem:[%s2204_s1 + $0x40] sm:$0xff] %v2255_v32  ;;  %2258 = vst [vmem:[%s2204_s1 + $0x50] sm:$0xff] %v2257_v26 }
 0x24e   : > { %v2259_v56 = vld [vmem:[%s4739_s24 + $0x30] sm:$0xff]  ;;  %v2261_v51 = vld [vmem:[%s4739_s24 + $0x38] sm:$0xff] }
 0x24f   : > { %2260 = vst [vmem:[%s2204_s1 + $0x60] sm:$0xff] %v2259_v56  ;;  %2262 = vst [vmem:[%s2204_s1 + $0x70] sm:$0xff] %v2261_v51 }
 0x250 PF: > { %s4973_s11 = sld [smem:[#allocation15_spill]] }
 0x251   : > { %s4974_s12 = sld [smem:[#allocation10_spill]] }
 0x252   : > { %s4975_s13 = sld [smem:[#allocation19_spill]] }
 0x253   : > { %s4976_s14 = sld [smem:[#allocation13_spill]] }
 0x254   : > { %s4977_s15 = sld [smem:[#allocation14_spill]] }
 0x255   : > { %s4978_s16 = sld [smem:[#allocation16_spill]] }
 0x256   : > { %s15_s18 = sadd.s32 1, %s4973_s11   ;;  %s4979_s17 = sld [smem:[#allocation18_spill]] }
 0x257   : > { %p12_p5 = scmp.ge.s32.totalorder %s15_s18, 6  }
 0x259   :  { %14 = sbr.rel (!%p12_p5) target bundleno = 10 (0xa), region = 128 }
 0x25e   :  { %2278 = vsyncpa [#allocation3], 1 }
 0x25f   :  { %2280 = vsyncpa [#allocation3 + $0x1], 1 }
 0x260   :  { %2281 = vsyncpa [#allocation5], 1 }

</bundles_post_ra>
